<compile_context>
chip_gen: v7x
topology: tpu7x:2x2x1
jax: 0.10.0
libtpu: 0.0.40
codegen_flags: <defaults>
</compile_context>

<pallas_src>
import functools

import jax
import jax.numpy as jnp
from jax import lax
from jax.experimental import pallas as pl
from jax.experimental.pallas import tpu as pltpu

# ---------------------------------------------------------------------------
# Small, module-consistent problem sizes
# ---------------------------------------------------------------------------
B = 2                       # batch
CIN = 3                     # in_channels (module default 3)
HS = WS = 16                # input spatial size
FEAT = 32                   # in_features of the (synthetic) CNN backbone
LAT = 32                    # hidden_units == latent_units (small stand-in for 300)
HIDDEN_DIMS = (LAT, 128, 64, 32, 16)   # default [latent_units, 128, 64, 32, 16]
KH = KW = 3
BN_EPS = 1e-5
NEG_SLOPE = 0.01            # nn.LeakyReLU default
ENC_K = 32                  # 27 im2col cols + 1 bias col + 4 zero-pad cols
SLAB = FEAT + 3 * LAT       # 128 : lane-dense encoder output slab
OUT_HW = 2 ** len(HIDDEN_DIMS)   # 32 : reconstruction spatial size

_VMEM = pl.BlockSpec(memory_space=pltpu.MemorySpace.VMEM)


# ---------------------------------------------------------------------------
# Shared elementwise epilogue (f32 on all chip generations)
# ---------------------------------------------------------------------------
def _apply_act(y, act):
    if act == "relu":
        return jnp.maximum(y, 0.0)
    if act == "leaky_relu":
        return jnp.where(y > 0.0, y, NEG_SLOPE * y)
    if act == "tanh":
        return jnp.tanh(y)
    return y


# ---------------------------------------------------------------------------
# Pallas kernels
# ---------------------------------------------------------------------------
def _encoder_kernel(patches_ref,   # (B*HS*WS, ENC_K) bf16 im2col (+ones+zeros)
                    convw_ref,     # (ENC_K, FEAT)    bf16, conv bias in row 27
                    pool_ref,      # (B, B*HS*WS)     f32 block-diag 1/(HS*WS)
                    w_both_ref,    # (FEAT, 2*LAT)    bf16, BN folded [mu|log_var]
                    b_both_ref,    # (1, 2*LAT)       f32 folded biases
                    eps_ref,       # (B, LAT)         f32
                    dec0w_ref,     # (LAT, 4*HD1)     bf16 fused 1x1 ConvT block
                    dec0b_ref,     # (1, 4*HD1)       f32
                    out_ref,       # (B, SLAB)        f32  [feats|mu|log_var|z]
                    dec0_ref):     # (B, 4*HD1)       bf16 first decoder output
    # feature extractor: conv-as-matmul (bias folded via ones column) + ReLU
    conv = jnp.dot(patches_ref[...], convw_ref[...],
                   preferred_element_type=jnp.float32)
    conv = jnp.maximum(conv, 0.0)                              # (B*HS*WS, FEAT)

    # AdaptiveAvgPool2d((1,1)) + squeeze, as an MXU dot (no reshape / XLU reduce)
    feats = jnp.dot(pool_ref[...], conv,
                    preferred_element_type=jnp.float32)        # (B, FEAT)

    # mu_layer & log_var_layer fused: Linear (+folded BatchNorm1d) -> Tanh
    # TODO(synk): Dropout(p=0.0) is identity at inference; no op emitted.
    h = jnp.dot(feats.astype(jnp.bfloat16), w_both_ref[...],
                preferred_element_type=jnp.float32) + b_both_ref[...]
    h = jnp.tanh(h)                                            # (B, 2*LAT)
    mu = h[:, :LAT]
    log_var = h[:, LAT:]

    # reparameterize: z = mu + sqrt(exp(log_var)) * eps
    z = mu + jnp.exp(0.5 * log_var) * eps_ref[...]

    # first decoder block (ConvTranspose on a 1x1 map == plain matmul) fused in
    d0 = jnp.dot(z.astype(jnp.bfloat16), dec0w_ref[...],
                 preferred_element_type=jnp.float32) + dec0b_ref[...]
    d0 = jnp.where(d0 > 0.0, d0, NEG_SLOPE * d0)               # LeakyReLU

    # lane-dense outputs
    out_ref[:, :FEAT] = feats
    out_ref[:, FEAT:FEAT + 2 * LAT] = h
    out_ref[:, FEAT + 2 * LAT:] = z
    dec0_ref[...] = d0.astype(dec0_ref.dtype)


def _mm_kernel(p_ref, w_ref, b_ref, o_ref, *, act):
    # generic conv / conv-transpose block: matmul + folded BN/bias + activation
    y = jnp.dot(p_ref[...], w_ref[...], preferred_element_type=jnp.float32)
    y = y + b_ref[...]
    o_ref[...] = _apply_act(y, act).astype(o_ref.dtype)


# ---------------------------------------------------------------------------
# Layout glue (wrapper-side XLA): im2col, phase packing, weight folding
# ---------------------------------------------------------------------------
def _im2col3x3(xpad):
    # xpad: (B, H+2, W+2, C) -> (B*H*W, 9*C); tap order (kh, kw), channels last
    b, hp, wp, c = xpad.shape
    h, w = hp - 2, wp - 2
    taps = [xpad[:, i:i + h, j:j + w, :] for i in range(KH) for j in range(KW)]
    return jnp.concatenate(taps, axis=-1).reshape(b * h * w, KH * KW * c)


def _encoder_patches(x_nchw):
    x = jnp.transpose(x_nchw, (0, 2, 3, 1))                    # NHWC
    xp = jnp.pad(x, ((0, 0), (1, 1), (1, 1), (0, 0)))
    p = _im2col3x3(xp)                                         # (B*HS*WS, 27)
    ones = jnp.ones((p.shape[0], 1), p.dtype)                  # bias column
    zeros = jnp.zeros((p.shape[0], ENC_K - KH * KW * CIN - 1), p.dtype)
    return jnp.concatenate([p, ones, zeros], axis=-1).astype(jnp.bfloat16)


def _convT_patches(x, dtype=jnp.bfloat16):
    # 2x2 "forward" patches for the 4-phase ConvTranspose: row (a,b) holds
    # [x(a,b), x(a,b+1), x(a+1,b), x(a+1,b+1)], zero-padded at the far edges.
    b, h, w, c = x.shape
    xp = jnp.pad(x, ((0, 0), (0, 1), (0, 1), (0, 0)))
    taps = [xp[:, :h, :w, :], xp[:, :h, 1:, :],
            xp[:, 1:, :w, :], xp[:, 1:, 1:, :]]
    return jnp.concatenate(taps, axis=-1).reshape(b * h * w, 4 * c).astype(dtype)


def _phase_interleave(y, b, h, w, cout):
    # (B*H*W, 4*Cout) phase-grouped [(0,0),(0,1),(1,0),(1,1)] -> (B, 2H, 2W, Cout)
    y = y.reshape(b, h, w, 2, 2, cout)
    y = jnp.transpose(y, (0, 1, 3, 2, 4, 5))
    return y.reshape(b, 2 * h, 2 * w, cout)


def _conv_w_to_mat(w_oikk):
    # torch Conv2d weight (Cout, Cin, KH, KW) -> (9*Cin, Cout)
    cout, cin = w_oikk.shape[0], w_oikk.shape[1]
    return jnp.transpose(w_oikk, (2, 3, 1, 0)).reshape(KH * KW * cin, cout)


def _convT_phase_mat(w_iokk):
    # torch ConvTranspose2d weight (Cin, Cout, 3, 3) -> (4*Cin, 4*Cout) block
    # matrix.  Row blocks = input taps (da, db); column blocks = output phases
    # (py, px); block (da,db)->(py,px) is w[:, :, 1+py-2*da, 1+px-2*db] or 0.
    cin, cout = w_iokk.shape[0], w_iokk.shape[1]
    rows = []
    for da in (0, 1):
        for db in (0, 1):
            cols = []
            for py in (0, 1):
                for px in (0, 1):
                    ky, kx = 1 + py - 2 * da, 1 + px - 2 * db
                    if 0 <= ky < KH and 0 <= kx < KW:
                        cols.append(w_iokk[:, :, ky, kx])
                    else:
                        cols.append(jnp.zeros((cin, cout), w_iokk.dtype))
            rows.append(jnp.concatenate(cols, axis=1))
    return jnp.concatenate(rows, axis=0)


# reference lowering (zero-dilate + flipped 3x3 conv) kept only for the
# wrapper-side self-check of the 4-phase decomposition.
def _dilate_pad_s2(x):
    b, h, w, c = x.shape
    y = jnp.zeros((b, 2 * h - 1, 2 * w - 1, c), x.dtype)
    y = y.at[:, ::2, ::2, :].set(x)
    return jnp.pad(y, ((0, 0), (1, 2), (1, 2), (0, 0)))


def _convT_w_to_mat(w_iokk):
    cin, cout = w_iokk.shape[0], w_iokk.shape[1]
    w = jnp.flip(w_iokk, axis=(2, 3))
    w = jnp.transpose(w, (2, 3, 0, 1))
    return w.reshape(KH * KW * cin, cout)


def _bn_fold(gamma, beta, mean, var):
    s = gamma * jax.lax.rsqrt(var + BN_EPS)
    return s, beta - mean * s


def _fold_linear(w_oi, b_o, gamma, beta, mean, var):
    s, b0 = _bn_fold(gamma, beta, mean, var)
    return w_oi.T * s[None, :], b_o * s + b0


def _fold_convT_phase(w_iokk, bias, gamma, beta, mean, var):
    s, b0 = _bn_fold(gamma, beta, mean, var)
    wm = _convT_phase_mat(w_iokk)                      # (4*Cin, 4*Cout)
    col_scale = jnp.tile(s, 4)                         # same BN per phase group
    col_bias = jnp.tile(bias * s + b0, 4)
    return ((wm * col_scale[None, :]).astype(jnp.bfloat16),
            col_bias[None, :].astype(jnp.float32))


# ---------------------------------------------------------------------------
# Pallas-backed blocks + pure-JAX mirrors (same dtype policy)
# ---------------------------------------------------------------------------
def _mm_block(patches, w, bias, act, out_dtype):
    return pl.pallas_call(
        functools.partial(_mm_kernel, act=act),
        out_shape=jax.ShapeDtypeStruct((patches.shape[0], w.shape[1]), out_dtype),
        in_specs=[_VMEM, _VMEM, _VMEM],
        out_specs=_VMEM,
    )(patches, w, bias)


def _convT_block(x_nhwc, w, bias):
    b, h, wd, _ = x_nhwc.shape
    y = _mm_block(_convT_patches(x_nhwc), w, bias, "leaky_relu", jnp.bfloat16)
    return _phase_interleave(y, b, h, wd, w.shape[1] // 4)


def _convT_block_ref(x_nhwc, w, bias):
    b, h, wd, _ = x_nhwc.shape
    p = _convT_patches(x_nhwc)
    y = jnp.dot(p, w, preferred_element_type=jnp.float32) + bias
    y = _apply_act(y, "leaky_relu").astype(jnp.bfloat16)
    return _phase_interleave(y, b, h, wd, w.shape[1] // 4)


# ---------------------------------------------------------------------------
# Parameter preparation (folding / casting) and deterministic init
# ---------------------------------------------------------------------------
def prepare_params(raw):
    prep = {}
    # encoder conv: bias folded via ones column, K padded 27 -> 32
    cw = _conv_w_to_mat(raw["enc_conv_w"])                     # (27, FEAT)
    cw = jnp.concatenate(
        [cw, raw["enc_conv_b"][None, :],
         jnp.zeros((ENC_K - cw.shape[0] - 1, FEAT), cw.dtype)], axis=0)
    prep["enc_w"] = cw.astype(jnp.bfloat16)                    # (32, FEAT)
    # global-average-pool as block-diagonal MXU matrix
    prep["pool"] = (jnp.repeat(jnp.eye(B, dtype=jnp.float32), HS * WS, axis=1)
                    / float(HS * WS))                          # (B, B*HS*WS)
    # mu / log_var heads: Linear + folded BatchNorm1d, fused into one matmul
    wmu, bmu = _fold_linear(raw["mu_w"], raw["mu_b"], raw["mu_gamma"],
                            raw["mu_beta"], raw["mu_mean"], raw["mu_var"])
    wlv, blv = _fold_linear(raw["lv_w"], raw["lv_b"], raw["lv_gamma"],
                            raw["lv_beta"], raw["lv_mean"], raw["lv_var"])
    prep["w_both"] = jnp.concatenate([wmu, wlv], axis=1).astype(jnp.bfloat16)
    prep["b_both"] = jnp.concatenate([bmu, blv])[None, :].astype(jnp.float32)
    # decoder ConvTranspose blocks (4-phase matrices) with folded BatchNorm2d
    dec = []
    for i in range(len(HIDDEN_DIMS) - 1):
        dec.append(_fold_convT_phase(
            raw[f"dec{i}_w"], raw[f"dec{i}_b"], raw[f"dec{i}_gamma"],
            raw[f"dec{i}_beta"], raw[f"dec{i}_mean"], raw[f"dec{i}_var"]))
    # first decoder block is fused into the encoder kernel: at 1x1 spatial
    # input only the (a,b) tap rows (first LAT rows) are ever non-zero.
    w0, b0 = dec[0]
    prep["dec0_w"] = w0[:LAT, :]                               # (LAT, 4*128)
    prep["dec0_b"] = b0
    prep["decoder"] = tuple(dec[1:])
    # final layer: ConvTranspose + BN + LeakyReLU, then Conv2d + Tanh
    prep["finT_w"], prep["finT_b"] = _fold_convT_phase(
        raw["finT_w"], raw["finT_b"], raw["finT_gamma"], raw["finT_beta"],
        raw["finT_mean"], raw["finT_var"])
    prep["finC_w"] = _conv_w_to_mat(raw["finC_w"]).astype(jnp.bfloat16)
    prep["finC_b"] = raw["finC_b"][None, :].astype(jnp.float32)
    return prep


def init_raw_params(key):
    ks = iter(jax.random.split(key, 64))

    def nrm(shape, scale):
        return jax.random.normal(next(ks), shape, jnp.float32) * scale

    # TODO(synk): the pretrained vgg19 `features` backbone is replaced by a
    # single synthetic 3x3 conv + ReLU (no torchvision weights in-script).
    raw = {
        "enc_conv_w": nrm((FEAT, CIN, KH, KW), 0.2),
        "enc_conv_b": nrm((FEAT,), 0.05),
        "mu_w": nrm((LAT, FEAT), 0.2), "mu_b": nrm((LAT,), 0.05),
        "mu_gamma": 1.0 + nrm((LAT,), 0.05), "mu_beta": nrm((LAT,), 0.05),
        "mu_mean": nrm((LAT,), 0.05), "mu_var": 1.0 + jnp.abs(nrm((LAT,), 0.05)),
        "lv_w": nrm((LAT, FEAT), 0.2), "lv_b": nrm((LAT,), 0.05),
        "lv_gamma": 1.0 + nrm((LAT,), 0.05), "lv_beta": nrm((LAT,), 0.05),
        "lv_mean": nrm((LAT,), 0.05), "lv_var": 1.0 + jnp.abs(nrm((LAT,), 0.05)),
    }
    for i, (cin, cout) in enumerate(zip(HIDDEN_DIMS[:-1], HIDDEN_DIMS[1:])):
        raw[f"dec{i}_w"] = nrm((cin, cout, KH, KW), 0.1)
        raw[f"dec{i}_b"] = nrm((cout,), 0.05)
        raw[f"dec{i}_gamma"] = 1.0 + nrm((cout,), 0.05)
        raw[f"dec{i}_beta"] = nrm((cout,), 0.05)
        raw[f"dec{i}_mean"] = nrm((cout,), 0.05)
        raw[f"dec{i}_var"] = 1.0 + jnp.abs(nrm((cout,), 0.05))
    cl = HIDDEN_DIMS[-1]
    raw["finT_w"] = nrm((cl, cl, KH, KW), 0.1)
    raw["finT_b"] = nrm((cl,), 0.05)
    raw["finT_gamma"] = 1.0 + nrm((cl,), 0.05)
    raw["finT_beta"] = nrm((cl,), 0.05)
    raw["finT_mean"] = nrm((cl,), 0.05)
    raw["finT_var"] = 1.0 + jnp.abs(nrm((cl,), 0.05))
    raw["finC_w"] = nrm((CIN, cl, KH, KW), 0.1)
    raw["finC_b"] = nrm((CIN,), 0.05)
    return raw


# ---------------------------------------------------------------------------
# Forward passes (Pallas and pure-JAX reference)
# ---------------------------------------------------------------------------
@jax.jit
def vae_forward(x_nchw, prep, eps):
    # --- encoder + mu/log_var + reparameterize + decoder[0] : ONE pallas_call
    patches = _encoder_patches(x_nchw)
    slab, dec0 = pl.pallas_call(
        _encoder_kernel,
        out_shape=(jax.ShapeDtypeStruct((B, SLAB), jnp.float32),
                   jax.ShapeDtypeStruct((B, 4 * HIDDEN_DIMS[1]), jnp.bfloat16)),
        in_specs=[_VMEM] * 8,
        out_specs=(_VMEM, _VMEM),
    )(patches, prep["enc_w"], prep["pool"], prep["w_both"], prep["b_both"],
      eps, prep["dec0_w"], prep["dec0_b"])
    feats = slab[:, :FEAT]
    mu = slab[:, FEAT:FEAT + LAT]
    log_var = slab[:, FEAT + LAT:FEAT + 2 * LAT]
    z = slab[:, FEAT + 2 * LAT:]

    # --- remaining decoder blocks: one 4-phase matmul kernel each ------------
    h = _phase_interleave(dec0, B, 1, 1, HIDDEN_DIMS[1])       # (B, 2, 2, 128)
    for w, bias in prep["decoder"]:
        h = _convT_block(h, w, bias)
    # --- final layer: ConvT + BN + LeakyReLU, then Conv2d + Tanh -------------
    h = _convT_block(h, prep["finT_w"], prep["finT_b"])        # (B, 32, 32, 16)
    hp = jnp.pad(h, ((0, 0), (1, 1), (1, 1), (0, 0)))
    rec = _mm_block(_im2col3x3(hp).astype(jnp.bfloat16),
                    prep["finC_w"], prep["finC_b"], "tanh", jnp.float32)
    rec = rec.reshape(B, OUT_HW, OUT_HW, CIN)

    reconstruction = jnp.transpose(rec, (0, 3, 1, 2))          # NHWC -> NCHW
    return reconstruction, feats, z.reshape(B, LAT, 1, 1), mu, log_var


@jax.jit
def vae_forward_ref(x_nchw, prep, eps):
    patches = _encoder_patches(x_nchw)
    conv = jnp.maximum(jnp.dot(patches, prep["enc_w"],
                               preferred_element_type=jnp.float32), 0.0)
    feats = jnp.dot(prep["pool"], conv, preferred_element_type=jnp.float32)
    h = jnp.tanh(jnp.dot(feats.astype(jnp.bfloat16), prep["w_both"],
                         preferred_element_type=jnp.float32) + prep["b_both"])
    mu, log_var = h[:, :LAT], h[:, LAT:]
    z = mu + jnp.exp(0.5 * log_var) * eps
    d0 = jnp.dot(z.astype(jnp.bfloat16), prep["dec0_w"],
                 preferred_element_type=jnp.float32) + prep["dec0_b"]
    d0 = _apply_act(d0, "leaky_relu").astype(jnp.bfloat16)
    a = _phase_interleave(d0, B, 1, 1, HIDDEN_DIMS[1])
    for w, bias in prep["decoder"]:
        a = _convT_block_ref(a, w, bias)
    a = _convT_block_ref(a, prep["finT_w"], prep["finT_b"])
    ap = jnp.pad(a, ((0, 0), (1, 1), (1, 1), (0, 0)))
    rec = jnp.tanh(jnp.dot(_im2col3x3(ap).astype(jnp.bfloat16), prep["finC_w"],
                           preferred_element_type=jnp.float32) + prep["finC_b"])
    rec = rec.reshape(B, OUT_HW, OUT_HW, CIN)
    return (jnp.transpose(rec, (0, 3, 1, 2)), feats,
            z.reshape(B, LAT, 1, 1), mu, log_var)


# ---------------------------------------------------------------------------
if __name__ == "__main__":
    key = jax.random.PRNGKey(0)
    kx, kp, ke = jax.random.split(key, 3)
    x = jax.random.normal(kx, (B, CIN, HS, WS), jnp.float32)   # NCHW like PyTorch
    raw = init_raw_params(kp)
    prep = prepare_params(raw)
    # TODO(synk): eps is sampled with jax.random in the wrapper (deterministic)
    # instead of torch.distributions / in-kernel PRNG.
    eps = jax.random.normal(ke, (B, LAT), jnp.float32)

    # f32 self-check: 4-phase ConvTranspose lowering == zero-dilate + flip conv
    xchk = jax.random.normal(jax.random.PRNGKey(1),
                             (1, 4, 4, HIDDEN_DIMS[1]), jnp.float32)
    wchk, bchk = raw["dec1_w"], raw["dec1_b"]
    y_phase = _phase_interleave(
        jnp.dot(_convT_patches(xchk, jnp.float32), _convT_phase_mat(wchk),
                precision=lax.Precision.HIGHEST) + jnp.tile(bchk, 4)[None, :],
        1, 4, 4, wchk.shape[1])
    y_dil = (jnp.dot(_im2col3x3(_dilate_pad_s2(xchk)), _convT_w_to_mat(wchk),
                     precision=lax.Precision.HIGHEST)
             + bchk[None, :]).reshape(1, 8, 8, wchk.shape[1])
    assert jnp.allclose(y_phase, y_dil, rtol=1e-3, atol=1e-3)

    out = vae_forward(x, prep, eps)
    jax.block_until_ready(out)
    recon, feats, z, mu, log_var = out

    assert recon.shape == (B, CIN, OUT_HW, OUT_HW)
    assert feats.shape == (B, FEAT)
    assert z.shape == (B, LAT, 1, 1)
    assert mu.shape == (B, LAT) and log_var.shape == (B, LAT)
    assert bool(jnp.all(jnp.isfinite(recon)))
    assert bool(jnp.all(jnp.abs(recon) <= 1.0))                 # Tanh output

    ref = vae_forward_ref(x, prep, eps)
    jax.block_until_ready(ref)
    for got, want in zip(out, ref):
        assert jnp.allclose(got.astype(jnp.float32), want.astype(jnp.float32),
                            rtol=2e-2, atol=2e-2)

    print("KERNEL_OK")
</pallas_src>

<mosaic_0001>
module attributes {stable_mosaic.version = 11 : i64} {
  func.func @_encoder_kernel(%arg0: memref<512x32xbf16, #tpu.memory_space<vmem>>, %arg1: memref<32x32xbf16, #tpu.memory_space<vmem>>, %arg2: memref<2x512xf32, #tpu.memory_space<vmem>>, %arg3: memref<32x64xbf16, #tpu.memory_space<vmem>>, %arg4: memref<1x64xf32, #tpu.memory_space<vmem>>, %arg5: memref<2x32xf32, #tpu.memory_space<vmem>>, %arg6: memref<32x512xbf16, #tpu.memory_space<vmem>>, %arg7: memref<1x512xf32, #tpu.memory_space<vmem>>, %arg8: memref<2x128xf32, #tpu.memory_space<vmem>>, %arg9: memref<2x512xbf16, #tpu.memory_space<vmem>>) attributes {dimension_semantics = [], scalar_prefetch = 0 : i64, scratch_operands = 0 : i64, tpu.core_type = #tpu.core_type<tc>} {
    %c0 = arith.constant 0 : index
    %c0_0 = arith.constant 0 : index
    %0 = vector.load %arg0[%c0, %c0_0] : memref<512x32xbf16, #tpu.memory_space<vmem>>, vector<512x32xbf16>
    %c0_1 = arith.constant 0 : index
    %c0_2 = arith.constant 0 : index
    %1 = vector.load %arg1[%c0_1, %c0_2] : memref<32x32xbf16, #tpu.memory_space<vmem>>, vector<32x32xbf16>
    %cst = arith.constant dense<0.000000e+00> : vector<512x32xf32>
    %2 = tpu.matmul %0, %1, %cst {dimension_numbers = #tpu.dot_dimension_numbers<[1], [0], [0], [1], [0, 0, 1, 1], [], []>} : vector<512x32xbf16>, vector<32x32xbf16>, vector<512x32xf32> -> vector<512x32xf32>
    %cst_3 = arith.constant 0.000000e+00 : f32
    %3 = vector.broadcast %cst_3 : f32 to vector<512x32xf32>
    %4 = arith.maximumf %2, %3 : vector<512x32xf32>
    %c0_4 = arith.constant 0 : index
    %c0_5 = arith.constant 0 : index
    %5 = vector.load %arg2[%c0_4, %c0_5] : memref<2x512xf32, #tpu.memory_space<vmem>>, vector<2x512xf32>
    %cst_6 = arith.constant dense<0.000000e+00> : vector<2x32xf32>
    %6 = tpu.matmul %5, %4, %cst_6 {dimension_numbers = #tpu.dot_dimension_numbers<[1], [0], [0], [1], [0, 0, 1, 1], [], []>} : vector<2x512xf32>, vector<512x32xf32>, vector<2x32xf32> -> vector<2x32xf32>
    %7 = arith.truncf %6 : vector<2x32xf32> to vector<2x32xbf16>
    %c0_7 = arith.constant 0 : index
    %c0_8 = arith.constant 0 : index
    %8 = vector.load %arg3[%c0_7, %c0_8] : memref<32x64xbf16, #tpu.memory_space<vmem>>, vector<32x64xbf16>
    %cst_9 = arith.constant dense<0.000000e+00> : vector<2x64xf32>
    %9 = tpu.matmul %7, %8, %cst_9 {dimension_numbers = #tpu.dot_dimension_numbers<[1], [0], [0], [1], [0, 0, 1, 1], [], []>} : vector<2x32xbf16>, vector<32x64xbf16>, vector<2x64xf32> -> vector<2x64xf32>
    %c0_10 = arith.constant 0 : index
    %c0_11 = arith.constant 0 : index
    %10 = vector.load %arg4[%c0_10, %c0_11] : memref<1x64xf32, #tpu.memory_space<vmem>>, vector<1x64xf32>
    %11 = vector.broadcast %10 : vector<1x64xf32> to vector<2x64xf32>
    %12 = arith.addf %9, %11 : vector<2x64xf32>
    %13 = math.tanh %12 : vector<2x64xf32>
    %14 = vector.extract_strided_slice %13 {offsets = [0, 0], sizes = [2, 32], strides = [1, 1]} : vector<2x64xf32> to vector<2x32xf32>
    %15 = vector.extract_strided_slice %13 {offsets = [0, 32], sizes = [2, 32], strides = [1, 1]} : vector<2x64xf32> to vector<2x32xf32>
    %cst_12 = arith.constant 5.000000e-01 : f32
    %16 = vector.broadcast %cst_12 : f32 to vector<2x32xf32>
    %17 = arith.mulf %16, %15 : vector<2x32xf32>
    %18 = math.exp %17 : vector<2x32xf32>
    %c0_13 = arith.constant 0 : index
    %c0_14 = arith.constant 0 : index
    %19 = vector.load %arg5[%c0_13, %c0_14] : memref<2x32xf32, #tpu.memory_space<vmem>>, vector<2x32xf32>
    %20 = arith.mulf %18, %19 : vector<2x32xf32>
    %21 = arith.addf %14, %20 : vector<2x32xf32>
    %22 = arith.truncf %21 : vector<2x32xf32> to vector<2x32xbf16>
    %c0_15 = arith.constant 0 : index
    %c0_16 = arith.constant 0 : index
    %23 = vector.load %arg6[%c0_15, %c0_16] : memref<32x512xbf16, #tpu.memory_space<vmem>>, vector<32x512xbf16>
    %cst_17 = arith.constant dense<0.000000e+00> : vector<2x512xf32>
    %24 = tpu.matmul %22, %23, %cst_17 {dimension_numbers = #tpu.dot_dimension_numbers<[1], [0], [0], [1], [0, 0, 1, 1], [], []>} : vector<2x32xbf16>, vector<32x512xbf16>, vector<2x512xf32> -> vector<2x512xf32>
    %c0_18 = arith.constant 0 : index
    %c0_19 = arith.constant 0 : index
    %25 = vector.load %arg7[%c0_18, %c0_19] : memref<1x512xf32, #tpu.memory_space<vmem>>, vector<1x512xf32>
    %26 = vector.broadcast %25 : vector<1x512xf32> to vector<2x512xf32>
    %27 = arith.addf %24, %26 : vector<2x512xf32>
    %cst_20 = arith.constant 0.000000e+00 : f32
    %28 = vector.broadcast %cst_20 : f32 to vector<2x512xf32>
    %29 = arith.cmpf ogt, %27, %28 : vector<2x512xf32>
    %cst_21 = arith.constant 0.00999999977 : f32
    %30 = vector.broadcast %cst_21 : f32 to vector<2x512xf32>
    %31 = arith.mulf %30, %27 : vector<2x512xf32>
    %32 = arith.select %29, %27, %31 : vector<2x512xi1>, vector<2x512xf32>
    %c0_22 = arith.constant 0 : index
    %c0_23 = arith.constant 0 : index
    %33 = vector.load %arg8[%c0_22, %c0_23] : memref<2x128xf32, #tpu.memory_space<vmem>>, vector<2x32xf32>
    tpu.vector_store %arg8[%c0_22, %c0_23], %6 {strides = array<i32>} : memref<2x128xf32, #tpu.memory_space<vmem>>, vector<2x32xf32>,
    %c0_24 = arith.constant 0 : index
    %c32 = arith.constant 32 : index
    %34 = vector.load %arg8[%c0_24, %c32] : memref<2x128xf32, #tpu.memory_space<vmem>>, vector<2x64xf32>
    tpu.vector_store %arg8[%c0_24, %c32], %13 {strides = array<i32>} : memref<2x128xf32, #tpu.memory_space<vmem>>, vector<2x64xf32>,
    %c0_25 = arith.constant 0 : index
    %c96 = arith.constant 96 : index
    %35 = vector.load %arg8[%c0_25, %c96] : memref<2x128xf32, #tpu.memory_space<vmem>>, vector<2x32xf32>
    tpu.vector_store %arg8[%c0_25, %c96], %21 {strides = array<i32>} : memref<2x128xf32, #tpu.memory_space<vmem>>, vector<2x32xf32>,
    %36 = arith.truncf %32 : vector<2x512xf32> to vector<2x512xbf16>
    %c0_26 = arith.constant 0 : index
    %c0_27 = arith.constant 0 : index
    %37 = vector.load %arg9[%c0_26, %c0_27] : memref<2x512xbf16, #tpu.memory_space<vmem>>, vector<2x512xbf16>
    tpu.vector_store %arg9[%c0_26, %c0_27], %36 {strides = array<i32>} : memref<2x512xbf16, #tpu.memory_space<vmem>>, vector<2x512xbf16>,
    return
  }
}

module attributes {stable_mosaic.version = 11 : i64} {
  func.func @_mm_kernel(%arg0: memref<8x512xbf16, #tpu.memory_space<vmem>>, %arg1: memref<512x256xbf16, #tpu.memory_space<vmem>>, %arg2: memref<1x256xf32, #tpu.memory_space<vmem>>, %arg3: memref<8x256xbf16, #tpu.memory_space<vmem>>) attributes {dimension_semantics = [], scalar_prefetch = 0 : i64, scratch_operands = 0 : i64, tpu.core_type = #tpu.core_type<tc>} {
    %c0 = arith.constant 0 : index
    %c0_0 = arith.constant 0 : index
    %0 = vector.load %arg0[%c0, %c0_0] : memref<8x512xbf16, #tpu.memory_space<vmem>>, vector<8x512xbf16>
    %c0_1 = arith.constant 0 : index
    %c0_2 = arith.constant 0 : index
    %1 = vector.load %arg1[%c0_1, %c0_2] : memref<512x256xbf16, #tpu.memory_space<vmem>>, vector<512x256xbf16>
    %cst = arith.constant dense<0.000000e+00> : vector<8x256xf32>
    %2 = tpu.matmul %0, %1, %cst {dimension_numbers = #tpu.dot_dimension_numbers<[1], [0], [0], [1], [0, 0, 1, 1], [], []>} : vector<8x512xbf16>, vector<512x256xbf16>, vector<8x256xf32> -> vector<8x256xf32>
    %c0_3 = arith.constant 0 : index
    %c0_4 = arith.constant 0 : index
    %3 = vector.load %arg2[%c0_3, %c0_4] : memref<1x256xf32, #tpu.memory_space<vmem>>, vector<1x256xf32>
    %4 = vector.broadcast %3 : vector<1x256xf32> to vector<8x256xf32>
    %5 = arith.addf %2, %4 : vector<8x256xf32>
    %cst_5 = arith.constant 0.000000e+00 : f32
    %6 = vector.broadcast %cst_5 : f32 to vector<8x256xf32>
    %7 = arith.cmpf ogt, %5, %6 : vector<8x256xf32>
    %cst_6 = arith.constant 0.00999999977 : f32
    %8 = vector.broadcast %cst_6 : f32 to vector<8x256xf32>
    %9 = arith.mulf %8, %5 : vector<8x256xf32>
    %10 = arith.select %7, %5, %9 : vector<8x256xi1>, vector<8x256xf32>
    %11 = arith.truncf %10 : vector<8x256xf32> to vector<8x256xbf16>
    %c0_7 = arith.constant 0 : index
    %c0_8 = arith.constant 0 : index
    %12 = vector.load %arg3[%c0_7, %c0_8] : memref<8x256xbf16, #tpu.memory_space<vmem>>, vector<8x256xbf16>
    tpu.vector_store %arg3[%c0_7, %c0_8], %11 {strides = array<i32>} : memref<8x256xbf16, #tpu.memory_space<vmem>>, vector<8x256xbf16>,
    return
  }
}

module attributes {stable_mosaic.version = 11 : i64} {
  func.func @_mm_kernel(%arg0: memref<32x256xbf16, #tpu.memory_space<vmem>>, %arg1: memref<256x128xbf16, #tpu.memory_space<vmem>>, %arg2: memref<1x128xf32, #tpu.memory_space<vmem>>, %arg3: memref<32x128xbf16, #tpu.memory_space<vmem>>) attributes {dimension_semantics = [], scalar_prefetch = 0 : i64, scratch_operands = 0 : i64, tpu.core_type = #tpu.core_type<tc>} {
    %c0 = arith.constant 0 : index
    %c0_0 = arith.constant 0 : index
    %0 = vector.load %arg0[%c0, %c0_0] : memref<32x256xbf16, #tpu.memory_space<vmem>>, vector<32x256xbf16>
    %c0_1 = arith.constant 0 : index
    %c0_2 = arith.constant 0 : index
    %1 = vector.load %arg1[%c0_1, %c0_2] : memref<256x128xbf16, #tpu.memory_space<vmem>>, vector<256x128xbf16>
    %cst = arith.constant dense<0.000000e+00> : vector<32x128xf32>
    %2 = tpu.matmul %0, %1, %cst {dimension_numbers = #tpu.dot_dimension_numbers<[1], [0], [0], [1], [0, 0, 1, 1], [], []>} : vector<32x256xbf16>, vector<256x128xbf16>, vector<32x128xf32> -> vector<32x128xf32>
    %c0_3 = arith.constant 0 : index
    %c0_4 = arith.constant 0 : index
    %3 = vector.load %arg2[%c0_3, %c0_4] : memref<1x128xf32, #tpu.memory_space<vmem>>, vector<1x128xf32>
    %4 = vector.broadcast %3 : vector<1x128xf32> to vector<32x128xf32>
    %5 = arith.addf %2, %4 : vector<32x128xf32>
    %cst_5 = arith.constant 0.000000e+00 : f32
    %6 = vector.broadcast %cst_5 : f32 to vector<32x128xf32>
    %7 = arith.cmpf ogt, %5, %6 : vector<32x128xf32>
    %cst_6 = arith.constant 0.00999999977 : f32
    %8 = vector.broadcast %cst_6 : f32 to vector<32x128xf32>
    %9 = arith.mulf %8, %5 : vector<32x128xf32>
    %10 = arith.select %7, %5, %9 : vector<32x128xi1>, vector<32x128xf32>
    %11 = arith.truncf %10 : vector<32x128xf32> to vector<32x128xbf16>
    %c0_7 = arith.constant 0 : index
    %c0_8 = arith.constant 0 : index
    %12 = vector.load %arg3[%c0_7, %c0_8] : memref<32x128xbf16, #tpu.memory_space<vmem>>, vector<32x128xbf16>
    tpu.vector_store %arg3[%c0_7, %c0_8], %11 {strides = array<i32>} : memref<32x128xbf16, #tpu.memory_space<vmem>>, vector<32x128xbf16>,
    return
  }
}

module attributes {stable_mosaic.version = 11 : i64} {
  func.func @_mm_kernel(%arg0: memref<128x128xbf16, #tpu.memory_space<vmem>>, %arg1: memref<128x64xbf16, #tpu.memory_space<vmem>>, %arg2: memref<1x64xf32, #tpu.memory_space<vmem>>, %arg3: memref<128x64xbf16, #tpu.memory_space<vmem>>) attributes {dimension_semantics = [], scalar_prefetch = 0 : i64, scratch_operands = 0 : i64, tpu.core_type = #tpu.core_type<tc>} {
    %c0 = arith.constant 0 : index
    %c0_0 = arith.constant 0 : index
    %0 = vector.load %arg0[%c0, %c0_0] : memref<128x128xbf16, #tpu.memory_space<vmem>>, vector<128x128xbf16>
    %c0_1 = arith.constant 0 : index
    %c0_2 = arith.constant 0 : index
    %1 = vector.load %arg1[%c0_1, %c0_2] : memref<128x64xbf16, #tpu.memory_space<vmem>>, vector<128x64xbf16>
    %cst = arith.constant dense<0.000000e+00> : vector<128x64xf32>
    %2 = tpu.matmul %0, %1, %cst {dimension_numbers = #tpu.dot_dimension_numbers<[1], [0], [0], [1], [0, 0, 1, 1], [], []>} : vector<128x128xbf16>, vector<128x64xbf16>, vector<128x64xf32> -> vector<128x64xf32>
    %c0_3 = arith.constant 0 : index
    %c0_4 = arith.constant 0 : index
    %3 = vector.load %arg2[%c0_3, %c0_4] : memref<1x64xf32, #tpu.memory_space<vmem>>, vector<1x64xf32>
    %4 = vector.broadcast %3 : vector<1x64xf32> to vector<128x64xf32>
    %5 = arith.addf %2, %4 : vector<128x64xf32>
    %cst_5 = arith.constant 0.000000e+00 : f32
    %6 = vector.broadcast %cst_5 : f32 to vector<128x64xf32>
    %7 = arith.cmpf ogt, %5, %6 : vector<128x64xf32>
    %cst_6 = arith.constant 0.00999999977 : f32
    %8 = vector.broadcast %cst_6 : f32 to vector<128x64xf32>
    %9 = arith.mulf %8, %5 : vector<128x64xf32>
    %10 = arith.select %7, %5, %9 : vector<128x64xi1>, vector<128x64xf32>
    %11 = arith.truncf %10 : vector<128x64xf32> to vector<128x64xbf16>
    %c0_7 = arith.constant 0 : index
    %c0_8 = arith.constant 0 : index
    %12 = vector.load %arg3[%c0_7, %c0_8] : memref<128x64xbf16, #tpu.memory_space<vmem>>, vector<128x64xbf16>
    tpu.vector_store %arg3[%c0_7, %c0_8], %11 {strides = array<i32>} : memref<128x64xbf16, #tpu.memory_space<vmem>>, vector<128x64xbf16>,
    return
  }
}

module attributes {stable_mosaic.version = 11 : i64} {
  func.func @_mm_kernel(%arg0: memref<512x64xbf16, #tpu.memory_space<vmem>>, %arg1: memref<64x64xbf16, #tpu.memory_space<vmem>>, %arg2: memref<1x64xf32, #tpu.memory_space<vmem>>, %arg3: memref<512x64xbf16, #tpu.memory_space<vmem>>) attributes {dimension_semantics = [], scalar_prefetch = 0 : i64, scratch_operands = 0 : i64, tpu.core_type = #tpu.core_type<tc>} {
    %c0 = arith.constant 0 : index
    %c0_0 = arith.constant 0 : index
    %0 = vector.load %arg0[%c0, %c0_0] : memref<512x64xbf16, #tpu.memory_space<vmem>>, vector<512x64xbf16>
    %c0_1 = arith.constant 0 : index
    %c0_2 = arith.constant 0 : index
    %1 = vector.load %arg1[%c0_1, %c0_2] : memref<64x64xbf16, #tpu.memory_space<vmem>>, vector<64x64xbf16>
    %cst = arith.constant dense<0.000000e+00> : vector<512x64xf32>
    %2 = tpu.matmul %0, %1, %cst {dimension_numbers = #tpu.dot_dimension_numbers<[1], [0], [0], [1], [0, 0, 1, 1], [], []>} : vector<512x64xbf16>, vector<64x64xbf16>, vector<512x64xf32> -> vector<512x64xf32>
    %c0_3 = arith.constant 0 : index
    %c0_4 = arith.constant 0 : index
    %3 = vector.load %arg2[%c0_3, %c0_4] : memref<1x64xf32, #tpu.memory_space<vmem>>, vector<1x64xf32>
    %4 = vector.broadcast %3 : vector<1x64xf32> to vector<512x64xf32>
    %5 = arith.addf %2, %4 : vector<512x64xf32>
    %cst_5 = arith.constant 0.000000e+00 : f32
    %6 = vector.broadcast %cst_5 : f32 to vector<512x64xf32>
    %7 = arith.cmpf ogt, %5, %6 : vector<512x64xf32>
    %cst_6 = arith.constant 0.00999999977 : f32
    %8 = vector.broadcast %cst_6 : f32 to vector<512x64xf32>
    %9 = arith.mulf %8, %5 : vector<512x64xf32>
    %10 = arith.select %7, %5, %9 : vector<512x64xi1>, vector<512x64xf32>
    %11 = arith.truncf %10 : vector<512x64xf32> to vector<512x64xbf16>
    %c0_7 = arith.constant 0 : index
    %c0_8 = arith.constant 0 : index
    %12 = vector.load %arg3[%c0_7, %c0_8] : memref<512x64xbf16, #tpu.memory_space<vmem>>, vector<512x64xbf16>
    tpu.vector_store %arg3[%c0_7, %c0_8], %11 {strides = array<i32>} : memref<512x64xbf16, #tpu.memory_space<vmem>>, vector<512x64xbf16>,
    return
  }
}

module attributes {stable_mosaic.version = 11 : i64} {
  func.func @_mm_kernel(%arg0: memref<2048x144xbf16, #tpu.memory_space<vmem>>, %arg1: memref<144x3xbf16, #tpu.memory_space<vmem>>, %arg2: memref<1x3xf32, #tpu.memory_space<vmem>>, %arg3: memref<2048x3xf32, #tpu.memory_space<vmem>>) attributes {dimension_semantics = [], scalar_prefetch = 0 : i64, scratch_operands = 0 : i64, tpu.core_type = #tpu.core_type<tc>} {
    %c0 = arith.constant 0 : index
    %c0_0 = arith.constant 0 : index
    %0 = vector.load %arg0[%c0, %c0_0] : memref<2048x144xbf16, #tpu.memory_space<vmem>>, vector<2048x144xbf16>
    %c0_1 = arith.constant 0 : index
    %c0_2 = arith.constant 0 : index
    %1 = vector.load %arg1[%c0_1, %c0_2] : memref<144x3xbf16, #tpu.memory_space<vmem>>, vector<144x3xbf16>
    %cst = arith.constant dense<0.000000e+00> : vector<2048x3xf32>
    %2 = tpu.matmul %0, %1, %cst {dimension_numbers = #tpu.dot_dimension_numbers<[1], [0], [0], [1], [0, 0, 1, 1], [], []>} : vector<2048x144xbf16>, vector<144x3xbf16>, vector<2048x3xf32> -> vector<2048x3xf32>
    %c0_3 = arith.constant 0 : index
    %c0_4 = arith.constant 0 : index
    %3 = vector.load %arg2[%c0_3, %c0_4] : memref<1x3xf32, #tpu.memory_space<vmem>>, vector<1x3xf32>
    %4 = vector.broadcast %3 : vector<1x3xf32> to vector<2048x3xf32>
    %5 = arith.addf %2, %4 : vector<2048x3xf32>
    %6 = math.tanh %5 : vector<2048x3xf32>
    %c0_5 = arith.constant 0 : index
    %c0_6 = arith.constant 0 : index
    %7 = vector.load %arg3[%c0_5, %c0_6] : memref<2048x3xf32, #tpu.memory_space<vmem>>, vector<2048x3xf32>
    tpu.vector_store %arg3[%c0_5, %c0_6], %6 {strides = array<i32>} : memref<2048x3xf32, #tpu.memory_space<vmem>>, vector<2048x3xf32>,
    return
  }
}

</mosaic_0001>

<bundles_post_ra>
// kernel: vae_forward.7
= control target key start
LH: loop header
LB: loop body
LE: loop exit
PB: predicated region body
PF: predicated region fallthrough
CT: control target
= control target key end

     0   :  { %s925_s1 = inlined_call_operand.vmem [shape: bf16[512,256], index: 1, kind: input, shape index: {}]   ;;  %s926_s0 = inlined_call_operand.vmem [shape: bf16[8,512], index: 0, kind: input, shape index: {}]   ;;  %s927_s2 = inlined_call_operand.vmem [shape: f32[1,256], index: 2, kind: input, shape index: {}]   ;;  %s928_s3 = inlined_call_operand.vmem [shape: bf16[8,256], index: 3, kind: output, shape index: {}]  }
   0x1   :  { %v601_v0 = vld [vmem:[%s925_s1 + $0x4] ss:$8 sps:$4 sm:$0xff]   ;;  %v605_v2 = vld [vmem:[%s925_s1] ss:$8 sps:$4 sm:$0xff]   ;;  %v607_v4 = vld [vmem:[%s925_s1 + $0x14] ss:$8 sps:$4 sm:$0xff]  }
   0x2   :  { %v603_v1 = vld [vmem:[%s925_s1 + $0x104] ss:$8 sps:$4 sm:$0xff]   ;;  %426 = vmatprep.subr.bf16.mxu1 %v601_v0  ;;  %v606_v3 = vld [vmem:[%s925_s1 + $0x100] ss:$8 sps:$4 sm:$0xff]   ;;  %v609_v5 = vld [vmem:[%s925_s1 + $0x114] ss:$8 sps:$4 sm:$0xff]  }
   0x3   :  { %467 = vmatprep.subr.bf16.mxu0 %v603_v1  ;;  %427 = vmatpush1.bf16.msra.mxu1 %v605_v2  ;;  %v611_v6 = vld [vmem:[%s925_s1 + $0x10] ss:$8 sps:$4 sm:$0xff]   ;;  %v613_v8 = vld [vmem:[%s925_s1 + $0x24] ss:$8 sps:$4 sm:$0xff]   ;;  %v617_v10 = vld [vmem:[%s925_s1 + $0x20] ss:$8 sps:$4 sm:$0xff]  }
   0x4   :  { %468 = vmatpush1.bf16.msra.mxu0 %v606_v3  ;;  %428 = vmatprep.subr.bf16.mxu1 %v607_v4  ;;  %v612_v7 = vld [vmem:[%s925_s1 + $0x110] ss:$8 sps:$4 sm:$0xff]   ;;  %v615_v9 = vld [vmem:[%s925_s1 + $0x124] ss:$8 sps:$4 sm:$0xff]   ;;  %v618_v11 = vld [vmem:[%s925_s1 + $0x120] ss:$8 sps:$4 sm:$0xff]  }
   0x5   :  { %469 = vmatprep.subr.bf16.mxu0 %v609_v5  ;;  %v619_v12 = vld [vmem:[%s925_s1 + $0x34] ss:$8 sps:$4 sm:$0xff]   ;;  %v623_v14 = vld [vmem:[%s925_s1 + $0x30] ss:$8 sps:$4 sm:$0xff]   ;;  %v625_v16 = vld [vmem:[%s925_s1 + $0x44] ss:$8 sps:$4 sm:$0xff]  }
   0x6   :  { %v621_v13 = vld [vmem:[%s925_s1 + $0x134] ss:$8 sps:$4 sm:$0xff]   ;;  %v624_v15 = vld [vmem:[%s925_s1 + $0x130] ss:$8 sps:$4 sm:$0xff]   ;;  %v627_v17 = vld [vmem:[%s925_s1 + $0x144] ss:$8 sps:$4 sm:$0xff]  }
   0x7   :  { %429 = vmatpush1.bf16.msra.mxu1 %v611_v6  ;;  %v629_v18 = vld [vmem:[%s925_s1 + $0x40] ss:$8 sps:$4 sm:$0xff]   ;;  %v631_v20 = vld [vmem:[%s925_s1 + $0x54] ss:$8 sps:$4 sm:$0xff]   ;;  %v635_v22 = vld [vmem:[%s925_s1 + $0x50] ss:$8 sps:$4 sm:$0xff]   ;;  %v82_v6 = vlaneseq }
   0x8   :  { %470 = vmatpush1.bf16.msra.mxu0 %v612_v7  ;;  %430 = vmatprep.subr.bf16.mxu1 %v613_v8  ;;  %v630_v19 = vld [vmem:[%s925_s1 + $0x140] ss:$8 sps:$4 sm:$0xff]   ;;  %v633_v21 = vld [vmem:[%s925_s1 + $0x154] ss:$8 sps:$4 sm:$0xff]   ;;  %v636_v23 = vld [vmem:[%s925_s1 + $0x150] ss:$8 sps:$4 sm:$0xff]  }
   0x9   :  { %471 = vmatprep.subr.bf16.mxu0 %v615_v9  ;;  %v637_v24 = vld [vmem:[%s925_s1 + $0x64] ss:$8 sps:$4 sm:$0xff]   ;;  %v641_v26 = vld [vmem:[%s925_s1 + $0x60] ss:$8 sps:$4 sm:$0xff]   ;;  %v643_v28 = vld [vmem:[%s925_s1 + $0x74] ss:$8 sps:$4 sm:$0xff]  }
   0xa   :  { %v639_v25 = vld [vmem:[%s925_s1 + $0x164] ss:$8 sps:$4 sm:$0xff]   ;;  %v642_v27 = vld [vmem:[%s925_s1 + $0x160] ss:$8 sps:$4 sm:$0xff]   ;;  %v645_v29 = vld [vmem:[%s925_s1 + $0x174] ss:$8 sps:$4 sm:$0xff]  }
   0xb   :  { %431 = vmatpush1.bf16.msra.mxu1 %v617_v10  ;;  %v647_v30 = vld [vmem:[%s925_s1 + $0x70] ss:$8 sps:$4 sm:$0xff]   ;;  %v649_v32 = vld [vmem:[%s925_s1 + $0x84] ss:$8 sps:$4 sm:$0xff]   ;;  %v653_v34 = vld [vmem:[%s925_s1 + $0x80] ss:$8 sps:$4 sm:$0xff]  }
   0xc   :  { %472 = vmatpush1.bf16.msra.mxu0 %v618_v11  ;;  %432 = vmatprep.subr.bf16.mxu1 %v619_v12  ;;  %v648_v31 = vld [vmem:[%s925_s1 + $0x170] ss:$8 sps:$4 sm:$0xff]   ;;  %v651_v33 = vld [vmem:[%s925_s1 + $0x184] ss:$8 sps:$4 sm:$0xff]   ;;  %v654_v35 = vld [vmem:[%s925_s1 + $0x180] ss:$8 sps:$4 sm:$0xff]  }
   0xd   :  { %473 = vmatprep.subr.bf16.mxu0 %v621_v13  ;;  %v655_v36 = vld [vmem:[%s925_s1 + $0x94] ss:$8 sps:$4 sm:$0xff]   ;;  %v659_v38 = vld [vmem:[%s925_s1 + $0x90] ss:$8 sps:$4 sm:$0xff]   ;;  %v661_v40 = vld [vmem:[%s925_s1 + $0xa4] ss:$8 sps:$4 sm:$0xff]  }
   0xe   :  { %v657_v37 = vld [vmem:[%s925_s1 + $0x194] ss:$8 sps:$4 sm:$0xff]   ;;  %v660_v39 = vld [vmem:[%s925_s1 + $0x190] ss:$8 sps:$4 sm:$0xff]   ;;  %v663_v41 = vld [vmem:[%s925_s1 + $0x1a4] ss:$8 sps:$4 sm:$0xff]  }
   0xf   :  { %433 = vmatpush1.bf16.msra.mxu1 %v623_v14  ;;  %v665_v42 = vld [vmem:[%s925_s1 + $0xa0] ss:$8 sps:$4 sm:$0xff]   ;;  %v667_v44 = vld [vmem:[%s925_s1 + $0xb4] ss:$8 sps:$4 sm:$0xff]   ;;  %v671_v49 = vld [vmem:[%s925_s1 + $0xb0] ss:$8 sps:$4 sm:$0xff]  }
  0x10   :  { %474 = vmatpush1.bf16.msra.mxu0 %v624_v15  ;;  %434 = vmatprep.subr.bf16.mxu1 %v625_v16  ;;  %v666_v43 = vld [vmem:[%s925_s1 + $0x1a0] ss:$8 sps:$4 sm:$0xff]   ;;  %v669_v45 = vld [vmem:[%s925_s1 + $0x1b4] ss:$8 sps:$4 sm:$0xff]   ;;  %v672_v50 = vld [vmem:[%s925_s1 + $0x1b0] ss:$8 sps:$4 sm:$0xff]  }
  0x11   :  { %475 = vmatprep.subr.bf16.mxu0 %v627_v17  ;;  %v14_v46 = vld [vmem:[%s926_s0] sm:$0xff]  ;;  %v15_v48 = vld [vmem:[%s926_s0 + $0x8] sm:$0xff]  ;;  %v679_v56 = vld [vmem:[%s925_s1 + $0xd4] ss:$8 sps:$4 sm:$0xff]   ;;  %v83_v7 = vshrl.u32 %v82_v6, 7 }
  0x12   :  { %v528_v47 = vcombine.high %v14_v46, %v14_v46  ;;  %v530_v51 = vcombine.high %v15_v48, %v15_v48  ;;  %v673_v52 = vld [vmem:[%s925_s1 + $0xc4] ss:$8 sps:$4 sm:$0xff]   ;;  %v677_v54 = vld [vmem:[%s925_s1 + $0xc0] ss:$8 sps:$4 sm:$0xff]   ;;  %v681_v57 = vld [vmem:[%s925_s1 + $0x1d4] ss:$8 sps:$4 sm:$0xff]   ;;  %v527_v4 = vcombine.low %v14_v46, %v14_v46  ;;  %v529_v5 = vcombine.low %v15_v48, %v15_v48 }
  0x13   :  { %435 = vmatpush1.bf16.msra.mxu1 %v629_v18  ;;  %v675_v53 = vld [vmem:[%s925_s1 + $0x1c4] ss:$8 sps:$4 sm:$0xff]   ;;  %v678_v55 = vld [vmem:[%s925_s1 + $0x1c0] ss:$8 sps:$4 sm:$0xff]   ;;  %v683_v58 = vld [vmem:[%s925_s1 + $0xd0] ss:$8 sps:$4 sm:$0xff]  }
  0x14   :  { %476 = vmatpush1.bf16.msra.mxu0 %v630_v19  ;;  %436 = vmatprep.subr.bf16.mxu1 %v631_v20  ;;  %v684_v59 = vld [vmem:[%s925_s1 + $0x1d0] ss:$8 sps:$4 sm:$0xff]   ;;  %v685_v60 = vld [vmem:[%s925_s1 + $0xe4] ss:$8 sps:$4 sm:$0xff]   ;;  %v689_v62 = vld [vmem:[%s925_s1 + $0xe0] ss:$8 sps:$4 sm:$0xff]  }
  0x15   :  { %477 = vmatprep.subr.bf16.mxu0 %v633_v21  ;;  %458 = vmatprep.mubr.bf16.mxu1 %v528_v47  ;;  %v687_v61 = vld [vmem:[%s925_s1 + $0x1e4] ss:$8 sps:$4 sm:$0xff]   ;;  %v690_v63 = vld [vmem:[%s925_s1 + $0x1e0] ss:$8 sps:$4 sm:$0xff]   ;;  %v691_v0 = vld [vmem:[%s925_s1 + $0xf4] ss:$8 sps:$4 sm:$0xff]  }
  0x16   :  { %499 = vmatprep.mubr.bf16.mxu0 %v530_v51  ;;  %v693_v1 = vld [vmem:[%s925_s1 + $0x1f4] ss:$8 sps:$4 sm:$0xff]   ;;  %v695_v2 = vld [vmem:[%s925_s1 + $0xf0] ss:$8 sps:$4 sm:$0xff]   ;;  %v84_v8 = vsub.s32 0, %v83_v7  ;;  %v88_v10 = vsub.s32 1, %v83_v7 }
  0x17   :  { %437 = vmatpush1.bf16.msra.mxu1 %v635_v22  ;;  %v696_v3 = vld [vmem:[%s925_s1 + $0x1f0] ss:$8 sps:$4 sm:$0xff]   ;;  %v80_v9 = vld [vmem:[%s927_s2] sm:$0x3] }
  0x18   :  { %478 = vmatpush1.bf16.msra.mxu0 %v636_v23  ;;  %438 = vmatprep.subr.bf16.mxu1 %v637_v24  ;;  %v85_v11 = vrot.slane %v80_v9, %v84_v8  ;;  %v89_v12 = vrot.slane %v80_v9, %v88_v10 }
  0x19   :  { %479 = vmatprep.subr.bf16.mxu0 %v639_v25 }
  0x1b   :  { %439 = vmatpush1.bf16.msra.mxu1 %v641_v26 }
  0x1c   :  { %480 = vmatpush1.bf16.msra.mxu0 %v642_v27  ;;  %440 = vmatprep.subr.bf16.mxu1 %v643_v28 }
  0x1d   :  { %481 = vmatprep.subr.bf16.mxu0 %v645_v29 }
  0x1f   :  { %441 = vmatpush1.bf16.msra.mxu1 %v647_v30 }
  0x20   :  { %482 = vmatpush1.bf16.msra.mxu0 %v648_v31  ;;  %442 = vmatprep.subr.bf16.mxu1 %v649_v32 }
  0x21   :  { %483 = vmatprep.subr.bf16.mxu0 %v651_v33 }
  0x23   :  { %443 = vmatpush1.bf16.msra.mxu1 %v653_v34 }
  0x24   :  { %484 = vmatpush1.bf16.msra.mxu0 %v654_v35  ;;  %444 = vmatprep.subr.bf16.mxu1 %v655_v36 }
  0x25   :  { %485 = vmatprep.subr.bf16.mxu0 %v657_v37 }
  0x27   :  { %445 = vmatpush1.bf16.msra.mxu1 %v659_v38 }
  0x28   :  { %486 = vmatpush1.bf16.msra.mxu0 %v660_v39  ;;  %446 = vmatprep.subr.bf16.mxu1 %v661_v40 }
  0x29   :  { %487 = vmatprep.subr.bf16.mxu0 %v663_v41 }
  0x2b   :  { %447 = vmatpush1.bf16.msra.mxu1 %v665_v42 }
  0x2c   :  { %488 = vmatpush1.bf16.msra.mxu0 %v666_v43  ;;  %448 = vmatprep.subr.bf16.mxu1 %v667_v44 }
  0x2d   :  { %489 = vmatprep.subr.bf16.mxu0 %v669_v45 }
  0x2f   :  { %449 = vmatpush1.bf16.msra.mxu1 %v671_v49 }
  0x30   :  { %490 = vmatpush1.bf16.msra.mxu0 %v672_v50  ;;  %450 = vmatprep.subr.bf16.mxu1 %v673_v52 }
  0x31   :  { %491 = vmatprep.subr.bf16.mxu0 %v675_v53 }
  0x33   :  { %451 = vmatpush1.bf16.msra.mxu1 %v677_v54 }
  0x34   :  { %492 = vmatpush1.bf16.msra.mxu0 %v678_v55  ;;  %452 = vmatprep.subr.bf16.mxu1 %v679_v56 }
  0x35   :  { %493 = vmatprep.subr.bf16.mxu0 %v681_v57 }
  0x37   :  { %453 = vmatpush1.bf16.msra.mxu1 %v683_v58 }
  0x38   :  { %494 = vmatpush1.bf16.msra.mxu0 %v684_v59  ;;  %454 = vmatprep.subr.bf16.mxu1 %v685_v60 }
  0x39   :  { %495 = vmatprep.subr.bf16.mxu0 %v687_v61 }
  0x3b   :  { %455 = vmatpush1.bf16.msra.mxu1 %v689_v62 }
  0x3c   :  { %496 = vmatpush1.bf16.msra.mxu0 %v690_v63  ;;  %456 = vmatprep.subr.bf16.mxu1 %v691_v0 }
  0x3d   :  { %497 = vmatprep.subr.bf16.mxu0 %v693_v1 }
  0x3f   :  { %457 = vmatpush1.bf16.msra.mxu1 %v695_v2 }
  0x40   :  { %498 = vmatpush1.bf16.msra.mxu0 %v696_v3 }
  0x42   :  { %459 = vmatmul.mubr.bf16.vlgmr.msra.gmra.mrb[0].mxu1 %v527_v4 }
  0x43   :  { %500 = vmatmul.mubr.bf16.vlgmr.msra.gmra.mrb[0].mxu0 %v529_v5 }
 0x115   :  { %v460_v13 = vpop.f32.mrb[0].mxu1 }
 0x116   :  { %v501_v14 = vpop.f32.mrb[0].mxu0  ;;  %v461_v15 = vadd.f32 %v460_v13, %v85_v11  ;;  %v462_v16 = vpop.f32.mrb[1].mxu1 }
 0x117   :  { %v503_v17 = vpop.f32.mrb[1].mxu0  ;;  %v463_v18 = vadd.f32 %v462_v16, %v89_v12  ;;  %v464_v19 = vpop.f32.mrb[2].mxu1 }
 0x118   :  { %v505_v20 = vpop.f32.mrb[2].mxu0  ;;  %v502_v21 = vadd.f32 %v501_v14, %v461_v15  ;;  %v465_v22 = vpop.f32.mrb[3].mxu1 }
 0x119   :  { %v506_v23 = vpop.f32.mrb[3].mxu0  ;;  %v504_v24 = vadd.f32 %v503_v17, %v463_v18 }
 0x11a   :  { %vm508_vm0 = vcmp.gt.f32.partialorder %v502_v21, 0.0  ;;  %v510_v25 = vmul.f32 0.01, %v502_v21 }
 0x11b   :  { %vm509_vm1 = vcmp.gt.f32.partialorder %v504_v24, 0.0  ;;  %v511_v26 = vmul.f32 0.01, %v504_v24 }
 0x11c   :  { %v512_v27 = vsel %vm508_vm0, %v502_v21, %v510_v25 }
 0x11d   :  { %v513_v28 = vsel %vm509_vm1, %v504_v24, %v511_v26 }
 0x11e   :  { %v596_v29 = vpack.c.bf16 %v513_v28, %v512_v27 }
 0x120   :  { %522 = vst [vmem:[%s928_s3] sm:$0xff] %v596_v29 }

// kernel: vae_forward.8
= control target key start
LH: loop header
LB: loop body
LE: loop exit
PB: predicated region body
PF: predicated region fallthrough
CT: control target
= control target key end

     0   :  { %s454_s1 = inlined_call_operand.vmem [shape: bf16[256,128], index: 1, kind: input, shape index: {}]   ;;  %s455_s0 = inlined_call_operand.vmem [shape: bf16[32,256], index: 0, kind: input, shape index: {}]   ;;  %s456_s2 = inlined_call_operand.vmem [shape: f32[1,128], index: 2, kind: input, shape index: {}]   ;;  %s457_s3 = inlined_call_operand.vmem [shape: bf16[32,128], index: 3, kind: output, shape index: {}]  }
   0x1   :  { %v343_v0 = vld [vmem:[%s454_s1 + $0x40] sm:$0xff]   ;;  %v345_v2 = vld [vmem:[%s454_s1 + $0x48] sm:$0xff]   ;;  %v347_v4 = vld [vmem:[%s454_s1 + $0x50] sm:$0xff]  }
   0x2   :  { %v344_v1 = vld [vmem:[%s454_s1] sm:$0xff]   ;;  %299 = vmatprep.subr.bf16.mxu0 %v343_v0  ;;  %327 = vmatprep.subr.bf16.mxu1 %v343_v0  ;;  %v346_v3 = vld [vmem:[%s454_s1 + $0x8] sm:$0xff]   ;;  %v348_v5 = vld [vmem:[%s454_s1 + $0x10] sm:$0xff]  }
   0x3   :  { %300 = vmatpush3.bf16.msra.mxu0 %v344_v1  ;;  %335 = vmatpush3.bf16.msra.mxu1 %v344_v1  ;;  %v349_v6 = vld [vmem:[%s454_s1 + $0x58] sm:$0xff]   ;;  %v351_v8 = vld [vmem:[%s454_s1 + $0x60] sm:$0xff]   ;;  %v353_v10 = vld [vmem:[%s454_s1 + $0x68] sm:$0xff]  }
   0x4   :  { %301 = vmatprep.subr.bf16.mxu0 %v345_v2  ;;  %328 = vmatprep.subr.bf16.mxu1 %v345_v2  ;;  %v350_v7 = vld [vmem:[%s454_s1 + $0x18] sm:$0xff]   ;;  %v352_v9 = vld [vmem:[%s454_s1 + $0x20] sm:$0xff]   ;;  %v354_v13 = vld [vmem:[%s454_s1 + $0x28] sm:$0xff]  }
   0x5   :  { %v361_v11 = vld [vmem:[%s455_s0 + $0x4] ss:$8 sps:$4 sm:$0xff]   ;;  %v364_v12 = vld [vmem:[%s455_s0 + $0x14] ss:$8 sps:$4 sm:$0xff]   ;;  %v359_v18 = vld [vmem:[%s455_s0] ss:$8 sps:$4 sm:$0xff]  }
   0x6   :  { %v355_v14 = vld [vmem:[%s454_s1 + $0x70] sm:$0xff]   ;;  %206 = vmatprep.mubr.bf16.mxu0 %v361_v11  ;;  %214 = vmatprep.mubr.bf16.mxu1 %v364_v12  ;;  %v357_v16 = vld [vmem:[%s454_s1 + $0x78] sm:$0xff]   ;;  %v259_v22 = vld [vmem:[%s456_s2] ss:$0 sm:$0xff] }
   0x7   :  { %302 = vmatpush3.bf16.msra.mxu0 %v346_v3  ;;  %336 = vmatpush3.bf16.msra.mxu1 %v346_v3  ;;  %v356_v15 = vld [vmem:[%s454_s1 + $0x30] sm:$0xff]   ;;  %v358_v17 = vld [vmem:[%s454_s1 + $0x38] sm:$0xff]  }
   0x8   :  { %303 = vmatprep.subr.bf16.mxu0 %v347_v4  ;;  %329 = vmatprep.subr.bf16.mxu1 %v347_v4  ;;  %v362_v19 = vld [vmem:[%s455_s0 + $0x10] ss:$8 sps:$4 sm:$0xff]  }
   0xb   :  { %304 = vmatpush3.bf16.msra.mxu0 %v348_v5  ;;  %337 = vmatpush3.bf16.msra.mxu1 %v348_v5 }
   0xc   :  { %305 = vmatprep.subr.bf16.mxu0 %v349_v6  ;;  %330 = vmatprep.subr.bf16.mxu1 %v349_v6 }
   0xf   :  { %306 = vmatpush3.bf16.msra.mxu0 %v350_v7  ;;  %338 = vmatpush3.bf16.msra.mxu1 %v350_v7 }
  0x10   :  { %307 = vmatprep.subr.bf16.mxu0 %v351_v8  ;;  %331 = vmatprep.subr.bf16.mxu1 %v351_v8 }
  0x13   :  { %308 = vmatpush3.bf16.msra.mxu0 %v352_v9  ;;  %339 = vmatpush3.bf16.msra.mxu1 %v352_v9 }
  0x14   :  { %309 = vmatprep.subr.bf16.mxu0 %v353_v10  ;;  %332 = vmatprep.subr.bf16.mxu1 %v353_v10 }
  0x17   :  { %310 = vmatpush3.bf16.msra.mxu0 %v354_v13  ;;  %340 = vmatpush3.bf16.msra.mxu1 %v354_v13 }
  0x18   :  { %311 = vmatprep.subr.bf16.mxu0 %v355_v14  ;;  %333 = vmatprep.subr.bf16.mxu1 %v355_v14 }
  0x1b   :  { %312 = vmatpush3.bf16.msra.mxu0 %v356_v15  ;;  %341 = vmatpush3.bf16.msra.mxu1 %v356_v15 }
  0x1c   :  { %313 = vmatprep.subr.bf16.mxu0 %v357_v16  ;;  %334 = vmatprep.subr.bf16.mxu1 %v357_v16 }
  0x1f   :  { %314 = vmatpush3.bf16.msra.mxu0 %v358_v17  ;;  %342 = vmatpush3.bf16.msra.mxu1 %v358_v17 }
  0x22   :  { %207 = vmatmul.mubr.bf16.vlgmr.msra.gmra.mrb[0].mxu0 %v359_v18  ;;  %215 = vmatmul.mubr.bf16.vlgmr.msra.gmra.mrb[0].mxu1 %v362_v19 }
  0xf5   :  { %v315_v20 = vpop.f32.mrb[0].mxu0  ;;  %v321_v21 = vpop.f32.mrb[0].mxu1 }
  0xf6   :  { %v316_v23 = vpop.f32.mrb[1].mxu0  ;;  %v322_v24 = vpop.f32.mrb[1].mxu1 }
  0xf7   :  { %v317_v25 = vadd.f32 %v316_v23, %v315_v20  ;;  %v323_v26 = vadd.f32 %v322_v24, %v321_v21  ;;  %v318_v27 = vpop.f32.mrb[2].mxu0  ;;  %v324_v28 = vpop.f32.mrb[2].mxu1 }
  0xf8   :  { %v319_v29 = vpop.f32.mrb[3].mxu0  ;;  %v325_v30 = vpop.f32.mrb[3].mxu1 }
  0xf9   :  { %v209_v31 = vadd.f32 %v317_v25, %v259_v22  ;;  %v217_v32 = vadd.f32 %v323_v26, %v259_v22  ;;  %v320_v33 = vadd.f32 %v319_v29, %v318_v27  ;;  %v326_v34 = vadd.f32 %v325_v30, %v324_v28 }
  0xfb   :  { %v227_v35 = vmul.f32 0.01, %v209_v31  ;;  %v229_v36 = vmul.f32 0.01, %v217_v32  ;;  %v212_v37 = vadd.f32 %v320_v33, %v259_v22  ;;  %v220_v38 = vadd.f32 %v326_v34, %v259_v22 }
  0xfc   :  { %vm223_vm0 = vcmp.gt.f32.partialorder %v209_v31, 0.0  ;;  %vm225_vm1 = vcmp.gt.f32.partialorder %v217_v32, 0.0 }
  0xfd   :  { %vm224_vm2 = vcmp.gt.f32.partialorder %v212_v37, 0.0  ;;  %v228_v39 = vmul.f32 0.01, %v212_v37  ;;  %vm226_vm3 = vcmp.gt.f32.partialorder %v220_v38, 0.0  ;;  %v230_v40 = vmul.f32 0.01, %v220_v38 }
  0xfe   :  { %v231_v41 = vsel %vm223_vm0, %v209_v31, %v227_v35  ;;  %v233_v42 = vsel %vm225_vm1, %v217_v32, %v229_v36 }
  0xff   :  { %v232_v43 = vsel %vm224_vm2, %v212_v37, %v228_v39  ;;  %v234_v44 = vsel %vm226_vm3, %v220_v38, %v230_v40 }
 0x100   :  { %v291_v45 = vpack.c.bf16 %v232_v43, %v231_v41  ;;  %v296_v46 = vpack.c.bf16 %v234_v44, %v233_v42 }
 0x102   :  { %292 = vst [vmem:[%s457_s3] sm:$0xff] %v291_v45   ;;  %298 = vst [vmem:[%s457_s3 + $0x8] sm:$0xff] %v296_v46  }

// kernel: vae_forward.6
= control target key start
LH: loop header
LB: loop body
LE: loop exit
PB: predicated region body
PF: predicated region fallthrough
CT: control target
= control target key end

     0   :  { %vm272_vm0 = vcmask 261120   ;;  %v1585_v34 = vmov 1983009808   ;;  %v728_v36 = vlaneseq  ;;  %vm1587_vm1 = vmmov 0   ;;  %s1588_s17 = smov 32   ;;  %s1590_s28 = smov 96   ;;  %s1901_s1 = inlined_call_operand.vmem [shape: bf16[32,32], index: 1, kind: input, shape index: {}]   ;;  %s1902_s0 = inlined_call_operand.vmem [shape: bf16[512,32], index: 0, kind: input, shape index: {}]   ;;  %s1903_s2 = inlined_call_operand.vmem [shape: f32[2,512], index: 2, kind: input, shape index: {}]   ;;  %s1904_s3 = inlined_call_operand.vmem [shape: bf16[32,64], index: 3, kind: input, shape index: {}]   ;;  %s1905_s5 = inlined_call_operand.vmem [shape: f32[2,32], index: 5, kind: input, shape index: {}]   ;;  %s1906_s8 = inlined_call_operand.vmem [shape: f32[2,128], index: 8, kind: output, shape index: {0}]   ;;  %s1907_s4 = inlined_call_operand.vmem [shape: f32[1,64], index: 4, kind: input, shape index: {}]   ;;  %s1908_s6 = inlined_call_operand.vmem [shape: bf16[32,512], index: 6, kind: input, shape index: {}]   ;;  %s1909_s7 = inlined_call_operand.vmem [shape: f32[1,512], index: 7, kind: input, shape index: {}]   ;;  %s1910_s9 = inlined_call_operand.vmem [shape: bf16[2,512], index: 9, kind: output, shape index: {1}]  }
   0x1   :  { %v1532_v0 = vld [vmem:[%s1901_s1] sm:$0xff]   ;;  %v1533_v1 = vld [vmem:[%s1901_s1 + $0x8] sm:$0xff]   ;;  %v1536_v4 = vld [vmem:[%s1902_s0 + $0x10] sm:$0xff]   ;;  %v726_v35 = vunpack.c.l.s4 %v1585_v34  ;;  %vm1135_vm2 = vcmask 254976   ;;  %vm1141_vm3 = vcmask 779520   ;;  %vm1147_vm4 = vcmask 1042176  }
   0x2   :  { %1381 = vmatprep.subr.bf16.mxu0 %v1532_v0  ;;  %v1534_v2 = vld [vmem:[%s1902_s0] sm:$0xff]   ;;  %1521 = vmatprep.subr.bf16.mxu1 %v1532_v0  ;;  %v1535_v3 = vld [vmem:[%s1902_s0 + $0x8] sm:$0xff]   ;;  %v1537_v5 = vld [vmem:[%s1902_s0 + $0x18] sm:$0xff]   ;;  %v1776_v38 = vshrl.u32 %v728_v36, 7 }
   0x3   :  { %1382 = vmatpush3.bf16.msra.mxu0 %v1532_v0  ;;  %1523 = vmatpush3.bf16.msra.mxu1 %v1532_v0  ;;  %v1538_v6 = vld [vmem:[%s1902_s0 + $0x20] sm:$0xff]   ;;  %v1551_v8 = vld [vmem:[%s1902_s0 + $0xc8] sm:$0xff]   ;;  %v1554_v10 = vld [vmem:[%s1902_s0 + $0xd0] sm:$0xff]   ;;  %v727_v37 = vunpack.c.0.s8 %v726_v35 }
   0x4   :  { %1383 = vmatprep.subr.bf16.mxu0 %v1533_v1  ;;  %1385 = vmatprep.mubr.msk.bf16.mxu0 %vm272_vm0, %v1534_v2  ;;  %v1550_v7 = vld [vmem:[%s1902_s0 + $0xc0] sm:$0xff]   ;;  %v1539_v9 = vld [vmem:[%s1902_s0 + $0x28] sm:$0xff]   ;;  %v1540_v11 = vld [vmem:[%s1902_s0 + $0x30] sm:$0xff]  }
   0x5   :  { %1522 = vmatprep.subr.bf16.mxu1 %v1533_v1  ;;  %1433 = vmatprep.mubr.msk.bf16.mxu1 %vm272_vm0, %v1550_v7  ;;  %v1555_v12 = vld [vmem:[%s1902_s0 + $0xd8] sm:$0xff]   ;;  %v1558_v13 = vld [vmem:[%s1902_s0 + $0xe0] sm:$0xff]   ;;  %v1559_v16 = vld [vmem:[%s1902_s0 + $0xe8] sm:$0xff]   ;;  %v730_v39 = vsub.s32 %v727_v37, %v1776_v38 }
   0x6   :  { %v1541_v14 = vld [vmem:[%s1902_s0 + $0x38] sm:$0xff]   ;;  %v1542_v15 = vld [vmem:[%s1902_s0 + $0x40] sm:$0xff]   ;;  %v1562_v17 = vld [vmem:[%s1902_s0 + $0xf0] sm:$0xff]  }
   0x7   :  { %1384 = vmatpush3.bf16.msra.mxu0 %v1533_v1  ;;  %1524 = vmatpush3.bf16.msra.mxu1 %v1533_v1  ;;  %v1543_v18 = vld [vmem:[%s1902_s0 + $0x48] sm:$0xff]   ;;  %v1544_v19 = vld [vmem:[%s1902_s0 + $0x50] sm:$0xff]   ;;  %v1563_v20 = vld [vmem:[%s1902_s0 + $0xf8] sm:$0xff]  }
   0x8   :  { %v1545_v21 = vld [vmem:[%s1902_s0 + $0x58] sm:$0xff]   ;;  %v1546_v22 = vld [vmem:[%s1902_s0 + $0x60] sm:$0xff]   ;;  %v1547_v23 = vld [vmem:[%s1902_s0 + $0x68] sm:$0xff]  }
   0x9   :  { %v1548_v24 = vld [vmem:[%s1902_s0 + $0x70] sm:$0xff]   ;;  %v1549_v25 = vld [vmem:[%s1902_s0 + $0x78] sm:$0xff]   ;;  %v1552_v26 = vld [vmem:[%s1902_s0 + $0x80] sm:$0xff]  }
   0xa   :  { %1386 = vmatmul.mubr.msk.bf16.vlgmr.msra.gmra.mrb[0].mxu0 %vm272_vm0, %v1535_v3  ;;  %1434 = vmatmul.mubr.msk.bf16.vlgmr.msra.gmra.mrb[0].mxu1 %vm272_vm0, %v1551_v8  ;;  %v1553_v27 = vld [vmem:[%s1902_s0 + $0x88] sm:$0xff]   ;;  %v1556_v28 = vld [vmem:[%s1902_s0 + $0x90] sm:$0xff]   ;;  %v1557_v29 = vld [vmem:[%s1902_s0 + $0x98] sm:$0xff]  }
   0xb   :  { %1389 = vmatprep.mubr.msk.bf16.mxu0 %vm272_vm0, %v1536_v4  ;;  %1437 = vmatprep.mubr.msk.bf16.mxu1 %vm272_vm0, %v1554_v10  ;;  %v1560_v30 = vld [vmem:[%s1902_s0 + $0xa0] sm:$0xff]   ;;  %v1561_v31 = vld [vmem:[%s1902_s0 + $0xa8] sm:$0xff]   ;;  %v1564_v32 = vld [vmem:[%s1902_s0 + $0xb0] sm:$0xff]  }
   0xc   :  { %v1565_v33 = vld [vmem:[%s1902_s0 + $0xb8] sm:$0xff]   ;;  %v722_v40 = vld [vmem:[%s1903_s2] sm:$0xff] }
   0xd   :  { %v1782_v41 = vrot.slane %v722_v40, %v730_v39  ;;  %v724_v43 = vcombine.high %v722_v40, %v722_v40 }
   0xf   :  { %v739_v42 = vcombine.high %v1782_v41, %v1782_v41  ;;  %v1786_v44 = vrot.slane %v724_v43, %v730_v39 }
  0x12   :  { %1390 = vmatmul.mubr.msk.bf16.gmra.mrb[4].mxu0 %vm272_vm0, %v1537_v5  ;;  %1438 = vmatmul.mubr.msk.bf16.gmra.mrb[4].mxu1 %vm272_vm0, %v1555_v12 }
  0x13   :  { %1393 = vmatprep.mubr.msk.bf16.mxu0 %vm272_vm0, %v1538_v6  ;;  %1441 = vmatprep.mubr.msk.bf16.mxu1 %vm272_vm0, %v1558_v13 }
  0x1a   :  { %1394 = vmatmul.mubr.msk.bf16.gmra.mrb[8].mxu0 %vm272_vm0, %v1539_v9  ;;  %1442 = vmatmul.mubr.msk.bf16.gmra.mrb[8].mxu1 %vm272_vm0, %v1559_v16 }
  0x1b   :  { %1397 = vmatprep.mubr.msk.bf16.mxu0 %vm272_vm0, %v1540_v11  ;;  %1445 = vmatprep.mubr.msk.bf16.mxu1 %vm272_vm0, %v1562_v17 }
  0x22   :  { %1398 = vmatmul.mubr.msk.bf16.gmra.mrb[12].mxu0 %vm272_vm0, %v1541_v14  ;;  %1446 = vmatmul.mubr.msk.bf16.gmra.mrb[12].mxu1 %vm272_vm0, %v1563_v20 }
  0x23   :  { %1401 = vmatprep.mubr.msk.bf16.mxu0 %vm272_vm0, %v1542_v15  ;;  %809 = vmatprep.mubr.f32.mxu1 %v739_v42 }
  0x2a   :  { %1402 = vmatmul.mubr.msk.bf16.gmra.mrb[16].mxu0 %vm272_vm0, %v1543_v18 }
  0x2b   :  { %1405 = vmatprep.mubr.msk.bf16.mxu0 %vm272_vm0, %v1544_v19 }
  0x32   :  { %1406 = vmatmul.mubr.msk.bf16.gmra.mrb[20].mxu0 %vm272_vm0, %v1545_v21 }
  0x33   :  { %1409 = vmatprep.mubr.msk.bf16.mxu0 %vm272_vm0, %v1546_v22 }
  0x3a   :  { %1410 = vmatmul.mubr.msk.bf16.gmra.mrb[24].mxu0 %vm272_vm0, %v1547_v23 }
  0x3b   :  { %1413 = vmatprep.mubr.msk.bf16.mxu0 %vm272_vm0, %v1548_v24 }
  0x42   :  { %1414 = vmatmul.mubr.msk.bf16.gmra.mrb[28].mxu0 %vm272_vm0, %v1549_v25 }
  0x43   :  { %1417 = vmatprep.mubr.msk.bf16.mxu0 %vm272_vm0, %v1552_v26 }
  0x4a   :  { %1418 = vmatmul.mubr.msk.bf16.gmra.mrb[32].mxu0 %vm272_vm0, %v1553_v27 }
  0x4b   :  { %1421 = vmatprep.mubr.msk.bf16.mxu0 %vm272_vm0, %v1556_v28 }
  0x52   :  { %1422 = vmatmul.mubr.msk.bf16.gmra.mrb[36].mxu0 %vm272_vm0, %v1557_v29 }
  0x53   :  { %1425 = vmatprep.mubr.msk.bf16.mxu0 %vm272_vm0, %v1560_v30 }
  0x5a   :  { %1426 = vmatmul.mubr.msk.bf16.gmra.mrb[40].mxu0 %vm272_vm0, %v1561_v31 }
  0x5b   :  { %1429 = vmatprep.mubr.msk.bf16.mxu0 %vm272_vm0, %v1564_v32 }
  0x62   :  { %1430 = vmatmul.mubr.msk.bf16.gmra.mrb[44].mxu0 %vm272_vm0, %v1565_v33 }
  0xdd   :  { %v1387_v45 = vpop.f32.mrb[0].mxu0  ;;  %v1435_v61 = vpop.f32.mrb[0].mxu1 }
  0xde   :  { %v403_v46 = vpop.f32.mrb[1].mxu0  ;;  %v660_v48 = vmax.f32 %v1387_v45, 0.0  ;;  %v708_v0 = vmax.f32 %v1435_v61, 0.0  ;;  %v595_v1 = vpop.f32.mrb[1].mxu1 }
  0xdf   :  { %v1388_v47 = vpop.f32.mrb[2].mxu0  ;;  %v658_v51 = vmax.f32 %v403_v46, 0.0  ;;  %v706_v3 = vmax.f32 %v595_v1, 0.0  ;;  %v1436_v4 = vpop.f32.mrb[2].mxu1 }
  0xe0   :  { %v661_v49 = vmax.f32 %v1388_v47, 0.0  ;;  %v406_v50 = vpop.f32.mrb[3].mxu0  ;;  %v709_v6 = vmax.f32 %v1436_v4, 0.0  ;;  %v598_v7 = vpop.f32.mrb[3].mxu1 }
  0xe1   :  { %v659_v52 = vmax.f32 %v406_v50, 0.0  ;;  %v707_v8 = vmax.f32 %v598_v7, 0.0 }
  0xe2   :  { %v1788_v53 = vpack.c.bf16 %v661_v49, %v660_v48  ;;  %v1796_v10 = vpack.c.bf16 %v709_v6, %v708_v0 }
  0xe3   :  { %v1790_v54 = vpack.c.bf16 %v659_v52, %v658_v51  ;;  %v1798_v12 = vpack.c.bf16 %v707_v8, %v706_v3 }
  0xe5   :  { %v1391_v55 = vpop.f32.mrb[4].mxu0  ;;  %v1439_v17 = vpop.f32.mrb[4].mxu1 }
  0xe6   :  { %v419_v56 = vpop.f32.mrb[5].mxu0  ;;  %v664_v58 = vmax.f32 %v1391_v55, 0.0  ;;  %v712_v20 = vmax.f32 %v1439_v17, 0.0  ;;  %v611_v21 = vpop.f32.mrb[5].mxu1 }
  0xe7   :  { %v1392_v57 = vpop.f32.mrb[6].mxu0  ;;  %v662_v62 = vmax.f32 %v419_v56, 0.0  ;;  %v710_v23 = vmax.f32 %v611_v21, 0.0  ;;  %v1440_v24 = vpop.f32.mrb[6].mxu1 }
  0xe8   :  { %v665_v59 = vmax.f32 %v1392_v57, 0.0  ;;  %v422_v60 = vpop.f32.mrb[7].mxu0  ;;  %v713_v26 = vmax.f32 %v1440_v24, 0.0  ;;  %v614_v27 = vpop.f32.mrb[7].mxu1 }
  0xe9   :  { %v663_v63 = vmax.f32 %v422_v60, 0.0  ;;  %v711_v28 = vmax.f32 %v614_v27, 0.0 }
  0xea   :  { %v1792_v2 = vpack.c.bf16 %v665_v59, %v664_v58  ;;  %v1804_v30 = vpack.c.bf16 %v713_v26, %v712_v20 }
  0xeb   :  { %v1794_v5 = vpack.c.bf16 %v663_v63, %v662_v62  ;;  %v1806_v32 = vpack.c.bf16 %v711_v28, %v710_v23 }
  0xed   :  { %v1395_v9 = vpop.f32.mrb[8].mxu0  ;;  %v1443_v37 = vpop.f32.mrb[8].mxu1 }
  0xee   :  { %v435_v11 = vpop.f32.mrb[9].mxu0  ;;  %v668_v14 = vmax.f32 %v1395_v9, 0.0  ;;  %v716_v42 = vmax.f32 %v1443_v37, 0.0  ;;  %v627_v43 = vpop.f32.mrb[9].mxu1 }
  0xef   :  { %v1396_v13 = vpop.f32.mrb[10].mxu0  ;;  %v666_v18 = vmax.f32 %v435_v11, 0.0  ;;  %v714_v46 = vmax.f32 %v627_v43, 0.0  ;;  %v1444_v47 = vpop.f32.mrb[10].mxu1 }
  0xf0   :  { %v669_v15 = vmax.f32 %v1396_v13, 0.0  ;;  %v438_v16 = vpop.f32.mrb[11].mxu0  ;;  %v717_v49 = vmax.f32 %v1444_v47, 0.0  ;;  %v630_v50 = vpop.f32.mrb[11].mxu1 }
  0xf1   :  { %v667_v19 = vmax.f32 %v438_v16, 0.0  ;;  %v715_v51 = vmax.f32 %v630_v50, 0.0 }
  0xf2   :  { %v1800_v22 = vpack.c.bf16 %v669_v15, %v668_v14  ;;  %v1812_v55 = vpack.c.bf16 %v717_v49, %v716_v42 }
  0xf3   :  { %v1802_v25 = vpack.c.bf16 %v667_v19, %v666_v18  ;;  %v1814_v57 = vpack.c.bf16 %v715_v51, %v714_v46 }
  0xf5   :  { %v1399_v29 = vpop.f32.mrb[12].mxu0  ;;  %v1447_v62 = vpop.f32.mrb[12].mxu1 }
  0xf6   :  { %v451_v31 = vpop.f32.mrb[13].mxu0  ;;  %v672_v34 = vmax.f32 %v1399_v29, 0.0  ;;  %v720_v1 = vmax.f32 %v1447_v62, 0.0  ;;  %v643_v3 = vpop.f32.mrb[13].mxu1 }
  0xf7   :  { %v1400_v33 = vpop.f32.mrb[14].mxu0  ;;  %v670_v39 = vmax.f32 %v451_v31, 0.0  ;;  %v718_v6 = vmax.f32 %v643_v3, 0.0  ;;  %v1448_v7 = vpop.f32.mrb[14].mxu1 }
  0xf8   :  { %v673_v35 = vmax.f32 %v1400_v33, 0.0  ;;  %v454_v36 = vpop.f32.mrb[15].mxu0  ;;  %v721_v9 = vmax.f32 %v1448_v7, 0.0  ;;  %v646_v11 = vpop.f32.mrb[15].mxu1 }
  0xf9   :  { %v671_v40 = vmax.f32 %v454_v36, 0.0  ;;  %v719_v13 = vmax.f32 %v646_v11, 0.0 }
  0xfa   :  { %v1808_v45 = vpack.c.bf16 %v673_v35, %v672_v34  ;;  %v1816_v15 = vpack.c.bf16 %v721_v9, %v720_v1 }
  0xfb   :  { %v1810_v48 = vpack.c.bf16 %v671_v40, %v670_v39  ;;  %v1819_v17 = vpack.c.bf16 %v719_v13, %v718_v6 }
  0xfd   :  { %v1403_v52 = vpop.f32.mrb[16].mxu0 }
  0xfe   :  { %v467_v56 = vpop.f32.mrb[17].mxu0  ;;  %v676_v59 = vmax.f32 %v1403_v52, 0.0 }
  0xff   :  { %v1404_v58 = vpop.f32.mrb[18].mxu0  ;;  %v674_v63 = vmax.f32 %v467_v56, 0.0 }
 0x100   :  { %v677_v60 = vmax.f32 %v1404_v58, 0.0  ;;  %v470_v61 = vpop.f32.mrb[19].mxu0 }
 0x101   :  { %v675_v0 = vmax.f32 %v470_v61, 0.0 }
 0x102   :  { %v1461_v4 = vpack.c.bf16 %v677_v60, %v676_v59 }
 0x103   :  { %v1457_v8 = vpack.c.bf16 %v675_v0, %v674_v63  ;;  %v740_v63 = vcombine.high %v1786_v44, %v1786_v44 }
 0x105   :  { %v1407_v14 = vpop.f32.mrb[20].mxu0  ;;  %1458 = vmatprep.subr.bf16.mxu1 %v1457_v8 }
 0x106   :  { %v483_v16 = vpop.f32.mrb[21].mxu0  ;;  %1460 = vmatpush3.bf16.msra.mxu1 %v1790_v54  ;;  %v680_v19 = vmax.f32 %v1407_v14, 0.0 }
 0x107   :  { %v1408_v18 = vpop.f32.mrb[22].mxu0  ;;  %1462 = vmatprep.subr.bf16.mxu1 %v1461_v4  ;;  %v678_v23 = vmax.f32 %v483_v16, 0.0 }
 0x108   :  { %v681_v20 = vmax.f32 %v1408_v18, 0.0  ;;  %v486_v21 = vpop.f32.mrb[23].mxu0 }
 0x109   :  { %v679_v24 = vmax.f32 %v486_v21, 0.0 }
 0x10a   :  { %v1469_v26 = vpack.c.bf16 %v681_v20, %v680_v19  ;;  %1464 = vmatpush3.bf16.msra.mxu1 %v1788_v53 }
 0x10b   :  { %v1465_v27 = vpack.c.bf16 %v679_v24, %v678_v23 }
 0x10d   :  { %v1411_v28 = vpop.f32.mrb[24].mxu0  ;;  %1466 = vmatprep.subr.bf16.mxu1 %v1465_v27 }
 0x10e   :  { %v499_v29 = vpop.f32.mrb[25].mxu0  ;;  %1468 = vmatpush3.bf16.msra.mxu1 %v1794_v5  ;;  %v684_v54 = vmax.f32 %v1411_v28, 0.0 }
 0x10f   :  { %v1412_v31 = vpop.f32.mrb[26].mxu0  ;;  %1470 = vmatprep.subr.bf16.mxu1 %v1469_v26  ;;  %v682_v35 = vmax.f32 %v499_v29, 0.0 }
 0x110   :  { %v685_v33 = vmax.f32 %v1412_v31, 0.0  ;;  %v502_v34 = vpop.f32.mrb[27].mxu0 }
 0x111   :  { %v683_v36 = vmax.f32 %v502_v34, 0.0 }
 0x112   :  { %v1477_v37 = vpack.c.bf16 %v685_v33, %v684_v54  ;;  %1472 = vmatpush3.bf16.msra.mxu1 %v1792_v2  ;;  %v1568_v54 = vld [vmem:[%s1904_s3 + $0x8] sm:$0xff]  }
 0x113   :  { %v1473_v39 = vpack.c.bf16 %v683_v36, %v682_v35 }
 0x115   :  { %v1415_v40 = vpop.f32.mrb[28].mxu0  ;;  %1474 = vmatprep.subr.bf16.mxu1 %v1473_v39 }
 0x116   :  { %v515_v53 = vpop.f32.mrb[29].mxu0  ;;  %1476 = vmatpush3.bf16.msra.mxu1 %v1802_v25  ;;  %v688_v43 = vmax.f32 %v1415_v40, 0.0  ;;  %v1257_v40 = vld [vmem:[%s1907_s4] ss:$0 sm:$0xff] }
 0x117   :  { %v1416_v42 = vpop.f32.mrb[30].mxu0  ;;  %1478 = vmatprep.subr.bf16.mxu1 %v1477_v37  ;;  %v686_v47 = vmax.f32 %v515_v53, 0.0 }
 0x118   :  { %v689_v5 = vmax.f32 %v1416_v42, 0.0  ;;  %v518_v46 = vpop.f32.mrb[31].mxu0 }
 0x119   :  { %v687_v49 = vmax.f32 %v518_v46, 0.0  ;;  %v1569_v46 = vld [vmem:[%s1908_s6] ss:$16 sps:$4 sm:$0xff]  }
 0x11a   :  { %v1485_v50 = vpack.c.bf16 %v689_v5, %v688_v43  ;;  %1480 = vmatpush3.bf16.msra.mxu1 %v1800_v22 }
 0x11b   :  { %v1481_v51 = vpack.c.bf16 %v687_v49, %v686_v47  ;;  %v1571_v49 = vld [vmem:[%s1908_s6 + $0x4] ss:$16 sps:$4 sm:$0xff]  }
 0x11d   :  { %v1419_v52 = vpop.f32.mrb[32].mxu0  ;;  %1482 = vmatprep.subr.bf16.mxu1 %v1481_v51  ;;  %v1572_v51 = vld [vmem:[%s1908_s6 + $0x20] ss:$16 sps:$4 sm:$0xff]  }
 0x11e   :  { %v692_v2 = vmax.f32 %v1419_v52, 0.0  ;;  %v531_v56 = vpop.f32.mrb[33].mxu0  ;;  %1484 = vmatpush3.bf16.msra.mxu1 %v1810_v48 }
 0x11f   :  { %v1420_v58 = vpop.f32.mrb[34].mxu0  ;;  %1486 = vmatprep.subr.bf16.mxu1 %v1485_v50  ;;  %v690_v60 = vmax.f32 %v531_v56, 0.0  ;;  %v1574_v50 = vld [vmem:[%s1908_s6 + $0x24] ss:$16 sps:$4 sm:$0xff]  }
 0x120   :  { %v693_v25 = vmax.f32 %v1420_v58, 0.0  ;;  %v534_v59 = vpop.f32.mrb[35].mxu0  ;;  %v1577_v58 = vld [vmem:[%s1908_s6 + $0xc] ss:$16 sps:$4 sm:$0xff]  }
 0x121   :  { %v691_v61 = vmax.f32 %v534_v59, 0.0 }
 0x122   :  { %v1495_v62 = vpack.c.bf16 %v693_v25, %v692_v2  ;;  %1488 = vmatpush3.bf16.msra.mxu1 %v1808_v45  ;;  %v1589_v25 = vmov 0  }
 0x123   :  { %v1491_v22 = vpack.c.bf16 %v691_v61, %v690_v60  ;;  %1490 = vmatprep.subr.bf16.mxu1 %v1798_v12 }
 0x125   :  { %v1423_v0 = vpop.f32.mrb[36].mxu0  ;;  %810 = vmatmul.mubr.f32.vlgmr.msra.gmra.mrb[16].mxu1 %v1782_v41 }
 0x126   :  { %v696_v1 = vmax.f32 %v1423_v0, 0.0  ;;  %v547_v48 = vpop.f32.mrb[37].mxu0  ;;  %1492 = vmatpush3.bf16.msra.mxu1 %v1491_v22  ;;  %879 = vmatprep.mubr.f32.mxu1 %v740_v63  ;;  %v1575_v0 = vld [vmem:[%s1908_s6 + $0x8] ss:$16 sps:$4 sm:$0xff]  }
 0x127   :  { %v1424_v3 = vpop.f32.mrb[38].mxu0  ;;  %1494 = vmatprep.subr.bf16.mxu1 %v1796_v10  ;;  %v694_v7 = vmax.f32 %v547_v48, 0.0  ;;  %v1580_v48 = vld [vmem:[%s1908_s6 + $0x2c] ss:$16 sps:$4 sm:$0xff]  }
 0x128   :  { %v697_v4 = vmax.f32 %v1424_v3, 0.0  ;;  %v550_v6 = vpop.f32.mrb[39].mxu0  ;;  %v1578_v3 = vld [vmem:[%s1908_s6 + $0x28] ss:$16 sps:$4 sm:$0xff]  }
 0x129   :  { %v695_v45 = vmax.f32 %v550_v6, 0.0  ;;  %v980_v6 = vsub.s32 0, %v1776_v38 }
 0x12a   :  { %v1503_v8 = vpack.c.bf16 %v697_v4, %v696_v1  ;;  %1496 = vmatpush3.bf16.msra.mxu1 %v1495_v62 }
 0x12b   :  { %v1499_v9 = vpack.c.bf16 %v695_v45, %v694_v7  ;;  %1498 = vmatprep.subr.bf16.mxu1 %v1806_v32  ;;  %v976_v7 = vld [vmem:[%s1909_s7] sm:$0xf]  ;;  %v984_v45 = vsub.s32 1, %v1776_v38 }
 0x12d   :  { %v1427_v12 = vpop.f32.mrb[40].mxu0 }
 0x12e   :  { %v700_v11 = vmax.f32 %v1427_v12, 0.0  ;;  %v563_v13 = vpop.f32.mrb[41].mxu0  ;;  %1500 = vmatpush3.bf16.msra.mxu1 %v1499_v9  ;;  %v985_v9 = vrot.slane %v976_v7, %v984_v45 }
 0x12f   :  { %v1428_v41 = vpop.f32.mrb[42].mxu0  ;;  %1502 = vmatprep.subr.bf16.mxu1 %v1804_v30  ;;  %v698_v18 = vmax.f32 %v563_v13, 0.0 }
 0x130   :  { %v701_v14 = vmax.f32 %v1428_v41, 0.0  ;;  %v566_v16 = vpop.f32.mrb[43].mxu0  ;;  %v988_v41 = vsub.s32 2, %v1776_v38 }
 0x131   :  { %v699_v10 = vmax.f32 %v566_v16, 0.0 }
 0x132   :  { %v1511_v19 = vpack.c.bf16 %v701_v14, %v700_v11  ;;  %1504 = vmatpush3.bf16.msra.mxu1 %v1503_v8  ;;  %v981_v8 = vrot.slane %v976_v7, %v980_v6 }
 0x133   :  { %v1507_v20 = vpack.c.bf16 %v699_v10, %v698_v18  ;;  %1506 = vmatprep.subr.bf16.mxu1 %v1814_v57  ;;  %v1567_v57 = vld [vmem:[%s1904_s3] sm:$0xff]   ;;  %v992_v18 = vsub.s32 3, %v1776_v38 }
 0x135   :  { %v1431_v21 = vpop.f32.mrb[44].mxu0 }
 0x136   :  { %v704_v23 = vmax.f32 %v1431_v21, 0.0  ;;  %v579_v24 = vpop.f32.mrb[45].mxu0  ;;  %1508 = vmatpush3.bf16.msra.mxu1 %v1507_v20 }
 0x137   :  { %v1432_v32 = vpop.f32.mrb[46].mxu0  ;;  %1510 = vmatprep.subr.bf16.mxu1 %v1812_v55  ;;  %v702_v28 = vmax.f32 %v579_v24, 0.0  ;;  %v1586_v55 = vmov 0.0  }
 0x138   :  { %v705_v26 = vmax.f32 %v1432_v32, 0.0  ;;  %v582_v27 = vpop.f32.mrb[47].mxu0  ;;  %v989_v32 = vrot.slane %v976_v7, %v988_v41 }
 0x139   :  { %v703_v30 = vmax.f32 %v582_v27, 0.0  ;;  %v993_v27 = vrot.slane %v976_v7, %v992_v18 }
 0x13a   :  { %v1519_v29 = vpack.c.bf16 %v705_v26, %v704_v23  ;;  %1512 = vmatpush3.bf16.msra.mxu1 %v1511_v19  ;;  %v1591_v23 = vmov 1966171168  }
 0x13b   :  { %v1515_v31 = vpack.c.bf16 %v703_v30, %v702_v28  ;;  %1514 = vmatprep.subr.bf16.mxu1 %v1819_v17  ;;  %v1160_v24 = vunpack.c.l.s4 %v1591_v23 }
 0x13e   :  { %1516 = vmatpush3.bf16.msra.mxu1 %v1515_v31 }
 0x13f   :  { %1518 = vmatprep.subr.bf16.mxu1 %v1816_v15  ;;  %v956_v15 = vld [vmem:[%s1905_s5] sm:$0x3] }
 0x140   :  { %958 = vrot.lane.b32.xlu0 %v956_v15, %s1588_s17 }
 0x142   :  { %1520 = vmatpush3.bf16.msra.mxu1 %v1519_v29  ;;  %v1161_v29 = vunpack.c.0.s8 %v1160_v24 }
 0x143   :  { %1449 = vmatprep.subr.bf16.mxu1 %v1586_v55 }
 0x145   :  { %880 = vmatmul.mubr.f32.vlgmr.msra.gmra.mrb[18].mxu1 %v1786_v44 }
 0x146   :  { %1450 = vmatpush3.bf16.msra.mxu1 %v1567_v57  ;;  %1453 = vmatprep.mubr.msk.bf16.mxu1 %vm1587_vm1, %v1586_v55 }
 0x147   :  { %1451 = vmatprep.subr.bf16.mxu1 %v1586_v55 }
 0x14a   :  { %1452 = vmatpush3.bf16.msra.mxu1 %v1568_v54 }
 0x14b   :  { %1041 = vmatprep.subr.bf16.mxu1 %v1571_v49 }
 0x1b2   :  { %v959_v59 = vpop.permute.xlu0 %958 }
 0x1f8   :  { %v1340_v44 = vpop.f32.mrb[16].mxu1 }
 0x1f9   :  { %v1341_v17 = vpop.f32.mrb[17].mxu1 }
 0x1fa   :  { %v1342_v33 = vadd.f32 %v1341_v17, %v1340_v44 }
 0x218   :  { %v1375_v34 = vpop.f32.mrb[18].mxu1 }
 0x219   :  { %v1376_v35 = vpop.f32.mrb[19].mxu1 }
 0x21a   :  { %v1377_v36 = vadd.f32 %v1376_v35, %v1375_v34 }
 0x21c   :  { %v882_v37 = vadd.f32 %v1377_v36, %v1342_v33  ;;  %v1164_v33 = vsub.s32 %v1161_v29, %v1776_v38 }
 0x21e   :  { %v885_v39 = vpack.c.bf16 %v882_v37, %v882_v37  ;;  %1136 = vst.msk [vmem:[%s1906_s8] sm:$0x3] %vm1135_vm2, %v882_v37 }
 0x220   :  { %1454 = vmatmul.mubr.msk.bf16.vlgmr.msra.gmra.mrb[20].mxu1 %vm272_vm0, %v885_v39 }
 0x221   :  { %1042 = vmatpush1.bf16.msra.mxu1 %v1569_v46  ;;  %1073 = vmatprep.mubr.bf16.mxu1 %v1589_v25 }
 0x222   :  { %1043 = vmatprep.subr.bf16.mxu1 %v1574_v50 }
 0x225   :  { %1044 = vmatpush1.bf16.msra.mxu1 %v1572_v51 }
 0x226   :  { %1082 = vmatprep.subr.bf16.mxu1 %v1577_v58 }
 0x2f3   :  { %v946_v53 = vpop.f32.mrb[20].mxu1 }
 0x2f4   :  { %v947_v42 = vadd.f32 %v1257_v40, %v946_v53  ;;  %v1455_v43 = vpop.f32.mrb[21].mxu1 }
 0x2f5   :  { %v949_v5 = vpop.f32.mrb[22].mxu1 }
 0x2f6   :  { %1581 = vtanh.f32 %v947_v42  ;;  %v1456_v47 = vpop.f32.mrb[23].mxu1 }
 0x300   :  { %v1582_v52 = vpop.eup %1581 }
 0x301   :  { %1138 = vrot.lane.b32.xlu1 %v1582_v52, %s1588_s17  ;;  %v953_v2 = vmul.f32 0.5, %v1582_v52 }
 0x303   :  { %v954_v56 = vmul.f32 1.442695, %v953_v2 }
 0x305   :  { %1583 = vpow2.f32 %v954_v56 }
 0x30f   :  { %v1584_v60 = vpop.eup %1583 }
 0x310   :  { %v961_v61 = vmul.f32 %v1584_v60, %v959_v59 }
 0x312   :  { %963 = vrot.lane.b32.xlu0 %v961_v61, %s1590_s28 }
 0x373   :  { %v1139_v62 = vpop.permute.xlu1 %1138 }
 0x374   :  { %1142 = vst.msk [vmem:[%s1906_s8] sm:$0x3] %vm1141_vm3, %v1139_v62 }
 0x384   :  { %v964_v63 = vpop.permute.xlu0 %963 }
 0x385   :  { %v966_v22 = vadd.f32 %v1582_v52, %v964_v63 }
 0x387   :  { %v967_v1 = vpack.c.bf16 %v966_v22, %v966_v22  ;;  %1144 = vrot.lane.b32.xlu1 %v966_v22, %s1590_s28 }
 0x389   :  { %1269 = vmatmul.mubr.msk.bf16.vlgmr.msra.gmra.mrb[24].mxu1 %vm272_vm0, %v967_v1 }
 0x38a   :  { %1083 = vmatpush1.bf16.msra.mxu1 %v1575_v0  ;;  %1114 = vmatprep.mubr.bf16.mxu1 %v1589_v25 }
 0x38b   :  { %1084 = vmatprep.subr.bf16.mxu1 %v1580_v48 }
 0x38e   :  { %1085 = vmatpush1.bf16.msra.mxu1 %v1578_v3 }
 0x391   :  { %1270 = vmatmul.mubr.msk.bf16.vlgmr.msra.gmra.mrb[28].mxu1 %vm272_vm0, %v967_v1 }
 0x3f9   :  { %v1145_v4 = vpop.permute.xlu1 %1144 }
 0x3fa   :  { %1148 = vst.msk [vmem:[%s1906_s8] sm:$0x3] %vm1147_vm4, %v1145_v4 }
 0x45c   :  { %v1075_v12 = vpop.f32.mrb[24].mxu1 }
 0x45d   :  { %v1076_v11 = vadd.f32 %v1075_v12, %v981_v8  ;;  %v1077_v13 = vpop.f32.mrb[25].mxu1 }
 0x45e   :  { %v1078_v14 = vadd.f32 %v1077_v13, %v985_v9  ;;  %v1079_v16 = vpop.f32.mrb[26].mxu1 }
 0x45f   :  { %vm1123_vm5 = vcmp.gt.f32.partialorder %v1076_v11, 0.0  ;;  %v1127_v10 = vmul.f32 0.01, %v1076_v11  ;;  %v1080_v19 = vpop.f32.mrb[27].mxu1 }
 0x460   :  { %vm1124_vm6 = vcmp.gt.f32.partialorder %v1078_v14, 0.0  ;;  %v1128_v20 = vmul.f32 0.01, %v1078_v14 }
 0x461   :  { %v1131_v21 = vsel %vm1123_vm5, %v1076_v11, %v1127_v10 }
 0x462   :  { %v1132_v26 = vsel %vm1124_vm6, %v1078_v14, %v1128_v20 }
 0x463   :  { %v1271_v28 = vpack.c.bf16 %v1132_v26, %v1131_v21 }
 0x464   :  { %v1116_v30 = vpop.f32.mrb[28].mxu1 }
 0x465   :  { %v1117_v31 = vadd.f32 %v1116_v30, %v989_v32  ;;  %v1118_v57 = vpop.f32.mrb[29].mxu1  ;;  %v1165_v37 = vrot.slane %v1271_v28, %v1164_v33 }
 0x466   :  { %v1119_v55 = vadd.f32 %v1118_v57, %v993_v27  ;;  %v1120_v54 = vpop.f32.mrb[30].mxu1 }
 0x467   :  { %vm1125_vm7 = vcmp.gt.f32.partialorder %v1117_v31, 0.0  ;;  %v1129_v15 = vmul.f32 0.01, %v1117_v31  ;;  %v1121_v44 = vpop.f32.mrb[31].mxu1 }
 0x468   :  { %vm1126_vm8 = vcmp.gt.f32.partialorder %v1119_v55, 0.0  ;;  %v1130_v17 = vmul.f32 0.01, %v1119_v55 }
 0x469   :  { %v1133_v34 = vsel %vm1125_vm7, %v1117_v31, %v1129_v15 }
 0x46a   :  { %v1134_v35 = vsel %vm1126_vm8, %v1119_v55, %v1130_v17 }
 0x46b   :  { %v1272_v36 = vpack.c.bf16 %v1134_v35, %v1133_v34 }
 0x46d   :  { %v1172_v39 = vrot.slane %v1272_v36, %v1164_v33 }
 0x46f   :  { %v1173_v40 = vcombine.low %v1165_v37, %v1172_v39 }
 0x471   :  { %1273 = vst.sshfl [vmem:[%s1910_s9] sm:$0x55 pattern:$0x73625140] %v1173_v40 }

// kernel: vae_forward.9
= control target key start
LH: loop header
LB: loop body
LE: loop exit
PB: predicated region body
PF: predicated region fallthrough
CT: control target
= control target key end

     0   :  { %vm359_vm0 = vcmask 519168   ;;  %s662_s1 = inlined_call_operand.vmem [shape: bf16[128,64], index: 1, kind: input, shape index: {}]   ;;  %s663_s0 = inlined_call_operand.vmem [shape: bf16[128,128], index: 0, kind: input, shape index: {}]   ;;  %s664_s2 = inlined_call_operand.vmem [shape: f32[1,64], index: 2, kind: input, shape index: {}]   ;;  %s665_s3 = inlined_call_operand.vmem [shape: bf16[128,64], index: 3, kind: output, shape index: {}]  }
   0x1   :  { %v493_v0 = vld [vmem:[%s662_s1] sm:$0xff]   ;;  %v494_v1 = vld [vmem:[%s662_s1 + $0x8] sm:$0xff]   ;;  %v495_v2 = vld [vmem:[%s662_s1 + $0x10] sm:$0xff]  }
   0x2   :  { %445 = vmatprep.subr.bf16.mxu0 %v493_v0  ;;  %477 = vmatprep.subr.bf16.mxu1 %v493_v0  ;;  %v496_v3 = vld [vmem:[%s662_s1 + $0x18] sm:$0xff]   ;;  %v501_v4 = vld [vmem:[%s663_s0] sm:$0xff]   ;;  %v498_v7 = vld [vmem:[%s662_s1 + $0x28] sm:$0xff]  }
   0x3   :  { %446 = vmatpush3.bf16.msra.mxu0 %v493_v0  ;;  %485 = vmatpush3.bf16.msra.mxu1 %v493_v0  ;;  %v502_v5 = vld [vmem:[%s663_s0 + $0x20] sm:$0xff]   ;;  %v499_v8 = vld [vmem:[%s662_s1 + $0x30] sm:$0xff]   ;;  %v500_v9 = vld [vmem:[%s662_s1 + $0x38] sm:$0xff]  }
   0x4   :  { %447 = vmatprep.subr.bf16.mxu0 %v494_v1  ;;  %478 = vmatprep.subr.bf16.mxu1 %v494_v1  ;;  %v497_v6 = vld [vmem:[%s662_s1 + $0x20] sm:$0xff]   ;;  %v503_v10 = vld [vmem:[%s663_s0 + $0x8] sm:$0xff]   ;;  %v505_v12 = vld [vmem:[%s663_s0 + $0x10] sm:$0xff]  }
   0x5   :  { %461 = vmatprep.mubr.bf16.mxu0 %v501_v4  ;;  %469 = vmatprep.mubr.bf16.mxu1 %v502_v5  ;;  %v504_v11 = vld [vmem:[%s663_s0 + $0x28] sm:$0xff]   ;;  %v506_v13 = vld [vmem:[%s663_s0 + $0x30] sm:$0xff]   ;;  %v507_v14 = vld [vmem:[%s663_s0 + $0x18] sm:$0xff]  }
   0x6   :  { %v508_v15 = vld [vmem:[%s663_s0 + $0x38] sm:$0xff]   ;;  %v580_v16 = vld [vmem:[%s664_s2] ss:$0 sm:$0xff] }
   0x7   :  { %448 = vmatpush3.bf16.msra.mxu0 %v494_v1  ;;  %486 = vmatpush3.bf16.msra.mxu1 %v494_v1 }
   0x8   :  { %449 = vmatprep.subr.bf16.mxu0 %v495_v2  ;;  %479 = vmatprep.subr.bf16.mxu1 %v495_v2 }
   0xb   :  { %450 = vmatpush3.bf16.msra.mxu0 %v495_v2  ;;  %487 = vmatpush3.bf16.msra.mxu1 %v495_v2 }
   0xc   :  { %451 = vmatprep.subr.bf16.mxu0 %v496_v3  ;;  %480 = vmatprep.subr.bf16.mxu1 %v496_v3 }
   0xf   :  { %452 = vmatpush3.bf16.msra.mxu0 %v496_v3  ;;  %488 = vmatpush3.bf16.msra.mxu1 %v496_v3 }
  0x10   :  { %453 = vmatprep.subr.bf16.mxu0 %v497_v6  ;;  %481 = vmatprep.subr.bf16.mxu1 %v497_v6 }
  0x13   :  { %454 = vmatpush3.bf16.msra.mxu0 %v497_v6  ;;  %489 = vmatpush3.bf16.msra.mxu1 %v497_v6 }
  0x14   :  { %455 = vmatprep.subr.bf16.mxu0 %v498_v7  ;;  %482 = vmatprep.subr.bf16.mxu1 %v498_v7 }
  0x17   :  { %456 = vmatpush3.bf16.msra.mxu0 %v498_v7  ;;  %490 = vmatpush3.bf16.msra.mxu1 %v498_v7 }
  0x18   :  { %457 = vmatprep.subr.bf16.mxu0 %v499_v8  ;;  %483 = vmatprep.subr.bf16.mxu1 %v499_v8 }
  0x1b   :  { %458 = vmatpush3.bf16.msra.mxu0 %v499_v8  ;;  %491 = vmatpush3.bf16.msra.mxu1 %v499_v8 }
  0x1c   :  { %459 = vmatprep.subr.bf16.mxu0 %v500_v9  ;;  %484 = vmatprep.subr.bf16.mxu1 %v500_v9 }
  0x1f   :  { %460 = vmatpush3.bf16.msra.mxu0 %v500_v9  ;;  %492 = vmatpush3.bf16.msra.mxu1 %v500_v9 }
  0x22   :  { %462 = vmatmul.mubr.bf16.vlgmr.msra.gmra.mrb[0].mxu0 %v503_v10  ;;  %470 = vmatmul.mubr.bf16.vlgmr.msra.gmra.mrb[0].mxu1 %v504_v11 }
  0x23   :  { %465 = vmatprep.mubr.bf16.mxu0 %v505_v12  ;;  %473 = vmatprep.mubr.bf16.mxu1 %v506_v13 }
  0x2a   :  { %466 = vmatmul.mubr.bf16.gmra.mrb[4].mxu0 %v507_v14  ;;  %474 = vmatmul.mubr.bf16.gmra.mrb[4].mxu1 %v508_v15 }
  0xf5   :  { %v463_v17 = vpop.f32.mrb[0].mxu0  ;;  %v471_v18 = vpop.f32.mrb[0].mxu1 }
  0xf6   :  { %v193_v19 = vadd.f32 %v463_v17, %v580_v16  ;;  %v225_v20 = vadd.f32 %v471_v18, %v580_v16  ;;  %v184_v21 = vpop.f32.mrb[1].mxu0  ;;  %v216_v22 = vpop.f32.mrb[1].mxu1 }
  0xf7   :  { %v185_v23 = vadd.f32 %v580_v16, %v184_v21  ;;  %v217_v24 = vadd.f32 %v580_v16, %v216_v22  ;;  %v464_v25 = vpop.f32.mrb[2].mxu0  ;;  %v472_v26 = vpop.f32.mrb[2].mxu1 }
  0xf8   :  { %vm249_vm1 = vcmp.gt.f32.partialorder %v193_v19, 0.0  ;;  %v265_v27 = vmul.f32 0.01, %v193_v19  ;;  %vm257_vm2 = vcmp.gt.f32.partialorder %v225_v20, 0.0  ;;  %v273_v28 = vmul.f32 0.01, %v225_v20 }
  0xf9   :  { %vm247_vm3 = vcmp.gt.f32.partialorder %v185_v23, 0.0  ;;  %v263_v29 = vmul.f32 0.01, %v185_v23  ;;  %vm255_vm4 = vcmp.gt.f32.partialorder %v217_v24, 0.0  ;;  %v271_v30 = vmul.f32 0.01, %v217_v24 }
  0xfa   :  { %v281_v31 = vsel %vm249_vm1, %v193_v19, %v265_v27  ;;  %v289_v32 = vsel %vm257_vm2, %v225_v20, %v273_v28  ;;  %v196_v33 = vadd.f32 %v464_v25, %v580_v16  ;;  %v228_v34 = vadd.f32 %v472_v26, %v580_v16  ;;  %v187_v35 = vpop.f32.mrb[3].mxu0  ;;  %v219_v36 = vpop.f32.mrb[3].mxu1 }
  0xfb   :  { %v415_v37 = vpack.c.bf16 %v281_v31, %v281_v31  ;;  %v423_v38 = vpack.c.bf16 %v289_v32, %v289_v32  ;;  %v279_v39 = vsel %vm247_vm3, %v185_v23, %v263_v29  ;;  %v287_v40 = vsel %vm255_vm4, %v217_v24, %v271_v30 }
  0xfc   :  { %v413_v41 = vpack.c.bf16 %v279_v39, %v279_v39  ;;  %v421_v42 = vpack.c.bf16 %v287_v40, %v287_v40  ;;  %vm250_vm5 = vcmp.gt.f32.partialorder %v196_v33, 0.0  ;;  %v266_v43 = vmul.f32 0.01, %v196_v33 }
  0xfd   :  { %362 = vst.msk [vmem:[%s665_s3 + $0x8] sm:$0xf] %vm359_vm0, %v415_v37  ;;  %370 = vst.msk [vmem:[%s665_s3 + $0x28] sm:$0xf] %vm359_vm0, %v423_v38  ;;  %vm258_vm6 = vcmp.gt.f32.partialorder %v228_v34, 0.0  ;;  %v188_v45 = vadd.f32 %v580_v16, %v187_v35  ;;  %v220_v46 = vadd.f32 %v580_v16, %v219_v36  ;;  %v467_v47 = vpop.f32.mrb[4].mxu0 }
  0xfe   :  { %v274_v44 = vmul.f32 0.01, %v228_v34  ;;  %v475_v48 = vpop.f32.mrb[4].mxu1  ;;  %360 = vst.msk [vmem:[%s665_s3] sm:$0xf] %vm359_vm0, %v413_v41  ;;  %v282_v49 = vsel %vm250_vm5, %v196_v33, %v266_v43  ;;  %v209_v50 = vadd.f32 %v467_v47, %v580_v16  ;;  %v200_v52 = vpop.f32.mrb[5].mxu0 }
  0xff   :  { %368 = vst.msk [vmem:[%s665_s3 + $0x20] sm:$0xf] %vm359_vm0, %v421_v42  ;;  %v241_v51 = vadd.f32 %v475_v48, %v580_v16  ;;  %v232_v53 = vpop.f32.mrb[5].mxu1  ;;  %v416_v54 = vpack.c.bf16 %v282_v49, %v282_v49  ;;  %vm248_vm7 = vcmp.gt.f32.partialorder %v188_v45, 0.0  ;;  %v264_v56 = vmul.f32 0.01, %v188_v45 }
 0x100   :  { %v290_v55 = vsel %vm258_vm6, %v228_v34, %v274_v44  ;;  %v468_v57 = vpop.f32.mrb[6].mxu0  ;;  %v476_v58 = vpop.f32.mrb[6].mxu1  ;;  %vm256_vm8 = vcmp.gt.f32.partialorder %v220_v46, 0.0  ;;  %v272_v60 = vmul.f32 0.01, %v220_v46  ;;  %vm253_vm9 = vcmp.gt.f32.partialorder %v209_v50, 0.0 }
 0x101   :  { %v424_v59 = vpack.c.bf16 %v290_v55, %v290_v55  ;;  %v203_v61 = vpop.f32.mrb[7].mxu0  ;;  %v235_v62 = vpop.f32.mrb[7].mxu1  ;;  %363 = vst.msk [vmem:[%s665_s3 + $0xc] sm:$0xf] %vm359_vm0, %v416_v54  ;;  %v280_v63 = vsel %vm248_vm7, %v188_v45, %v264_v56  ;;  %v269_v0 = vmul.f32 0.01, %v209_v50  ;;  %v201_v4 = vadd.f32 %v580_v16, %v200_v52 }
 0x102   :  { %vm261_vm10 = vcmp.gt.f32.partialorder %v241_v51, 0.0  ;;  %v277_v1 = vmul.f32 0.01, %v241_v51  ;;  %v414_v2 = vpack.c.bf16 %v280_v63, %v280_v63  ;;  %v288_v3 = vsel %vm256_vm8, %v220_v46, %v272_v60 }
 0x103   :  { %371 = vst.msk [vmem:[%s665_s3 + $0x2c] sm:$0xf] %vm359_vm0, %v424_v59  ;;  %v233_v5 = vadd.f32 %v580_v16, %v232_v53  ;;  %v422_v6 = vpack.c.bf16 %v288_v3, %v288_v3  ;;  %v285_v7 = vsel %vm253_vm9, %v209_v50, %v269_v0  ;;  %v212_v9 = vadd.f32 %v468_v57, %v580_v16 }
 0x104   :  { %v293_v8 = vsel %vm261_vm10, %v241_v51, %v277_v1  ;;  %361 = vst.msk [vmem:[%s665_s3 + $0x4] sm:$0xf] %vm359_vm0, %v414_v2  ;;  %v419_v10 = vpack.c.bf16 %v285_v7, %v285_v7  ;;  %vm251_vm11 = vcmp.gt.f32.partialorder %v201_v4, 0.0  ;;  %v267_v12 = vmul.f32 0.01, %v201_v4 }
 0x105   :  { %v427_v11 = vpack.c.bf16 %v293_v8, %v293_v8  ;;  %369 = vst.msk [vmem:[%s665_s3 + $0x24] sm:$0xf] %vm359_vm0, %v422_v6  ;;  %vm259_vm12 = vcmp.gt.f32.partialorder %v233_v5, 0.0  ;;  %v275_v13 = vmul.f32 0.01, %v233_v5  ;;  %vm254_vm13 = vcmp.gt.f32.partialorder %v212_v9, 0.0 }
 0x106   :  { %v270_v14 = vmul.f32 0.01, %v212_v9  ;;  %366 = vst.msk [vmem:[%s665_s3 + $0x18] sm:$0xf] %vm359_vm0, %v419_v10  ;;  %v283_v15 = vsel %vm251_vm11, %v201_v4, %v267_v12  ;;  %v244_v17 = vadd.f32 %v476_v58, %v580_v16  ;;  %v204_v18 = vadd.f32 %v580_v16, %v203_v61 }
 0x107   :  { %374 = vst.msk [vmem:[%s665_s3 + $0x38] sm:$0xf] %vm359_vm0, %v427_v11  ;;  %v236_v19 = vadd.f32 %v580_v16, %v235_v62  ;;  %v417_v20 = vpack.c.bf16 %v283_v15, %v283_v15  ;;  %v291_v21 = vsel %vm259_vm12, %v233_v5, %v275_v13 }
 0x108   :  { %v286_v22 = vsel %vm254_vm13, %v212_v9, %v270_v14  ;;  %v425_v23 = vpack.c.bf16 %v291_v21, %v291_v21  ;;  %vm262_vm14 = vcmp.gt.f32.partialorder %v244_v17, 0.0  ;;  %v278_v25 = vmul.f32 0.01, %v244_v17 }
 0x109   :  { %v420_v24 = vpack.c.bf16 %v286_v22, %v286_v22  ;;  %364 = vst.msk [vmem:[%s665_s3 + $0x10] sm:$0xf] %vm359_vm0, %v417_v20  ;;  %vm252_vm15 = vcmp.gt.f32.partialorder %v204_v18, 0.0  ;;  %v268_v26 = vmul.f32 0.01, %v204_v18  ;;  %vm260_vm1 = vcmp.gt.f32.partialorder %v236_v19, 0.0 }
 0x10a   :  { %v276_v27 = vmul.f32 0.01, %v236_v19  ;;  %372 = vst.msk [vmem:[%s665_s3 + $0x30] sm:$0xf] %vm359_vm0, %v425_v23  ;;  %v294_v16 = vsel %vm262_vm14, %v244_v17, %v278_v25 }
 0x10b   :  { %367 = vst.msk [vmem:[%s665_s3 + $0x1c] sm:$0xf] %vm359_vm0, %v420_v24  ;;  %v428_v28 = vpack.c.bf16 %v294_v16, %v294_v16  ;;  %v284_v29 = vsel %vm252_vm15, %v204_v18, %v268_v26 }
 0x10c   :  { %v292_v30 = vsel %vm260_vm1, %v236_v19, %v276_v27  ;;  %v418_v31 = vpack.c.bf16 %v284_v29, %v284_v29 }
 0x10d   :  { %v426_v32 = vpack.c.bf16 %v292_v30, %v292_v30  ;;  %375 = vst.msk [vmem:[%s665_s3 + $0x3c] sm:$0xf] %vm359_vm0, %v428_v28 }
 0x10e   :  { %365 = vst.msk [vmem:[%s665_s3 + $0x14] sm:$0xf] %vm359_vm0, %v418_v31 }
 0x10f   :  { %373 = vst.msk [vmem:[%s665_s3 + $0x34] sm:$0xf] %vm359_vm0, %v426_v32 }

// kernel: vae_forward.10
= control target key start
LH: loop header
LB: loop body
LE: loop exit
PB: predicated region body
PF: predicated region fallthrough
CT: control target
= control target key end

     0   :  { %vm278_vm0 = vcmask 523264   ;;  %vm1112_vm1 = vcmask 519168   ;;  %s2094_s1 = inlined_call_operand.vmem [shape: bf16[64,64], index: 1, kind: input, shape index: {}]   ;;  %s2095_s0 = inlined_call_operand.vmem [shape: bf16[512,64], index: 0, kind: input, shape index: {}]   ;;  %s2096_s2 = inlined_call_operand.vmem [shape: f32[1,64], index: 2, kind: input, shape index: {}]   ;;  %s2097_s3 = inlined_call_operand.vmem [shape: bf16[512,64], index: 3, kind: output, shape index: {}]  }
   0x1   :  { %v1494_v0 = vld [vmem:[%s2094_s1] sm:$0xff]   ;;  %v1495_v1 = vld [vmem:[%s2094_s1 + $0x8] sm:$0xff]   ;;  %v1496_v2 = vld [vmem:[%s2094_s1 + $0x10] sm:$0xff]  }
   0x2   :  { %1414 = vmatprep.subr.bf16.mxu0 %v1494_v0  ;;  %1486 = vmatprep.subr.bf16.mxu1 %v1494_v0  ;;  %v1498_v3 = vld [vmem:[%s2095_s0] sm:$0xff]   ;;  %v1497_v5 = vld [vmem:[%s2094_s1 + $0x18] sm:$0xff]   ;;  %v1500_v6 = vld [vmem:[%s2095_s0 + $0x8] sm:$0xff]  }
   0x3   :  { %1415 = vmatpush3.bf16.msra.mxu0 %v1494_v0  ;;  %1490 = vmatpush3.bf16.msra.mxu1 %v1494_v0  ;;  %v1499_v4 = vld [vmem:[%s2095_s0 + $0x80] sm:$0xff]   ;;  %v1501_v7 = vld [vmem:[%s2095_s0 + $0x88] sm:$0xff]   ;;  %v1502_v8 = vld [vmem:[%s2095_s0 + $0x10] sm:$0xff]  }
   0x4   :  { %1416 = vmatprep.subr.bf16.mxu0 %v1495_v1  ;;  %1487 = vmatprep.subr.bf16.mxu1 %v1495_v1  ;;  %v1503_v9 = vld [vmem:[%s2095_s0 + $0x90] sm:$0xff]   ;;  %v1504_v10 = vld [vmem:[%s2095_s0 + $0x18] sm:$0xff]   ;;  %v1506_v12 = vld [vmem:[%s2095_s0 + $0x20] sm:$0xff]  }
   0x5   :  { %1422 = vmatprep.mubr.msk.bf16.mxu0 %vm278_vm0, %v1498_v3  ;;  %1454 = vmatprep.mubr.msk.bf16.mxu1 %vm278_vm0, %v1499_v4  ;;  %v1505_v11 = vld [vmem:[%s2095_s0 + $0x98] sm:$0xff]   ;;  %v1507_v13 = vld [vmem:[%s2095_s0 + $0xa0] sm:$0xff]   ;;  %v1508_v14 = vld [vmem:[%s2095_s0 + $0x28] sm:$0xff]  }
   0x6   :  { %v1509_v15 = vld [vmem:[%s2095_s0 + $0xa8] sm:$0xff]   ;;  %v1510_v16 = vld [vmem:[%s2095_s0 + $0x30] sm:$0xff]   ;;  %v1512_v18 = vld [vmem:[%s2095_s0 + $0x38] sm:$0xff]  }
   0x7   :  { %1417 = vmatpush3.bf16.msra.mxu0 %v1495_v1  ;;  %1491 = vmatpush3.bf16.msra.mxu1 %v1495_v1  ;;  %v1511_v17 = vld [vmem:[%s2095_s0 + $0xb0] sm:$0xff]   ;;  %v1513_v19 = vld [vmem:[%s2095_s0 + $0xb8] sm:$0xff]   ;;  %v1514_v20 = vld [vmem:[%s2095_s0 + $0x40] sm:$0xff]  }
   0x8   :  { %1418 = vmatprep.subr.bf16.mxu0 %v1496_v2  ;;  %1488 = vmatprep.subr.bf16.mxu1 %v1496_v2  ;;  %v1515_v21 = vld [vmem:[%s2095_s0 + $0xc0] sm:$0xff]   ;;  %v1516_v22 = vld [vmem:[%s2095_s0 + $0x48] sm:$0xff]   ;;  %v1518_v24 = vld [vmem:[%s2095_s0 + $0x50] sm:$0xff]  }
   0x9   :  { %v1517_v23 = vld [vmem:[%s2095_s0 + $0xc8] sm:$0xff]   ;;  %v1519_v25 = vld [vmem:[%s2095_s0 + $0xd0] sm:$0xff]   ;;  %v1520_v26 = vld [vmem:[%s2095_s0 + $0x58] sm:$0xff]  }
   0xa   :  { %v1521_v27 = vld [vmem:[%s2095_s0 + $0xd8] sm:$0xff]   ;;  %v1522_v28 = vld [vmem:[%s2095_s0 + $0x60] sm:$0xff]   ;;  %v1524_v30 = vld [vmem:[%s2095_s0 + $0x68] sm:$0xff]  }
   0xb   :  { %1419 = vmatpush3.bf16.msra.mxu0 %v1496_v2  ;;  %1492 = vmatpush3.bf16.msra.mxu1 %v1496_v2  ;;  %v1523_v29 = vld [vmem:[%s2095_s0 + $0xe0] sm:$0xff]   ;;  %v1525_v31 = vld [vmem:[%s2095_s0 + $0xe8] sm:$0xff]   ;;  %v1526_v32 = vld [vmem:[%s2095_s0 + $0x70] sm:$0xff]  }
   0xc   :  { %1420 = vmatprep.subr.bf16.mxu0 %v1497_v5  ;;  %1489 = vmatprep.subr.bf16.mxu1 %v1497_v5  ;;  %v1527_v33 = vld [vmem:[%s2095_s0 + $0xf0] sm:$0xff]   ;;  %v1528_v34 = vld [vmem:[%s2095_s0 + $0x78] sm:$0xff]   ;;  %v1693_v36 = vld [vmem:[%s2096_s2] ss:$0 sm:$0xff] }
   0xd   :  { %v1529_v35 = vld [vmem:[%s2095_s0 + $0xf8] sm:$0xff]  }
   0xf   :  { %1421 = vmatpush3.bf16.msra.mxu0 %v1497_v5  ;;  %1493 = vmatpush3.bf16.msra.mxu1 %v1497_v5 }
  0x12   :  { %1423 = vmatmul.mubr.msk.bf16.vlgmr.msra.gmra.mrb[0].mxu0 %vm278_vm0, %v1500_v6  ;;  %1455 = vmatmul.mubr.msk.bf16.vlgmr.msra.gmra.mrb[0].mxu1 %vm278_vm0, %v1501_v7 }
  0x13   :  { %1426 = vmatprep.mubr.msk.bf16.mxu0 %vm278_vm0, %v1502_v8  ;;  %1458 = vmatprep.mubr.msk.bf16.mxu1 %vm278_vm0, %v1503_v9 }
  0x1a   :  { %1427 = vmatmul.mubr.msk.bf16.gmra.mrb[4].mxu0 %vm278_vm0, %v1504_v10  ;;  %1459 = vmatmul.mubr.msk.bf16.gmra.mrb[4].mxu1 %vm278_vm0, %v1505_v11 }
  0x1b   :  { %1430 = vmatprep.mubr.msk.bf16.mxu0 %vm278_vm0, %v1506_v12  ;;  %1462 = vmatprep.mubr.msk.bf16.mxu1 %vm278_vm0, %v1507_v13 }
  0x22   :  { %1431 = vmatmul.mubr.msk.bf16.gmra.mrb[8].mxu0 %vm278_vm0, %v1508_v14  ;;  %1463 = vmatmul.mubr.msk.bf16.gmra.mrb[8].mxu1 %vm278_vm0, %v1509_v15 }
  0x23   :  { %1434 = vmatprep.mubr.msk.bf16.mxu0 %vm278_vm0, %v1510_v16  ;;  %1466 = vmatprep.mubr.msk.bf16.mxu1 %vm278_vm0, %v1511_v17 }
  0x2a   :  { %1435 = vmatmul.mubr.msk.bf16.gmra.mrb[12].mxu0 %vm278_vm0, %v1512_v18  ;;  %1467 = vmatmul.mubr.msk.bf16.gmra.mrb[12].mxu1 %vm278_vm0, %v1513_v19 }
  0x2b   :  { %1438 = vmatprep.mubr.msk.bf16.mxu0 %vm278_vm0, %v1514_v20  ;;  %1470 = vmatprep.mubr.msk.bf16.mxu1 %vm278_vm0, %v1515_v21 }
  0x32   :  { %1439 = vmatmul.mubr.msk.bf16.gmra.mrb[16].mxu0 %vm278_vm0, %v1516_v22  ;;  %1471 = vmatmul.mubr.msk.bf16.gmra.mrb[16].mxu1 %vm278_vm0, %v1517_v23 }
  0x33   :  { %1442 = vmatprep.mubr.msk.bf16.mxu0 %vm278_vm0, %v1518_v24  ;;  %1474 = vmatprep.mubr.msk.bf16.mxu1 %vm278_vm0, %v1519_v25 }
  0x3a   :  { %1443 = vmatmul.mubr.msk.bf16.gmra.mrb[20].mxu0 %vm278_vm0, %v1520_v26  ;;  %1475 = vmatmul.mubr.msk.bf16.gmra.mrb[20].mxu1 %vm278_vm0, %v1521_v27 }
  0x3b   :  { %1446 = vmatprep.mubr.msk.bf16.mxu0 %vm278_vm0, %v1522_v28  ;;  %1478 = vmatprep.mubr.msk.bf16.mxu1 %vm278_vm0, %v1523_v29 }
  0x42   :  { %1447 = vmatmul.mubr.msk.bf16.gmra.mrb[24].mxu0 %vm278_vm0, %v1524_v30  ;;  %1479 = vmatmul.mubr.msk.bf16.gmra.mrb[24].mxu1 %vm278_vm0, %v1525_v31 }
  0x43   :  { %1450 = vmatprep.mubr.msk.bf16.mxu0 %vm278_vm0, %v1526_v32  ;;  %1482 = vmatprep.mubr.msk.bf16.mxu1 %vm278_vm0, %v1527_v33 }
  0x4a   :  { %1451 = vmatmul.mubr.msk.bf16.gmra.mrb[28].mxu0 %vm278_vm0, %v1528_v34  ;;  %1483 = vmatmul.mubr.msk.bf16.gmra.mrb[28].mxu1 %vm278_vm0, %v1529_v35 }
  0xe5   :  { %v1424_v37 = vpop.f32.mrb[0].mxu0  ;;  %v1456_v38 = vpop.f32.mrb[0].mxu1 }
  0xe6   :  { %v418_v39 = vadd.f32 %v1424_v37, %v1693_v36  ;;  %v546_v40 = vadd.f32 %v1456_v38, %v1693_v36  ;;  %v409_v41 = vpop.f32.mrb[1].mxu0  ;;  %v537_v42 = vpop.f32.mrb[1].mxu1 }
  0xe7   :  { %v410_v43 = vadd.f32 %v1693_v36, %v409_v41  ;;  %v538_v44 = vadd.f32 %v1693_v36, %v537_v42  ;;  %v1425_v45 = vpop.f32.mrb[2].mxu0  ;;  %v1457_v46 = vpop.f32.mrb[2].mxu1 }
  0xe8   :  { %vm666_vm2 = vcmp.gt.f32.partialorder %v418_v39, 0.0  ;;  %v730_v47 = vmul.f32 0.01, %v418_v39  ;;  %vm698_vm3 = vcmp.gt.f32.partialorder %v546_v40, 0.0  ;;  %v762_v48 = vmul.f32 0.01, %v546_v40 }
  0xe9   :  { %vm664_vm4 = vcmp.gt.f32.partialorder %v410_v43, 0.0  ;;  %v728_v49 = vmul.f32 0.01, %v410_v43  ;;  %vm696_vm5 = vcmp.gt.f32.partialorder %v538_v44, 0.0  ;;  %v760_v50 = vmul.f32 0.01, %v538_v44 }
  0xea   :  { %v794_v51 = vsel %vm666_vm2, %v418_v39, %v730_v47  ;;  %v826_v52 = vsel %vm698_vm3, %v546_v40, %v762_v48  ;;  %v421_v53 = vadd.f32 %v1425_v45, %v1693_v36  ;;  %v549_v54 = vadd.f32 %v1457_v46, %v1693_v36  ;;  %v412_v55 = vpop.f32.mrb[3].mxu0  ;;  %v540_v56 = vpop.f32.mrb[3].mxu1 }
  0xeb   :  { %v1316_v57 = vpack.c.bf16 %v794_v51, %v794_v51  ;;  %v1348_v58 = vpack.c.bf16 %v826_v52, %v826_v52  ;;  %v792_v59 = vsel %vm664_vm4, %v410_v43, %v728_v49  ;;  %v824_v60 = vsel %vm696_vm5, %v538_v44, %v760_v50 }
  0xec   :  { %v1314_v61 = vpack.c.bf16 %v792_v59, %v792_v59  ;;  %v1346_v62 = vpack.c.bf16 %v824_v60, %v824_v60  ;;  %vm667_vm6 = vcmp.gt.f32.partialorder %v421_v53, 0.0  ;;  %v731_v63 = vmul.f32 0.01, %v421_v53 }
  0xed   :  { %1115 = vst.msk [vmem:[%s2097_s3 + $0x8] sm:$0xf] %vm1112_vm1, %v1316_v57  ;;  %1147 = vst.msk [vmem:[%s2097_s3 + $0x88] sm:$0xf] %vm1112_vm1, %v1348_v58  ;;  %vm699_vm7 = vcmp.gt.f32.partialorder %v549_v54, 0.0  ;;  %v413_v1 = vadd.f32 %v1693_v36, %v412_v55  ;;  %v541_v2 = vadd.f32 %v1693_v36, %v540_v56  ;;  %v1428_v3 = vpop.f32.mrb[4].mxu0 }
  0xee   :  { %v763_v0 = vmul.f32 0.01, %v549_v54  ;;  %v1460_v4 = vpop.f32.mrb[4].mxu1  ;;  %1113 = vst.msk [vmem:[%s2097_s3] sm:$0xf] %vm1112_vm1, %v1314_v61  ;;  %v795_v5 = vsel %vm667_vm6, %v421_v53, %v731_v63  ;;  %v434_v6 = vadd.f32 %v1428_v3, %v1693_v36  ;;  %v425_v8 = vpop.f32.mrb[5].mxu0 }
  0xef   :  { %1145 = vst.msk [vmem:[%s2097_s3 + $0x80] sm:$0xf] %vm1112_vm1, %v1346_v62  ;;  %v562_v7 = vadd.f32 %v1460_v4, %v1693_v36  ;;  %v553_v9 = vpop.f32.mrb[5].mxu1  ;;  %v1317_v10 = vpack.c.bf16 %v795_v5, %v795_v5  ;;  %vm665_vm8 = vcmp.gt.f32.partialorder %v413_v1, 0.0  ;;  %v729_v12 = vmul.f32 0.01, %v413_v1 }
  0xf0   :  { %v827_v11 = vsel %vm699_vm7, %v549_v54, %v763_v0  ;;  %v1429_v13 = vpop.f32.mrb[6].mxu0  ;;  %v1461_v14 = vpop.f32.mrb[6].mxu1  ;;  %vm697_vm9 = vcmp.gt.f32.partialorder %v541_v2, 0.0  ;;  %v761_v16 = vmul.f32 0.01, %v541_v2  ;;  %vm670_vm10 = vcmp.gt.f32.partialorder %v434_v6, 0.0 }
  0xf1   :  { %v1349_v15 = vpack.c.bf16 %v827_v11, %v827_v11  ;;  %v428_v17 = vpop.f32.mrb[7].mxu0  ;;  %v556_v18 = vpop.f32.mrb[7].mxu1  ;;  %1116 = vst.msk [vmem:[%s2097_s3 + $0xc] sm:$0xf] %vm1112_vm1, %v1317_v10  ;;  %v793_v19 = vsel %vm665_vm8, %v413_v1, %v729_v12  ;;  %v734_v20 = vmul.f32 0.01, %v434_v6  ;;  %v426_v24 = vadd.f32 %v1693_v36, %v425_v8 }
  0xf2   :  { %vm702_vm11 = vcmp.gt.f32.partialorder %v562_v7, 0.0  ;;  %v766_v21 = vmul.f32 0.01, %v562_v7  ;;  %v1315_v22 = vpack.c.bf16 %v793_v19, %v793_v19  ;;  %v825_v23 = vsel %vm697_vm9, %v541_v2, %v761_v16 }
  0xf3   :  { %1148 = vst.msk [vmem:[%s2097_s3 + $0x8c] sm:$0xf] %vm1112_vm1, %v1349_v15  ;;  %v554_v25 = vadd.f32 %v1693_v36, %v553_v9  ;;  %v1347_v26 = vpack.c.bf16 %v825_v23, %v825_v23  ;;  %v798_v27 = vsel %vm670_vm10, %v434_v6, %v734_v20  ;;  %v437_v29 = vadd.f32 %v1429_v13, %v1693_v36 }
  0xf4   :  { %v830_v28 = vsel %vm702_vm11, %v562_v7, %v766_v21  ;;  %1114 = vst.msk [vmem:[%s2097_s3 + $0x4] sm:$0xf] %vm1112_vm1, %v1315_v22  ;;  %v1320_v30 = vpack.c.bf16 %v798_v27, %v798_v27  ;;  %vm668_vm12 = vcmp.gt.f32.partialorder %v426_v24, 0.0  ;;  %v732_v32 = vmul.f32 0.01, %v426_v24 }
  0xf5   :  { %v1352_v31 = vpack.c.bf16 %v830_v28, %v830_v28  ;;  %1146 = vst.msk [vmem:[%s2097_s3 + $0x84] sm:$0xf] %vm1112_vm1, %v1347_v26  ;;  %vm700_vm13 = vcmp.gt.f32.partialorder %v554_v25, 0.0  ;;  %v764_v33 = vmul.f32 0.01, %v554_v25  ;;  %vm671_vm14 = vcmp.gt.f32.partialorder %v437_v29, 0.0 }
  0xf6   :  { %v735_v34 = vmul.f32 0.01, %v437_v29  ;;  %1119 = vst.msk [vmem:[%s2097_s3 + $0x18] sm:$0xf] %vm1112_vm1, %v1320_v30  ;;  %v796_v35 = vsel %vm668_vm12, %v426_v24, %v732_v32  ;;  %v565_v37 = vadd.f32 %v1461_v14, %v1693_v36  ;;  %v429_v38 = vadd.f32 %v1693_v36, %v428_v17  ;;  %v1432_v40 = vpop.f32.mrb[8].mxu0  ;;  %v1464_v41 = vpop.f32.mrb[8].mxu1 }
  0xf7   :  { %1151 = vst.msk [vmem:[%s2097_s3 + $0x98] sm:$0xf] %vm1112_vm1, %v1352_v31  ;;  %v557_v39 = vadd.f32 %v1693_v36, %v556_v18  ;;  %v1318_v42 = vpack.c.bf16 %v796_v35, %v796_v35  ;;  %v828_v43 = vsel %vm700_vm13, %v554_v25, %v764_v33  ;;  %v450_v45 = vadd.f32 %v1432_v40, %v1693_v36  ;;  %v441_v46 = vpop.f32.mrb[9].mxu0  ;;  %v569_v47 = vpop.f32.mrb[9].mxu1 }
  0xf8   :  { %v799_v44 = vsel %vm671_vm14, %v437_v29, %v735_v34  ;;  %v1350_v48 = vpack.c.bf16 %v828_v43, %v828_v43  ;;  %vm703_vm15 = vcmp.gt.f32.partialorder %v565_v37, 0.0  ;;  %v767_v50 = vmul.f32 0.01, %v565_v37  ;;  %v1433_v51 = vpop.f32.mrb[10].mxu0  ;;  %v1465_v52 = vpop.f32.mrb[10].mxu1 }
  0xf9   :  { %v1321_v49 = vpack.c.bf16 %v799_v44, %v799_v44  ;;  %1117 = vst.msk [vmem:[%s2097_s3 + $0x10] sm:$0xf] %vm1112_vm1, %v1318_v42  ;;  %vm669_vm0 = vcmp.gt.f32.partialorder %v429_v38, 0.0  ;;  %v733_v53 = vmul.f32 0.01, %v429_v38  ;;  %vm701_vm2 = vcmp.gt.f32.partialorder %v557_v39, 0.0 }
  0xfa   :  { %v765_v54 = vmul.f32 0.01, %v557_v39  ;;  %1149 = vst.msk [vmem:[%s2097_s3 + $0x90] sm:$0xf] %vm1112_vm1, %v1350_v48  ;;  %v831_v55 = vsel %vm703_vm15, %v565_v37, %v767_v50  ;;  %vm674_vm3 = vcmp.gt.f32.partialorder %v450_v45, 0.0  ;;  %v578_v57 = vadd.f32 %v1464_v41, %v1693_v36  ;;  %v444_v58 = vpop.f32.mrb[11].mxu0 }
  0xfb   :  { %1120 = vst.msk [vmem:[%s2097_s3 + $0x1c] sm:$0xf] %vm1112_vm1, %v1321_v49  ;;  %v738_v56 = vmul.f32 0.01, %v450_v45  ;;  %v572_v59 = vpop.f32.mrb[11].mxu1  ;;  %v1353_v60 = vpack.c.bf16 %v831_v55, %v831_v55  ;;  %v797_v61 = vsel %vm669_vm0, %v429_v38, %v733_v53  ;;  %v442_v63 = vadd.f32 %v1693_v36, %v441_v46 }
  0xfc   :  { %v829_v62 = vsel %vm701_vm2, %v557_v39, %v765_v54  ;;  %v1319_v0 = vpack.c.bf16 %v797_v61, %v797_v61  ;;  %vm706_vm4 = vcmp.gt.f32.partialorder %v578_v57, 0.0  ;;  %v770_v4 = vmul.f32 0.01, %v578_v57 }
  0xfd   :  { %v1351_v1 = vpack.c.bf16 %v829_v62, %v829_v62  ;;  %v802_v2 = vsel %vm674_vm3, %v450_v45, %v738_v56  ;;  %1152 = vst.msk [vmem:[%s2097_s3 + $0x9c] sm:$0xf] %vm1112_vm1, %v1353_v60  ;;  %vm672_vm5 = vcmp.gt.f32.partialorder %v442_v63, 0.0  ;;  %v736_v5 = vmul.f32 0.01, %v442_v63  ;;  %v1436_v6 = vpop.f32.mrb[12].mxu0 }
  0xfe   :  { %v1324_v3 = vpack.c.bf16 %v802_v2, %v802_v2  ;;  %1118 = vst.msk [vmem:[%s2097_s3 + $0x14] sm:$0xf] %vm1112_vm1, %v1319_v0  ;;  %v570_v7 = vadd.f32 %v1693_v36, %v569_v47  ;;  %v453_v8 = vadd.f32 %v1433_v51, %v1693_v36  ;;  %v581_v9 = vadd.f32 %v1465_v52, %v1693_v36  ;;  %v1468_v11 = vpop.f32.mrb[12].mxu1  ;;  %v457_v12 = vpop.f32.mrb[13].mxu0 }
  0xff   :  { %1150 = vst.msk [vmem:[%s2097_s3 + $0x94] sm:$0xf] %vm1112_vm1, %v1351_v1  ;;  %v445_v10 = vadd.f32 %v1693_v36, %v444_v58  ;;  %v834_v13 = vsel %vm706_vm4, %v578_v57, %v770_v4  ;;  %v800_v14 = vsel %vm672_vm5, %v442_v63, %v736_v5  ;;  %v573_v15 = vadd.f32 %v1693_v36, %v572_v59  ;;  %v585_v17 = vpop.f32.mrb[13].mxu1  ;;  %v1437_v18 = vpop.f32.mrb[14].mxu0 }
 0x100   :  { %1123 = vst.msk [vmem:[%s2097_s3 + $0x28] sm:$0xf] %vm1112_vm1, %v1324_v3  ;;  %v466_v16 = vadd.f32 %v1436_v6, %v1693_v36  ;;  %v1356_v19 = vpack.c.bf16 %v834_v13, %v834_v13  ;;  %v1322_v20 = vpack.c.bf16 %v800_v14, %v800_v14  ;;  %vm704_vm6 = vcmp.gt.f32.partialorder %v570_v7, 0.0  ;;  %v1469_v22 = vpop.f32.mrb[14].mxu1  ;;  %v460_v23 = vpop.f32.mrb[15].mxu0 }
 0x101   :  { %v768_v21 = vmul.f32 0.01, %v570_v7  ;;  %vm675_vm7 = vcmp.gt.f32.partialorder %v453_v8, 0.0  ;;  %v739_v24 = vmul.f32 0.01, %v453_v8  ;;  %vm707_vm8 = vcmp.gt.f32.partialorder %v581_v9, 0.0 }
 0x102   :  { %v771_v25 = vmul.f32 0.01, %v581_v9  ;;  %1155 = vst.msk [vmem:[%s2097_s3 + $0xa8] sm:$0xf] %vm1112_vm1, %v1356_v19  ;;  %1121 = vst.msk [vmem:[%s2097_s3 + $0x20] sm:$0xf] %vm1112_vm1, %v1322_v20  ;;  %v594_v40 = vadd.f32 %v1468_v11, %v1693_v36  ;;  %v458_v44 = vadd.f32 %v1693_v36, %v457_v12  ;;  %v586_v45 = vadd.f32 %v1693_v36, %v585_v17 }
 0x103   :  { %v832_v26 = vsel %vm704_vm6, %v570_v7, %v768_v21  ;;  %vm673_vm9 = vcmp.gt.f32.partialorder %v445_v10, 0.0  ;;  %v737_v27 = vmul.f32 0.01, %v445_v10  ;;  %vm705_vm10 = vcmp.gt.f32.partialorder %v573_v15, 0.0  ;;  %v588_v28 = vpop.f32.mrb[15].mxu1 }
 0x104   :  { %v1354_v29 = vpack.c.bf16 %v832_v26, %v832_v26  ;;  %v803_v30 = vsel %vm675_vm7, %v453_v8, %v739_v24  ;;  %v835_v31 = vsel %vm707_vm8, %v581_v9, %v771_v25  ;;  %v769_v32 = vmul.f32 0.01, %v573_v15 }
 0x105   :  { %v1325_v33 = vpack.c.bf16 %v803_v30, %v803_v30  ;;  %v1357_v34 = vpack.c.bf16 %v835_v31, %v835_v31  ;;  %v801_v35 = vsel %vm673_vm9, %v445_v10, %v737_v27  ;;  %vm678_vm11 = vcmp.gt.f32.partialorder %v466_v16, 0.0  ;;  %v1440_v41 = vpop.f32.mrb[16].mxu0  ;;  %v1472_v42 = vpop.f32.mrb[16].mxu1 }
 0x106   :  { %1153 = vst.msk [vmem:[%s2097_s3 + $0xa0] sm:$0xf] %vm1112_vm1, %v1354_v29  ;;  %v1323_v37 = vpack.c.bf16 %v801_v35, %v801_v35  ;;  %v833_v38 = vsel %vm705_vm10, %v573_v15, %v769_v32  ;;  %v742_v39 = vmul.f32 0.01, %v466_v16  ;;  %v469_v46 = vadd.f32 %v1437_v18, %v1693_v36  ;;  %v473_v47 = vpop.f32.mrb[17].mxu0  ;;  %v601_v48 = vpop.f32.mrb[17].mxu1 }
 0x107   :  { %1124 = vst.msk [vmem:[%s2097_s3 + $0x2c] sm:$0xf] %vm1112_vm1, %v1325_v33  ;;  %1156 = vst.msk [vmem:[%s2097_s3 + $0xac] sm:$0xf] %vm1112_vm1, %v1357_v34  ;;  %v1355_v43 = vpack.c.bf16 %v833_v38, %v833_v38  ;;  %vm710_vm12 = vcmp.gt.f32.partialorder %v594_v40, 0.0  ;;  %v597_v51 = vadd.f32 %v1469_v22, %v1693_v36  ;;  %v1819_v52 = vpop.f32.mrb[18].mxu0  ;;  %v461_v3 = vadd.f32 %v1693_v36, %v460_v23 }
 0x108   :  { %1122 = vst.msk [vmem:[%s2097_s3 + $0x24] sm:$0xf] %vm1112_vm1, %v1323_v37  ;;  %v806_v49 = vsel %vm678_vm11, %v466_v16, %v742_v39  ;;  %v774_v50 = vmul.f32 0.01, %v594_v40  ;;  %v1821_v53 = vpop.f32.mrb[18].mxu1  ;;  %vm676_vm13 = vcmp.gt.f32.partialorder %v458_v44, 0.0  ;;  %v589_v7 = vadd.f32 %v1693_v36, %v588_v28 }
 0x109   :  { %1154 = vst.msk [vmem:[%s2097_s3 + $0xa4] sm:$0xf] %vm1112_vm1, %v1355_v43  ;;  %v1328_v54 = vpack.c.bf16 %v806_v49, %v806_v49  ;;  %v740_v55 = vmul.f32 0.01, %v458_v44  ;;  %vm708_vm14 = vcmp.gt.f32.partialorder %v586_v45, 0.0  ;;  %v1827_v56 = vpop.f32.mrb[19].mxu0  ;;  %v482_v10 = vadd.f32 %v1440_v41, %v1693_v36 }
 0x10a   :  { %v1829_v57 = vpop.f32.mrb[19].mxu1  ;;  %v838_v58 = vsel %vm710_vm12, %v594_v40, %v774_v50  ;;  %v772_v59 = vmul.f32 0.01, %v586_v45  ;;  %vm679_vm15 = vcmp.gt.f32.partialorder %v469_v46, 0.0  ;;  %v743_v60 = vmul.f32 0.01, %v469_v46 }
 0x10b   :  { %1127 = vst.msk [vmem:[%s2097_s3 + $0x38] sm:$0xf] %vm1112_vm1, %v1328_v54  ;;  %v1360_v61 = vpack.c.bf16 %v838_v58, %v838_v58  ;;  %v804_v62 = vsel %vm676_vm13, %v458_v44, %v740_v55  ;;  %vm711_vm0 = vcmp.gt.f32.partialorder %v597_v51, 0.0  ;;  %v775_v63 = vmul.f32 0.01, %v597_v51 }
 0x10c   :  { %v1326_v0 = vpack.c.bf16 %v804_v62, %v804_v62  ;;  %v836_v1 = vsel %vm708_vm14, %v586_v45, %v772_v59  ;;  %v807_v2 = vsel %vm679_vm15, %v469_v46, %v743_v60  ;;  %vm677_vm2 = vcmp.gt.f32.partialorder %v461_v3, 0.0 }
 0x10d   :  { %1159 = vst.msk [vmem:[%s2097_s3 + $0xb8] sm:$0xf] %vm1112_vm1, %v1360_v61  ;;  %v1358_v4 = vpack.c.bf16 %v836_v1, %v836_v1  ;;  %v1329_v5 = vpack.c.bf16 %v807_v2, %v807_v2  ;;  %v839_v6 = vsel %vm711_vm0, %v597_v51, %v775_v63  ;;  %v741_v9 = vmul.f32 0.01, %v461_v3  ;;  %v1444_v11 = vpop.f32.mrb[20].mxu0  ;;  %v1476_v12 = vpop.f32.mrb[20].mxu1 }
 0x10e   :  { %1125 = vst.msk [vmem:[%s2097_s3 + $0x30] sm:$0xf] %vm1112_vm1, %v1326_v0  ;;  %v1361_v8 = vpack.c.bf16 %v839_v6, %v839_v6  ;;  %vm709_vm3 = vcmp.gt.f32.partialorder %v589_v7, 0.0  ;;  %v773_v13 = vmul.f32 0.01, %v589_v7  ;;  %v610_v14 = vadd.f32 %v1472_v42, %v1693_v36  ;;  %v489_v16 = vpop.f32.mrb[21].mxu0 }
 0x10f   :  { %1157 = vst.msk [vmem:[%s2097_s3 + $0xb0] sm:$0xf] %vm1112_vm1, %v1358_v4  ;;  %1128 = vst.msk [vmem:[%s2097_s3 + $0x3c] sm:$0xf] %vm1112_vm1, %v1329_v5  ;;  %v474_v15 = vadd.f32 %v1693_v36, %v473_v47  ;;  %v1856_v17 = vpop.f32.mrb[21].mxu1  ;;  %v805_v18 = vsel %vm677_vm2, %v461_v3, %v741_v9  ;;  %vm682_vm4 = vcmp.gt.f32.partialorder %v482_v10, 0.0  ;;  %v602_v20 = vadd.f32 %v1693_v36, %v601_v48 }
 0x110   :  { %1160 = vst.msk [vmem:[%s2097_s3 + $0xbc] sm:$0xf] %vm1112_vm1, %v1361_v8  ;;  %v746_v19 = vmul.f32 0.01, %v482_v10  ;;  %v1863_v21 = vpop.f32.mrb[22].mxu0  ;;  %v1865_v22 = vpop.f32.mrb[22].mxu1  ;;  %v1327_v23 = vpack.c.bf16 %v805_v18, %v805_v18  ;;  %v837_v24 = vsel %vm709_vm3, %v589_v7, %v773_v13  ;;  %v485_v37 = vadd.f32 %v1819_v52, %v1693_v36 }
 0x111   :  { %vm714_vm5 = vcmp.gt.f32.partialorder %v610_v14, 0.0  ;;  %v778_v25 = vmul.f32 0.01, %v610_v14  ;;  %v1867_v26 = vpop.f32.mrb[23].mxu0  ;;  %v1869_v27 = vpop.f32.mrb[23].mxu1  ;;  %v1359_v28 = vpack.c.bf16 %v837_v24, %v837_v24  ;;  %vm680_vm6 = vcmp.gt.f32.partialorder %v474_v15, 0.0 }
 0x112   :  { %v810_v29 = vsel %vm682_vm4, %v482_v10, %v746_v19  ;;  %v744_v30 = vmul.f32 0.01, %v474_v15  ;;  %1126 = vst.msk [vmem:[%s2097_s3 + $0x34] sm:$0xf] %vm1112_vm1, %v1327_v23  ;;  %vm712_vm7 = vcmp.gt.f32.partialorder %v602_v20, 0.0  ;;  %v613_v38 = vadd.f32 %v1821_v53, %v1693_v36 }
 0x113   :  { %v1332_v31 = vpack.c.bf16 %v810_v29, %v810_v29  ;;  %v842_v32 = vsel %vm714_vm5, %v610_v14, %v778_v25  ;;  %v776_v33 = vmul.f32 0.01, %v602_v20  ;;  %1158 = vst.msk [vmem:[%s2097_s3 + $0xb4] sm:$0xf] %vm1112_vm1, %v1359_v28  ;;  %v477_v41 = vadd.f32 %v1693_v36, %v1827_v56 }
 0x114   :  { %v1364_v34 = vpack.c.bf16 %v842_v32, %v842_v32  ;;  %v808_v35 = vsel %vm680_vm6, %v474_v15, %v744_v30  ;;  %v605_v42 = vadd.f32 %v1693_v36, %v1829_v57  ;;  %vm683_vm8 = vcmp.gt.f32.partialorder %v485_v37, 0.0 }
 0x115   :  { %1131 = vst.msk [vmem:[%s2097_s3 + $0x48] sm:$0xf] %vm1112_vm1, %v1332_v31  ;;  %v1330_v39 = vpack.c.bf16 %v808_v35, %v808_v35  ;;  %v840_v40 = vsel %vm712_vm7, %v602_v20, %v776_v33  ;;  %v747_v44 = vmul.f32 0.01, %v485_v37  ;;  %vm715_vm9 = vcmp.gt.f32.partialorder %v613_v38, 0.0  ;;  %v1895_v45 = vpop.f32.mrb[24].mxu0 }
 0x116   :  { %1163 = vst.msk [vmem:[%s2097_s3 + $0xc8] sm:$0xf] %vm1112_vm1, %v1364_v34  ;;  %v1362_v43 = vpack.c.bf16 %v840_v40, %v840_v40  ;;  %v1897_v46 = vpop.f32.mrb[24].mxu1  ;;  %v779_v47 = vmul.f32 0.01, %v613_v38  ;;  %vm681_vm10 = vcmp.gt.f32.partialorder %v477_v41, 0.0  ;;  %v498_v51 = vadd.f32 %v1444_v11, %v1693_v36 }
 0x117   :  { %1129 = vst.msk [vmem:[%s2097_s3 + $0x40] sm:$0xf] %vm1112_vm1, %v1330_v39  ;;  %v745_v48 = vmul.f32 0.01, %v477_v41  ;;  %vm713_vm11 = vcmp.gt.f32.partialorder %v605_v42, 0.0  ;;  %v811_v49 = vsel %vm683_vm8, %v485_v37, %v747_v44  ;;  %v626_v52 = vadd.f32 %v1476_v12, %v1693_v36  ;;  %v1909_v53 = vpop.f32.mrb[25].mxu0 }
 0x118   :  { %1161 = vst.msk [vmem:[%s2097_s3 + $0xc0] sm:$0xf] %vm1112_vm1, %v1362_v43  ;;  %v777_v50 = vmul.f32 0.01, %v605_v42  ;;  %v1911_v54 = vpop.f32.mrb[25].mxu1  ;;  %v1333_v55 = vpack.c.bf16 %v811_v49, %v811_v49  ;;  %v843_v56 = vsel %vm715_vm9, %v613_v38, %v779_v47  ;;  %v490_v58 = vadd.f32 %v1693_v36, %v489_v16  ;;  %v1915_v59 = vpop.f32.mrb[26].mxu0 }
 0x119   :  { %v809_v57 = vsel %vm681_vm10, %v477_v41, %v745_v48  ;;  %v1917_v60 = vpop.f32.mrb[26].mxu1  ;;  %v1365_v61 = vpack.c.bf16 %v843_v56, %v843_v56  ;;  %vm686_vm12 = vcmp.gt.f32.partialorder %v498_v51, 0.0  ;;  %v1920_v0 = vpop.f32.mrb[27].mxu0  ;;  %v750_v3 = vmul.f32 0.01, %v498_v51 }
 0x11a   :  { %v1331_v62 = vpack.c.bf16 %v809_v57, %v809_v57  ;;  %v841_v63 = vsel %vm713_vm11, %v605_v42, %v777_v50  ;;  %v1922_v1 = vpop.f32.mrb[27].mxu1  ;;  %1132 = vst.msk [vmem:[%s2097_s3 + $0x4c] sm:$0xf] %vm1112_vm1, %v1333_v55  ;;  %vm718_vm13 = vcmp.gt.f32.partialorder %v626_v52, 0.0  ;;  %v782_v4 = vmul.f32 0.01, %v626_v52 }
 0x11b   :  { %v1363_v2 = vpack.c.bf16 %v841_v63, %v841_v63  ;;  %1164 = vst.msk [vmem:[%s2097_s3 + $0xcc] sm:$0xf] %vm1112_vm1, %v1365_v61  ;;  %vm684_vm14 = vcmp.gt.f32.partialorder %v490_v58, 0.0  ;;  %v748_v5 = vmul.f32 0.01, %v490_v58  ;;  %v618_v6 = vadd.f32 %v1693_v36, %v1856_v17 }
 0x11c   :  { %1130 = vst.msk [vmem:[%s2097_s3 + $0x44] sm:$0xf] %vm1112_vm1, %v1331_v62  ;;  %v501_v7 = vadd.f32 %v1863_v21, %v1693_v36  ;;  %v814_v8 = vsel %vm686_vm12, %v498_v51, %v750_v3  ;;  %v846_v9 = vsel %vm718_vm13, %v626_v52, %v782_v4  ;;  %v629_v10 = vadd.f32 %v1865_v22, %v1693_v36 }
 0x11d   :  { %1162 = vst.msk [vmem:[%s2097_s3 + $0xc4] sm:$0xf] %vm1112_vm1, %v1363_v2  ;;  %v493_v11 = vadd.f32 %v1693_v36, %v1867_v26  ;;  %v1336_v12 = vpack.c.bf16 %v814_v8, %v814_v8  ;;  %v1368_v13 = vpack.c.bf16 %v846_v9, %v846_v9  ;;  %v812_v14 = vsel %vm684_vm14, %v490_v58, %v748_v5  ;;  %v1948_v15 = vpop.f32.mrb[28].mxu0  ;;  %v1950_v16 = vpop.f32.mrb[28].mxu1 }
 0x11e   :  { %vm716_vm15 = vcmp.gt.f32.partialorder %v618_v6, 0.0  ;;  %v1334_v17 = vpack.c.bf16 %v812_v14, %v812_v14  ;;  %v780_v18 = vmul.f32 0.01, %v618_v6  ;;  %vm687_vm0 = vcmp.gt.f32.partialorder %v501_v7, 0.0  ;;  %v1952_v20 = vpop.f32.mrb[29].mxu0  ;;  %v1970_v28 = vpop.f32.mrb[29].mxu1 }
 0x11f   :  { %v751_v19 = vmul.f32 0.01, %v501_v7  ;;  %1135 = vst.msk [vmem:[%s2097_s3 + $0x58] sm:$0xf] %vm1112_vm1, %v1336_v12  ;;  %1167 = vst.msk [vmem:[%s2097_s3 + $0xd8] sm:$0xf] %vm1112_vm1, %v1368_v13  ;;  %v621_v25 = vadd.f32 %v1693_v36, %v1869_v27  ;;  %v514_v26 = vadd.f32 %v1895_v45, %v1693_v36  ;;  %v642_v41 = vadd.f32 %v1897_v46, %v1693_v36 }
 0x120   :  { %vm719_vm2 = vcmp.gt.f32.partialorder %v629_v10, 0.0  ;;  %v783_v21 = vmul.f32 0.01, %v629_v10  ;;  %vm685_vm3 = vcmp.gt.f32.partialorder %v493_v11, 0.0  ;;  %v749_v22 = vmul.f32 0.01, %v493_v11 }
 0x121   :  { %1133 = vst.msk [vmem:[%s2097_s3 + $0x50] sm:$0xf] %vm1112_vm1, %v1334_v17  ;;  %v844_v23 = vsel %vm716_vm15, %v618_v6, %v780_v18  ;;  %v815_v24 = vsel %vm687_vm0, %v501_v7, %v751_v19  ;;  %v1972_v29 = vpop.f32.mrb[30].mxu0  ;;  %v1974_v34 = vpop.f32.mrb[30].mxu1  ;;  %vm717_vm4 = vcmp.gt.f32.partialorder %v621_v25, 0.0  ;;  %vm690_vm5 = vcmp.gt.f32.partialorder %v514_v26, 0.0 }
 0x122   :  { %v1366_v30 = vpack.c.bf16 %v844_v23, %v844_v23  ;;  %v1337_v31 = vpack.c.bf16 %v815_v24, %v815_v24  ;;  %v847_v32 = vsel %vm719_vm2, %v629_v10, %v783_v21  ;;  %v813_v33 = vsel %vm685_vm3, %v493_v11, %v749_v22  ;;  %v1976_v35 = vpop.f32.mrb[31].mxu0  ;;  %v1978_v27 = vpop.f32.mrb[31].mxu1 }
 0x123   :  { %v1369_v37 = vpack.c.bf16 %v847_v32, %v847_v32  ;;  %v1335_v38 = vpack.c.bf16 %v813_v33, %v813_v33  ;;  %v781_v39 = vmul.f32 0.01, %v621_v25  ;;  %v754_v40 = vmul.f32 0.01, %v514_v26 }
 0x124   :  { %1165 = vst.msk [vmem:[%s2097_s3 + $0xd0] sm:$0xf] %vm1112_vm1, %v1366_v30  ;;  %1136 = vst.msk [vmem:[%s2097_s3 + $0x5c] sm:$0xf] %vm1112_vm1, %v1337_v31  ;;  %v506_v42 = vadd.f32 %v1693_v36, %v1909_v53  ;;  %v634_v44 = vadd.f32 %v1693_v36, %v1911_v54  ;;  %v517_v45 = vadd.f32 %v1915_v59, %v1693_v36  ;;  %vm722_vm6 = vcmp.gt.f32.partialorder %v642_v41, 0.0 }
 0x125   :  { %1168 = vst.msk [vmem:[%s2097_s3 + $0xdc] sm:$0xf] %vm1112_vm1, %v1369_v37  ;;  %1134 = vst.msk [vmem:[%s2097_s3 + $0x54] sm:$0xf] %vm1112_vm1, %v1335_v38  ;;  %v845_v43 = vsel %vm717_vm4, %v621_v25, %v781_v39  ;;  %v645_v46 = vadd.f32 %v1917_v60, %v1693_v36  ;;  %v818_v48 = vsel %vm690_vm5, %v514_v26, %v754_v40  ;;  %v786_v49 = vmul.f32 0.01, %v642_v41 }
 0x126   :  { %v1367_v47 = vpack.c.bf16 %v845_v43, %v845_v43  ;;  %v1340_v50 = vpack.c.bf16 %v818_v48, %v818_v48  ;;  %vm688_vm7 = vcmp.gt.f32.partialorder %v506_v42, 0.0  ;;  %v752_v51 = vmul.f32 0.01, %v506_v42 }
 0x127   :  { %vm720_vm8 = vcmp.gt.f32.partialorder %v634_v44, 0.0  ;;  %v850_v52 = vsel %vm722_vm6, %v642_v41, %v786_v49  ;;  %v784_v53 = vmul.f32 0.01, %v634_v44  ;;  %vm691_vm9 = vcmp.gt.f32.partialorder %v517_v45, 0.0 }
 0x128   :  { %1166 = vst.msk [vmem:[%s2097_s3 + $0xd4] sm:$0xf] %vm1112_vm1, %v1367_v47  ;;  %v755_v54 = vmul.f32 0.01, %v517_v45  ;;  %1139 = vst.msk [vmem:[%s2097_s3 + $0x68] sm:$0xf] %vm1112_vm1, %v1340_v50  ;;  %v1372_v55 = vpack.c.bf16 %v850_v52, %v850_v52  ;;  %v816_v56 = vsel %vm688_vm7, %v506_v42, %v752_v51  ;;  %v509_v61 = vadd.f32 %v1693_v36, %v1920_v0 }
 0x129   :  { %vm723_vm10 = vcmp.gt.f32.partialorder %v645_v46, 0.0  ;;  %v787_v57 = vmul.f32 0.01, %v645_v46  ;;  %v1338_v58 = vpack.c.bf16 %v816_v56, %v816_v56  ;;  %v848_v59 = vsel %vm720_vm8, %v634_v44, %v784_v53 }
 0x12a   :  { %v819_v60 = vsel %vm691_vm9, %v517_v45, %v755_v54  ;;  %1171 = vst.msk [vmem:[%s2097_s3 + $0xe8] sm:$0xf] %vm1112_vm1, %v1372_v55  ;;  %v1370_v62 = vpack.c.bf16 %v848_v59, %v848_v59  ;;  %v637_v3 = vadd.f32 %v1693_v36, %v1922_v1  ;;  %vm689_vm11 = vcmp.gt.f32.partialorder %v509_v61, 0.0 }
 0x12b   :  { %v1341_v63 = vpack.c.bf16 %v819_v60, %v819_v60  ;;  %v851_v2 = vsel %vm723_vm10, %v645_v46, %v787_v57  ;;  %1137 = vst.msk [vmem:[%s2097_s3 + $0x60] sm:$0xf] %vm1112_vm1, %v1338_v58  ;;  %v753_v5 = vmul.f32 0.01, %v509_v61  ;;  %v530_v0 = vadd.f32 %v1948_v15, %v1693_v36 }
 0x12c   :  { %v1373_v4 = vpack.c.bf16 %v851_v2, %v851_v2  ;;  %1169 = vst.msk [vmem:[%s2097_s3 + $0xe0] sm:$0xf] %vm1112_vm1, %v1370_v62  ;;  %vm721_vm12 = vcmp.gt.f32.partialorder %v637_v3, 0.0  ;;  %v785_v1 = vmul.f32 0.01, %v637_v3  ;;  %v658_v6 = vadd.f32 %v1950_v16, %v1693_v36 }
 0x12d   :  { %1140 = vst.msk [vmem:[%s2097_s3 + $0x6c] sm:$0xf] %vm1112_vm1, %v1341_v63  ;;  %v522_v7 = vadd.f32 %v1693_v36, %v1952_v20  ;;  %v817_v8 = vsel %vm689_vm11, %v509_v61, %v753_v5  ;;  %vm694_vm13 = vcmp.gt.f32.partialorder %v530_v0, 0.0  ;;  %v758_v9 = vmul.f32 0.01, %v530_v0 }
 0x12e   :  { %1172 = vst.msk [vmem:[%s2097_s3 + $0xec] sm:$0xf] %vm1112_vm1, %v1373_v4  ;;  %v650_v10 = vadd.f32 %v1693_v36, %v1970_v28  ;;  %v1339_v11 = vpack.c.bf16 %v817_v8, %v817_v8  ;;  %v849_v12 = vsel %vm721_vm12, %v637_v3, %v785_v1  ;;  %vm726_vm14 = vcmp.gt.f32.partialorder %v658_v6, 0.0 }
 0x12f   :  { %v790_v13 = vmul.f32 0.01, %v658_v6  ;;  %v1371_v14 = vpack.c.bf16 %v849_v12, %v849_v12  ;;  %v822_v15 = vsel %vm694_vm13, %v530_v0, %v758_v9  ;;  %vm692_vm15 = vcmp.gt.f32.partialorder %v522_v7, 0.0 }
 0x130   :  { %v756_v16 = vmul.f32 0.01, %v522_v7  ;;  %1138 = vst.msk [vmem:[%s2097_s3 + $0x64] sm:$0xf] %vm1112_vm1, %v1339_v11  ;;  %v1344_v17 = vpack.c.bf16 %v822_v15, %v822_v15  ;;  %vm724_vm0 = vcmp.gt.f32.partialorder %v650_v10, 0.0  ;;  %v533_v22 = vadd.f32 %v1972_v29, %v1693_v36 }
 0x131   :  { %v854_v18 = vsel %vm726_vm14, %v658_v6, %v790_v13  ;;  %v788_v19 = vmul.f32 0.01, %v650_v10  ;;  %1170 = vst.msk [vmem:[%s2097_s3 + $0xe4] sm:$0xf] %vm1112_vm1, %v1371_v14  ;;  %v661_v23 = vadd.f32 %v1974_v34, %v1693_v36  ;;  %v525_v26 = vadd.f32 %v1693_v36, %v1976_v35 }
 0x132   :  { %v1376_v20 = vpack.c.bf16 %v854_v18, %v854_v18  ;;  %v820_v21 = vsel %vm692_vm15, %v522_v7, %v756_v16  ;;  %1143 = vst.msk [vmem:[%s2097_s3 + $0x78] sm:$0xf] %vm1112_vm1, %v1344_v17  ;;  %v653_v28 = vadd.f32 %v1693_v36, %v1978_v27  ;;  %vm695_vm2 = vcmp.gt.f32.partialorder %v533_v22, 0.0 }
 0x133   :  { %v1342_v24 = vpack.c.bf16 %v820_v21, %v820_v21  ;;  %v852_v25 = vsel %vm724_vm0, %v650_v10, %v788_v19  ;;  %v759_v30 = vmul.f32 0.01, %v533_v22  ;;  %vm727_vm3 = vcmp.gt.f32.partialorder %v661_v23, 0.0 }
 0x134   :  { %1175 = vst.msk [vmem:[%s2097_s3 + $0xf8] sm:$0xf] %vm1112_vm1, %v1376_v20  ;;  %v1374_v29 = vpack.c.bf16 %v852_v25, %v852_v25  ;;  %v791_v31 = vmul.f32 0.01, %v661_v23  ;;  %vm693_vm4 = vcmp.gt.f32.partialorder %v525_v26, 0.0  ;;  %vm725_vm5 = vcmp.gt.f32.partialorder %v653_v28, 0.0 }
 0x135   :  { %1141 = vst.msk [vmem:[%s2097_s3 + $0x70] sm:$0xf] %vm1112_vm1, %v1342_v24  ;;  %v757_v32 = vmul.f32 0.01, %v525_v26  ;;  %v823_v36 = vsel %vm695_vm2, %v533_v22, %v759_v30  ;;  %v789_v33 = vmul.f32 0.01, %v653_v28 }
 0x136   :  { %1173 = vst.msk [vmem:[%s2097_s3 + $0xf0] sm:$0xf] %vm1112_vm1, %v1374_v29  ;;  %v1345_v34 = vpack.c.bf16 %v823_v36, %v823_v36  ;;  %v855_v35 = vsel %vm727_vm3, %v661_v23, %v791_v31 }
 0x137   :  { %v821_v37 = vsel %vm693_vm4, %v525_v26, %v757_v32  ;;  %v1377_v38 = vpack.c.bf16 %v855_v35, %v855_v35  ;;  %v853_v27 = vsel %vm725_vm5, %v653_v28, %v789_v33 }
 0x138   :  { %v1343_v39 = vpack.c.bf16 %v821_v37, %v821_v37  ;;  %1144 = vst.msk [vmem:[%s2097_s3 + $0x7c] sm:$0xf] %vm1112_vm1, %v1345_v34  ;;  %v1375_v40 = vpack.c.bf16 %v853_v27, %v853_v27 }
 0x139   :  { %1176 = vst.msk [vmem:[%s2097_s3 + $0xfc] sm:$0xf] %vm1112_vm1, %v1377_v38 }
 0x13a   :  { %1142 = vst.msk [vmem:[%s2097_s3 + $0x74] sm:$0xf] %vm1112_vm1, %v1343_v39  ;;  %1174 = vst.msk [vmem:[%s2097_s3 + $0xf4] sm:$0xf] %vm1112_vm1, %v1375_v40 }

// kernel: vae_forward.11
= control target key start
LH: loop header
LB: loop body
LE: loop exit
PB: predicated region body
PF: predicated region fallthrough
CT: control target
= control target key end

     0   :  { %v4782_v0 = vmov 0   ;;  %vm1502_vm0 = vcmask 130048   ;;  %vm3200_vm1 = vcmask 23552   ;;  %s7026_s1 = inlined_call_operand.vmem [shape: bf16[144,3], index: 1, kind: input, shape index: {}]   ;;  %s7027_s0 = inlined_call_operand.vmem [shape: bf16[2048,144], index: 0, kind: input, shape index: {}]   ;;  %s7028_s2 = inlined_call_operand.vmem [shape: f32[1,3], index: 2, kind: input, shape index: {}]   ;;  %s7029_s3 = inlined_call_operand.vmem [shape: f32[2048,3], index: 3, kind: output, shape index: {}]  }
   0x1   :  { %1887 = vmatprep.subr.bf16.mxu0 %v4782_v0  ;;  %3855 = vmatprep.subr.bf16.mxu1 %v4782_v0  ;;  %v3874_v1 = vld [vmem:[%s7026_s1] sm:$0xff]   ;;  %v3875_v2 = vld [vmem:[%s7026_s1 + $0x8] sm:$0xff]   ;;  %v3876_v3 = vld [vmem:[%s7026_s1 + $0x10] sm:$0xff]  }
   0x2   :  { %1888 = vmatpush1.bf16.msra.mxu0 %v3874_v1  ;;  %3864 = vmatpush1.bf16.msra.mxu1 %v3874_v1  ;;  %v3877_v4 = vld [vmem:[%s7026_s1 + $0x18] sm:$0xff]   ;;  %v3885_v5 = vld [vmem:[%s7027_s0 + $0x4] ss:$8 sps:$4 sm:$0xff]   ;;  %v3880_v9 = vld [vmem:[%s7026_s1 + $0x30] sm:$0xff]  }
   0x3   :  { %1889 = vmatprep.subr.bf16.mxu0 %v4782_v0  ;;  %3856 = vmatprep.subr.bf16.mxu1 %v4782_v0  ;;  %v3888_v6 = vld [vmem:[%s7027_s0 + $0x404] ss:$8 sps:$4 sm:$0xff]   ;;  %v3881_v10 = vld [vmem:[%s7026_s1 + $0x38] sm:$0xff]   ;;  %v3883_v12 = vld [vmem:[%s7027_s0] ss:$8 sps:$4 sm:$0xff]  }
   0x4   :  { %3727 = vmatprep.mubr.msk.bf16.mxu0 %vm1502_vm0, %v3885_v5  ;;  %3791 = vmatprep.mubr.msk.bf16.mxu1 %vm1502_vm0, %v3888_v6  ;;  %v3878_v7 = vld [vmem:[%s7026_s1 + $0x20] sm:$0xff]   ;;  %v3879_v8 = vld [vmem:[%s7026_s1 + $0x28] sm:$0xff]   ;;  %v3889_v14 = vld [vmem:[%s7027_s0 + $0x14] ss:$8 sps:$4 sm:$0xff]  }
   0x5   :  { %v3882_v11 = vld [vmem:[%s7026_s1 + $0x40] sm:$0xff]   ;;  %v3891_v15 = vld [vmem:[%s7027_s0 + $0x414] ss:$8 sps:$4 sm:$0xff]   ;;  %v3893_v16 = vld [vmem:[%s7027_s0 + $0x10] ss:$8 sps:$4 sm:$0xff]  }
   0x6   :  { %1890 = vmatpush1.bf16.msra.mxu0 %v3875_v2  ;;  %3865 = vmatpush1.bf16.msra.mxu1 %v3875_v2  ;;  %v3886_v13 = vld [vmem:[%s7027_s0 + $0x400] ss:$8 sps:$4 sm:$0xff]   ;;  %v3894_v17 = vld [vmem:[%s7027_s0 + $0x410] ss:$8 sps:$4 sm:$0xff]   ;;  %v3895_v18 = vld [vmem:[%s7027_s0 + $0x24] ss:$8 sps:$4 sm:$0xff]  }
   0x7   :  { %1891 = vmatprep.subr.bf16.mxu0 %v4782_v0  ;;  %3857 = vmatprep.subr.bf16.mxu1 %v4782_v0  ;;  %v3897_v19 = vld [vmem:[%s7027_s0 + $0x424] ss:$8 sps:$4 sm:$0xff]   ;;  %v3899_v20 = vld [vmem:[%s7027_s0 + $0x20] ss:$8 sps:$4 sm:$0xff]   ;;  %v3901_v22 = vld [vmem:[%s7027_s0 + $0x34] ss:$8 sps:$4 sm:$0xff]  }
   0x8   :  { %v3900_v21 = vld [vmem:[%s7027_s0 + $0x420] ss:$8 sps:$4 sm:$0xff]   ;;  %v3903_v23 = vld [vmem:[%s7027_s0 + $0x434] ss:$8 sps:$4 sm:$0xff]   ;;  %v3905_v24 = vld [vmem:[%s7027_s0 + $0x30] ss:$8 sps:$4 sm:$0xff]  }
   0x9   :  { %v3906_v25 = vld [vmem:[%s7027_s0 + $0x430] ss:$8 sps:$4 sm:$0xff]   ;;  %v3907_v26 = vld [vmem:[%s7027_s0 + $0x44] ss:$8 sps:$4 sm:$0xff]   ;;  %v3911_v28 = vld [vmem:[%s7027_s0 + $0x40] ss:$8 sps:$4 sm:$0xff]  }
   0xa   :  { %1892 = vmatpush1.bf16.msra.mxu0 %v3876_v3  ;;  %3866 = vmatpush1.bf16.msra.mxu1 %v3876_v3  ;;  %v3909_v27 = vld [vmem:[%s7027_s0 + $0x444] ss:$8 sps:$4 sm:$0xff]   ;;  %v3912_v29 = vld [vmem:[%s7027_s0 + $0x440] ss:$8 sps:$4 sm:$0xff]   ;;  %v3913_v30 = vld [vmem:[%s7027_s0 + $0x54] ss:$8 sps:$4 sm:$0xff]  }
   0xb   :  { %1893 = vmatprep.subr.bf16.mxu0 %v4782_v0  ;;  %3858 = vmatprep.subr.bf16.mxu1 %v4782_v0  ;;  %v3915_v31 = vld [vmem:[%s7027_s0 + $0x454] ss:$8 sps:$4 sm:$0xff]   ;;  %v3917_v32 = vld [vmem:[%s7027_s0 + $0x50] ss:$8 sps:$4 sm:$0xff]   ;;  %v3919_v34 = vld [vmem:[%s7027_s0 + $0x64] ss:$8 sps:$4 sm:$0xff]  }
   0xc   :  { %v3918_v33 = vld [vmem:[%s7027_s0 + $0x450] ss:$8 sps:$4 sm:$0xff]   ;;  %v3921_v35 = vld [vmem:[%s7027_s0 + $0x464] ss:$8 sps:$4 sm:$0xff]   ;;  %v3923_v36 = vld [vmem:[%s7027_s0 + $0x60] ss:$8 sps:$4 sm:$0xff]  }
   0xd   :  { %v3924_v37 = vld [vmem:[%s7027_s0 + $0x460] ss:$8 sps:$4 sm:$0xff]   ;;  %v3925_v38 = vld [vmem:[%s7027_s0 + $0x74] ss:$8 sps:$4 sm:$0xff]   ;;  %v3929_v40 = vld [vmem:[%s7027_s0 + $0x70] ss:$8 sps:$4 sm:$0xff]  }
   0xe   :  { %1894 = vmatpush1.bf16.msra.mxu0 %v3877_v4  ;;  %3867 = vmatpush1.bf16.msra.mxu1 %v3877_v4  ;;  %v3927_v39 = vld [vmem:[%s7027_s0 + $0x474] ss:$8 sps:$4 sm:$0xff]   ;;  %v3930_v41 = vld [vmem:[%s7027_s0 + $0x470] ss:$8 sps:$4 sm:$0xff]   ;;  %v3931_v42 = vld [vmem:[%s7027_s0 + $0x84] ss:$8 sps:$4 sm:$0xff]  }
   0xf   :  { %1895 = vmatprep.subr.bf16.mxu0 %v4782_v0  ;;  %3859 = vmatprep.subr.bf16.mxu1 %v4782_v0  ;;  %v3933_v43 = vld [vmem:[%s7027_s0 + $0x484] ss:$8 sps:$4 sm:$0xff]   ;;  %v3935_v44 = vld [vmem:[%s7027_s0 + $0x80] ss:$8 sps:$4 sm:$0xff]   ;;  %v3937_v46 = vld [vmem:[%s7027_s0 + $0x94] ss:$8 sps:$4 sm:$0xff]  }
  0x10   :  { %v3936_v45 = vld [vmem:[%s7027_s0 + $0x480] ss:$8 sps:$4 sm:$0xff]   ;;  %v3939_v47 = vld [vmem:[%s7027_s0 + $0x494] ss:$8 sps:$4 sm:$0xff]   ;;  %v3941_v48 = vld [vmem:[%s7027_s0 + $0x90] ss:$8 sps:$4 sm:$0xff]  }
  0x11   :  { %v3942_v49 = vld [vmem:[%s7027_s0 + $0x490] ss:$8 sps:$4 sm:$0xff]   ;;  %v3943_v50 = vld [vmem:[%s7027_s0 + $0xa4] ss:$8 sps:$4 sm:$0xff]   ;;  %v3947_v52 = vld [vmem:[%s7027_s0 + $0xa0] ss:$8 sps:$4 sm:$0xff]  }
  0x12   :  { %1896 = vmatpush1.bf16.msra.mxu0 %v3878_v7  ;;  %3868 = vmatpush1.bf16.msra.mxu1 %v3878_v7  ;;  %v3945_v51 = vld [vmem:[%s7027_s0 + $0x4a4] ss:$8 sps:$4 sm:$0xff]   ;;  %v3948_v53 = vld [vmem:[%s7027_s0 + $0x4a0] ss:$8 sps:$4 sm:$0xff]   ;;  %v3949_v54 = vld [vmem:[%s7027_s0 + $0xb4] ss:$8 sps:$4 sm:$0xff]  }
  0x13   :  { %1897 = vmatprep.subr.bf16.mxu0 %v4782_v0  ;;  %3860 = vmatprep.subr.bf16.mxu1 %v4782_v0  ;;  %v3951_v55 = vld [vmem:[%s7027_s0 + $0x4b4] ss:$8 sps:$4 sm:$0xff]   ;;  %v3953_v56 = vld [vmem:[%s7027_s0 + $0xb0] ss:$8 sps:$4 sm:$0xff]   ;;  %v3955_v58 = vld [vmem:[%s7027_s0 + $0xc4] ss:$8 sps:$4 sm:$0xff]  }
  0x14   :  { %v3954_v57 = vld [vmem:[%s7027_s0 + $0x4b0] ss:$8 sps:$4 sm:$0xff]   ;;  %v3957_v59 = vld [vmem:[%s7027_s0 + $0x4c4] ss:$8 sps:$4 sm:$0xff]   ;;  %v3959_v60 = vld [vmem:[%s7027_s0 + $0xc0] ss:$8 sps:$4 sm:$0xff]  }
  0x15   :  { %v3960_v61 = vld [vmem:[%s7027_s0 + $0x4c0] ss:$8 sps:$4 sm:$0xff]   ;;  %v3961_v62 = vld [vmem:[%s7027_s0 + $0xd4] ss:$8 sps:$4 sm:$0xff]   ;;  %v3966_v1 = vld [vmem:[%s7027_s0 + $0x4d0] ss:$8 sps:$4 sm:$0xff]  }
  0x16   :  { %1898 = vmatpush1.bf16.msra.mxu0 %v3879_v8  ;;  %3869 = vmatpush1.bf16.msra.mxu1 %v3879_v8  ;;  %v3963_v63 = vld [vmem:[%s7027_s0 + $0x4d4] ss:$8 sps:$4 sm:$0xff]   ;;  %v3967_v2 = vld [vmem:[%s7027_s0 + $0xe4] ss:$8 sps:$4 sm:$0xff]   ;;  %v3971_v4 = vld [vmem:[%s7027_s0 + $0xe0] ss:$8 sps:$4 sm:$0xff]  }
  0x17   :  { %1899 = vmatprep.subr.bf16.mxu0 %v4782_v0  ;;  %3861 = vmatprep.subr.bf16.mxu1 %v4782_v0  ;;  %v3969_v3 = vld [vmem:[%s7027_s0 + $0x4e4] ss:$8 sps:$4 sm:$0xff]   ;;  %v3972_v5 = vld [vmem:[%s7027_s0 + $0x4e0] ss:$8 sps:$4 sm:$0xff]   ;;  %v3973_v6 = vld [vmem:[%s7027_s0 + $0xf4] ss:$8 sps:$4 sm:$0xff]  }
  0x18   :  { %v3975_v7 = vld [vmem:[%s7027_s0 + $0x4f4] ss:$8 sps:$4 sm:$0xff]   ;;  %v3977_v8 = vld [vmem:[%s7027_s0 + $0xf0] ss:$8 sps:$4 sm:$0xff]  }
  0x1a   :  { %1900 = vmatpush1.bf16.msra.mxu0 %v3880_v9  ;;  %3870 = vmatpush1.bf16.msra.mxu1 %v3880_v9  ;;  %v3978_v9 = vld [vmem:[%s7027_s0 + $0x4f0] ss:$8 sps:$4 sm:$0xff]  }
  0x1b   :  { %1901 = vmatprep.subr.bf16.mxu0 %v4782_v0  ;;  %3862 = vmatprep.subr.bf16.mxu1 %v4782_v0 }
  0x1e   :  { %1902 = vmatpush1.bf16.msra.mxu0 %v3881_v10  ;;  %3871 = vmatpush1.bf16.msra.mxu1 %v3881_v10  ;;  %v3979_v10 = vld [vmem:[%s7027_s0 + $0x104] ss:$8 sps:$4 sm:$0xff]  }
  0x1f   :  { %1903 = vmatprep.subr.bf16.mxu0 %v4782_v0  ;;  %3863 = vmatprep.subr.bf16.mxu1 %v4782_v0  ;;  %v3965_v0 = vld [vmem:[%s7027_s0 + $0xd0] ss:$8 sps:$4 sm:$0xff]  }
  0x22   :  { %1904 = vmatpush1.bf16.msra.mxu0 %v3882_v11  ;;  %3872 = vmatpush1.bf16.msra.mxu1 %v3882_v11  ;;  %v3981_v11 = vld [vmem:[%s7027_s0 + $0x504] ss:$8 sps:$4 sm:$0xff]  }
  0x25   :  { %1920 = vmatmul.mubr.bf16.vlgmr.msra.gmra.mrb[0].mxu0 %v3883_v12  ;;  %2432 = vmatmul.mubr.bf16.vlgmr.msra.gmra.mrb[0].mxu1 %v3886_v13  ;;  %v3983_v12 = vld [vmem:[%s7027_s0 + $0x100] ss:$8 sps:$4 sm:$0xff]  }
  0x26   :  { %3728 = vmatprep.mubr.msk.bf16.mxu0 %vm1502_vm0, %v3889_v14  ;;  %3792 = vmatprep.mubr.msk.bf16.mxu1 %vm1502_vm0, %v3891_v15  ;;  %v3984_v13 = vld [vmem:[%s7027_s0 + $0x500] ss:$8 sps:$4 sm:$0xff]   ;;  %v3985_v14 = vld [vmem:[%s7027_s0 + $0x114] ss:$8 sps:$4 sm:$0xff]  }
  0x27   :  { %v3987_v15 = vld [vmem:[%s7027_s0 + $0x514] ss:$8 sps:$4 sm:$0xff]  }
  0x2d   :  { %1928 = vmatmul.mubr.bf16.gmra.mrb[4].mxu0 %v3893_v16  ;;  %2440 = vmatmul.mubr.bf16.gmra.mrb[4].mxu1 %v3894_v17  ;;  %v3989_v16 = vld [vmem:[%s7027_s0 + $0x110] ss:$8 sps:$4 sm:$0xff]  }
  0x2e   :  { %3729 = vmatprep.mubr.msk.bf16.mxu0 %vm1502_vm0, %v3895_v18  ;;  %3793 = vmatprep.mubr.msk.bf16.mxu1 %vm1502_vm0, %v3897_v19  ;;  %v3990_v17 = vld [vmem:[%s7027_s0 + $0x510] ss:$8 sps:$4 sm:$0xff]   ;;  %v3991_v18 = vld [vmem:[%s7027_s0 + $0x124] ss:$8 sps:$4 sm:$0xff]  }
  0x2f   :  { %v3993_v19 = vld [vmem:[%s7027_s0 + $0x524] ss:$8 sps:$4 sm:$0xff]  }
  0x35   :  { %1936 = vmatmul.mubr.bf16.gmra.mrb[8].mxu0 %v3899_v20  ;;  %2448 = vmatmul.mubr.bf16.gmra.mrb[8].mxu1 %v3900_v21  ;;  %v3995_v20 = vld [vmem:[%s7027_s0 + $0x120] ss:$8 sps:$4 sm:$0xff]  }
  0x36   :  { %3730 = vmatprep.mubr.msk.bf16.mxu0 %vm1502_vm0, %v3901_v22  ;;  %3794 = vmatprep.mubr.msk.bf16.mxu1 %vm1502_vm0, %v3903_v23  ;;  %v3996_v21 = vld [vmem:[%s7027_s0 + $0x520] ss:$8 sps:$4 sm:$0xff]   ;;  %v3997_v22 = vld [vmem:[%s7027_s0 + $0x134] ss:$8 sps:$4 sm:$0xff]  }
  0x37   :  { %v3999_v23 = vld [vmem:[%s7027_s0 + $0x534] ss:$8 sps:$4 sm:$0xff]  }
  0x3d   :  { %1944 = vmatmul.mubr.bf16.gmra.mrb[12].mxu0 %v3905_v24  ;;  %2456 = vmatmul.mubr.bf16.gmra.mrb[12].mxu1 %v3906_v25  ;;  %v4001_v24 = vld [vmem:[%s7027_s0 + $0x130] ss:$8 sps:$4 sm:$0xff]  }
  0x3e   :  { %3731 = vmatprep.mubr.msk.bf16.mxu0 %vm1502_vm0, %v3907_v26  ;;  %3795 = vmatprep.mubr.msk.bf16.mxu1 %vm1502_vm0, %v3909_v27  ;;  %v4002_v25 = vld [vmem:[%s7027_s0 + $0x530] ss:$8 sps:$4 sm:$0xff]   ;;  %v4003_v26 = vld [vmem:[%s7027_s0 + $0x144] ss:$8 sps:$4 sm:$0xff]  }
  0x3f   :  { %v4005_v27 = vld [vmem:[%s7027_s0 + $0x544] ss:$8 sps:$4 sm:$0xff]  }
  0x45   :  { %1952 = vmatmul.mubr.bf16.gmra.mrb[16].mxu0 %v3911_v28  ;;  %2464 = vmatmul.mubr.bf16.gmra.mrb[16].mxu1 %v3912_v29  ;;  %v4007_v28 = vld [vmem:[%s7027_s0 + $0x140] ss:$8 sps:$4 sm:$0xff]  }
  0x46   :  { %3732 = vmatprep.mubr.msk.bf16.mxu0 %vm1502_vm0, %v3913_v30  ;;  %3796 = vmatprep.mubr.msk.bf16.mxu1 %vm1502_vm0, %v3915_v31  ;;  %v4008_v29 = vld [vmem:[%s7027_s0 + $0x540] ss:$8 sps:$4 sm:$0xff]   ;;  %v4009_v30 = vld [vmem:[%s7027_s0 + $0x154] ss:$8 sps:$4 sm:$0xff]  }
  0x47   :  { %v4011_v31 = vld [vmem:[%s7027_s0 + $0x554] ss:$8 sps:$4 sm:$0xff]  }
  0x4d   :  { %1960 = vmatmul.mubr.bf16.gmra.mrb[20].mxu0 %v3917_v32  ;;  %2472 = vmatmul.mubr.bf16.gmra.mrb[20].mxu1 %v3918_v33  ;;  %v4013_v32 = vld [vmem:[%s7027_s0 + $0x150] ss:$8 sps:$4 sm:$0xff]  }
  0x4e   :  { %3733 = vmatprep.mubr.msk.bf16.mxu0 %vm1502_vm0, %v3919_v34  ;;  %3797 = vmatprep.mubr.msk.bf16.mxu1 %vm1502_vm0, %v3921_v35  ;;  %v4014_v33 = vld [vmem:[%s7027_s0 + $0x550] ss:$8 sps:$4 sm:$0xff]   ;;  %v4015_v34 = vld [vmem:[%s7027_s0 + $0x164] ss:$8 sps:$4 sm:$0xff]  }
  0x4f   :  { %v4017_v35 = vld [vmem:[%s7027_s0 + $0x564] ss:$8 sps:$4 sm:$0xff]  }
  0x55   :  { %1968 = vmatmul.mubr.bf16.gmra.mrb[24].mxu0 %v3923_v36  ;;  %2480 = vmatmul.mubr.bf16.gmra.mrb[24].mxu1 %v3924_v37  ;;  %v4019_v36 = vld [vmem:[%s7027_s0 + $0x160] ss:$8 sps:$4 sm:$0xff]  }
  0x56   :  { %3734 = vmatprep.mubr.msk.bf16.mxu0 %vm1502_vm0, %v3925_v38  ;;  %3798 = vmatprep.mubr.msk.bf16.mxu1 %vm1502_vm0, %v3927_v39  ;;  %v4020_v37 = vld [vmem:[%s7027_s0 + $0x560] ss:$8 sps:$4 sm:$0xff]   ;;  %v4021_v38 = vld [vmem:[%s7027_s0 + $0x174] ss:$8 sps:$4 sm:$0xff]  }
  0x57   :  { %v4023_v39 = vld [vmem:[%s7027_s0 + $0x574] ss:$8 sps:$4 sm:$0xff]  }
  0x5d   :  { %1976 = vmatmul.mubr.bf16.gmra.mrb[28].mxu0 %v3929_v40  ;;  %2488 = vmatmul.mubr.bf16.gmra.mrb[28].mxu1 %v3930_v41  ;;  %v4025_v40 = vld [vmem:[%s7027_s0 + $0x170] ss:$8 sps:$4 sm:$0xff]  }
  0x5e   :  { %3735 = vmatprep.mubr.msk.bf16.mxu0 %vm1502_vm0, %v3931_v42  ;;  %3799 = vmatprep.mubr.msk.bf16.mxu1 %vm1502_vm0, %v3933_v43  ;;  %v4026_v41 = vld [vmem:[%s7027_s0 + $0x570] ss:$8 sps:$4 sm:$0xff]   ;;  %v4027_v42 = vld [vmem:[%s7027_s0 + $0x184] ss:$8 sps:$4 sm:$0xff]  }
  0x5f   :  { %v4029_v43 = vld [vmem:[%s7027_s0 + $0x584] ss:$8 sps:$4 sm:$0xff]  }
  0x65   :  { %1984 = vmatmul.mubr.bf16.gmra.mrb[32].mxu0 %v3935_v44  ;;  %2496 = vmatmul.mubr.bf16.gmra.mrb[32].mxu1 %v3936_v45  ;;  %v4031_v44 = vld [vmem:[%s7027_s0 + $0x180] ss:$8 sps:$4 sm:$0xff]  }
  0x66   :  { %3736 = vmatprep.mubr.msk.bf16.mxu0 %vm1502_vm0, %v3937_v46  ;;  %3800 = vmatprep.mubr.msk.bf16.mxu1 %vm1502_vm0, %v3939_v47  ;;  %v4032_v45 = vld [vmem:[%s7027_s0 + $0x580] ss:$8 sps:$4 sm:$0xff]   ;;  %v4033_v46 = vld [vmem:[%s7027_s0 + $0x194] ss:$8 sps:$4 sm:$0xff]  }
  0x67   :  { %v4035_v47 = vld [vmem:[%s7027_s0 + $0x594] ss:$8 sps:$4 sm:$0xff]  }
  0x6d   :  { %1992 = vmatmul.mubr.bf16.gmra.mrb[36].mxu0 %v3941_v48  ;;  %2504 = vmatmul.mubr.bf16.gmra.mrb[36].mxu1 %v3942_v49  ;;  %v4037_v48 = vld [vmem:[%s7027_s0 + $0x190] ss:$8 sps:$4 sm:$0xff]  }
  0x6e   :  { %3737 = vmatprep.mubr.msk.bf16.mxu0 %vm1502_vm0, %v3943_v50  ;;  %3801 = vmatprep.mubr.msk.bf16.mxu1 %vm1502_vm0, %v3945_v51  ;;  %v4038_v49 = vld [vmem:[%s7027_s0 + $0x590] ss:$8 sps:$4 sm:$0xff]   ;;  %v4039_v50 = vld [vmem:[%s7027_s0 + $0x1a4] ss:$8 sps:$4 sm:$0xff]  }
  0x6f   :  { %v4041_v51 = vld [vmem:[%s7027_s0 + $0x5a4] ss:$8 sps:$4 sm:$0xff]  }
  0x75   :  { %2000 = vmatmul.mubr.bf16.gmra.mrb[40].mxu0 %v3947_v52  ;;  %2512 = vmatmul.mubr.bf16.gmra.mrb[40].mxu1 %v3948_v53  ;;  %v4043_v52 = vld [vmem:[%s7027_s0 + $0x1a0] ss:$8 sps:$4 sm:$0xff]  }
  0x76   :  { %3738 = vmatprep.mubr.msk.bf16.mxu0 %vm1502_vm0, %v3949_v54  ;;  %3802 = vmatprep.mubr.msk.bf16.mxu1 %vm1502_vm0, %v3951_v55  ;;  %v4044_v53 = vld [vmem:[%s7027_s0 + $0x5a0] ss:$8 sps:$4 sm:$0xff]   ;;  %v4045_v54 = vld [vmem:[%s7027_s0 + $0x1b4] ss:$8 sps:$4 sm:$0xff]  }
  0x77   :  { %v4047_v55 = vld [vmem:[%s7027_s0 + $0x5b4] ss:$8 sps:$4 sm:$0xff]  }
  0x7d   :  { %2008 = vmatmul.mubr.bf16.gmra.mrb[44].mxu0 %v3953_v56  ;;  %2520 = vmatmul.mubr.bf16.gmra.mrb[44].mxu1 %v3954_v57  ;;  %v5217_v56 = vld [vmem:[%s7028_s2] ss:$0 sm:$0xff] }
  0x7e   :  { %3739 = vmatprep.mubr.msk.bf16.mxu0 %vm1502_vm0, %v3955_v58  ;;  %3803 = vmatprep.mubr.msk.bf16.mxu1 %vm1502_vm0, %v3957_v59 }
  0x85   :  { %2016 = vmatmul.mubr.bf16.gmra.mrb[48].mxu0 %v3959_v60  ;;  %2528 = vmatmul.mubr.bf16.gmra.mrb[48].mxu1 %v3960_v61 }
  0x86   :  { %3740 = vmatprep.mubr.msk.bf16.mxu0 %vm1502_vm0, %v3961_v62  ;;  %3804 = vmatprep.mubr.msk.bf16.mxu1 %vm1502_vm0, %v3963_v63  ;;  %v4049_v63 = vld [vmem:[%s7027_s0 + $0x1b0] ss:$8 sps:$4 sm:$0xff]  }
  0x8d   :  { %2024 = vmatmul.mubr.bf16.gmra.mrb[52].mxu0 %v3965_v0  ;;  %2536 = vmatmul.mubr.bf16.gmra.mrb[52].mxu1 %v3966_v1  ;;  %v4050_v0 = vld [vmem:[%s7027_s0 + $0x5b0] ss:$8 sps:$4 sm:$0xff]  }
  0x8e   :  { %3741 = vmatprep.mubr.msk.bf16.mxu0 %vm1502_vm0, %v3967_v2  ;;  %3805 = vmatprep.mubr.msk.bf16.mxu1 %vm1502_vm0, %v3969_v3  ;;  %v4051_v3 = vld [vmem:[%s7027_s0 + $0x1c4] ss:$8 sps:$4 sm:$0xff]  }
  0x95   :  { %2032 = vmatmul.mubr.bf16.gmra.mrb[56].mxu0 %v3971_v4  ;;  %2544 = vmatmul.mubr.bf16.gmra.mrb[56].mxu1 %v3972_v5  ;;  %v4053_v4 = vld [vmem:[%s7027_s0 + $0x5c4] ss:$8 sps:$4 sm:$0xff]  }
  0x96   :  { %3742 = vmatprep.mubr.msk.bf16.mxu0 %vm1502_vm0, %v3973_v6  ;;  %3806 = vmatprep.mubr.msk.bf16.mxu1 %vm1502_vm0, %v3975_v7 }
  0x9d   :  { %2040 = vmatmul.mubr.bf16.gmra.mrb[60].mxu0 %v3977_v8  ;;  %2552 = vmatmul.mubr.bf16.gmra.mrb[60].mxu1 %v3978_v9 }
  0x9e   :  { %3743 = vmatprep.mubr.msk.bf16.mxu0 %vm1502_vm0, %v3979_v10  ;;  %3807 = vmatprep.mubr.msk.bf16.mxu1 %vm1502_vm0, %v3981_v11 }
  0xa5   :  { %2048 = vmatmul.mubr.bf16.gmra.mrb[64].mxu0 %v3983_v12  ;;  %2560 = vmatmul.mubr.bf16.gmra.mrb[64].mxu1 %v3984_v13 }
  0xa6   :  { %3744 = vmatprep.mubr.msk.bf16.mxu0 %vm1502_vm0, %v3985_v14  ;;  %3808 = vmatprep.mubr.msk.bf16.mxu1 %vm1502_vm0, %v3987_v15  ;;  %v4055_v15 = vld [vmem:[%s7027_s0 + $0x1c0] ss:$8 sps:$4 sm:$0xff]  }
  0xad   :  { %2056 = vmatmul.mubr.bf16.gmra.mrb[68].mxu0 %v3989_v16  ;;  %2568 = vmatmul.mubr.bf16.gmra.mrb[68].mxu1 %v3990_v17  ;;  %v4056_v16 = vld [vmem:[%s7027_s0 + $0x5c0] ss:$8 sps:$4 sm:$0xff]  }
  0xae   :  { %3745 = vmatprep.mubr.msk.bf16.mxu0 %vm1502_vm0, %v3991_v18  ;;  %3809 = vmatprep.mubr.msk.bf16.mxu1 %vm1502_vm0, %v3993_v19  ;;  %v4057_v19 = vld [vmem:[%s7027_s0 + $0x1d4] ss:$8 sps:$4 sm:$0xff]  }
  0xb5   :  { %2064 = vmatmul.mubr.bf16.gmra.mrb[72].mxu0 %v3995_v20  ;;  %2576 = vmatmul.mubr.bf16.gmra.mrb[72].mxu1 %v3996_v21  ;;  %v4059_v20 = vld [vmem:[%s7027_s0 + $0x5d4] ss:$8 sps:$4 sm:$0xff]  }
  0xb6   :  { %3746 = vmatprep.mubr.msk.bf16.mxu0 %vm1502_vm0, %v3997_v22  ;;  %3810 = vmatprep.mubr.msk.bf16.mxu1 %vm1502_vm0, %v3999_v23 }
  0xbd   :  { %2072 = vmatmul.mubr.bf16.gmra.mrb[76].mxu0 %v4001_v24  ;;  %2584 = vmatmul.mubr.bf16.gmra.mrb[76].mxu1 %v4002_v25 }
  0xbe   :  { %3747 = vmatprep.mubr.msk.bf16.mxu0 %vm1502_vm0, %v4003_v26  ;;  %3811 = vmatprep.mubr.msk.bf16.mxu1 %vm1502_vm0, %v4005_v27 }
  0xc5   :  { %2080 = vmatmul.mubr.bf16.gmra.mrb[80].mxu0 %v4007_v28  ;;  %2592 = vmatmul.mubr.bf16.gmra.mrb[80].mxu1 %v4008_v29 }
  0xc6   :  { %3748 = vmatprep.mubr.msk.bf16.mxu0 %vm1502_vm0, %v4009_v30  ;;  %3812 = vmatprep.mubr.msk.bf16.mxu1 %vm1502_vm0, %v4011_v31 }
  0xcd   :  { %2088 = vmatmul.mubr.bf16.gmra.mrb[84].mxu0 %v4013_v32  ;;  %2600 = vmatmul.mubr.bf16.gmra.mrb[84].mxu1 %v4014_v33 }
  0xce   :  { %3749 = vmatprep.mubr.msk.bf16.mxu0 %vm1502_vm0, %v4015_v34  ;;  %3813 = vmatprep.mubr.msk.bf16.mxu1 %vm1502_vm0, %v4017_v35  ;;  %v4061_v35 = vld [vmem:[%s7027_s0 + $0x1d0] ss:$8 sps:$4 sm:$0xff]  }
  0xd5   :  { %2096 = vmatmul.mubr.bf16.gmra.mrb[88].mxu0 %v4019_v36  ;;  %2608 = vmatmul.mubr.bf16.gmra.mrb[88].mxu1 %v4020_v37  ;;  %v4062_v36 = vld [vmem:[%s7027_s0 + $0x5d0] ss:$8 sps:$4 sm:$0xff]  }
  0xd6   :  { %3750 = vmatprep.mubr.msk.bf16.mxu0 %vm1502_vm0, %v4021_v38  ;;  %3814 = vmatprep.mubr.msk.bf16.mxu1 %vm1502_vm0, %v4023_v39  ;;  %v4063_v39 = vld [vmem:[%s7027_s0 + $0x1e4] ss:$8 sps:$4 sm:$0xff]  }
  0xdd   :  { %2104 = vmatmul.mubr.bf16.gmra.mrb[92].mxu0 %v4025_v40  ;;  %2616 = vmatmul.mubr.bf16.gmra.mrb[92].mxu1 %v4026_v41  ;;  %v4065_v40 = vld [vmem:[%s7027_s0 + $0x5e4] ss:$8 sps:$4 sm:$0xff]  }
  0xde   :  { %3751 = vmatprep.mubr.msk.bf16.mxu0 %vm1502_vm0, %v4027_v42  ;;  %3815 = vmatprep.mubr.msk.bf16.mxu1 %vm1502_vm0, %v4029_v43 }
  0xe5   :  { %2112 = vmatmul.mubr.bf16.gmra.mrb[96].mxu0 %v4031_v44  ;;  %2624 = vmatmul.mubr.bf16.gmra.mrb[96].mxu1 %v4032_v45 }
  0xe6   :  { %3752 = vmatprep.mubr.msk.bf16.mxu0 %vm1502_vm0, %v4033_v46  ;;  %3816 = vmatprep.mubr.msk.bf16.mxu1 %vm1502_vm0, %v4035_v47 }
  0xed   :  { %2120 = vmatmul.mubr.bf16.gmra.mrb[100].mxu0 %v4037_v48  ;;  %2632 = vmatmul.mubr.bf16.gmra.mrb[100].mxu1 %v4038_v49 }
  0xee   :  { %3753 = vmatprep.mubr.msk.bf16.mxu0 %vm1502_vm0, %v4039_v50  ;;  %3817 = vmatprep.mubr.msk.bf16.mxu1 %vm1502_vm0, %v4041_v51 }
  0xf5   :  { %2128 = vmatmul.mubr.bf16.gmra.mrb[104].mxu0 %v4043_v52  ;;  %2640 = vmatmul.mubr.bf16.gmra.mrb[104].mxu1 %v4044_v53 }
  0xf6   :  { %3754 = vmatprep.mubr.msk.bf16.mxu0 %vm1502_vm0, %v4045_v54  ;;  %3818 = vmatprep.mubr.msk.bf16.mxu1 %vm1502_vm0, %v4047_v55  ;;  %v4067_v55 = vld [vmem:[%s7027_s0 + $0x1e0] ss:$8 sps:$4 sm:$0xff]  }
  0xf8   :  { %v1921_v57 = vpop.f32.mrb[0].mxu0  ;;  %v2433_v58 = vpop.f32.mrb[0].mxu1 }
  0xf9   :  { %v1922_v59 = vadd.f32 %v5217_v56, %v1921_v57  ;;  %v2434_v60 = vadd.f32 %v5217_v56, %v2433_v58  ;;  %v1923_v61 = vpop.f32.mrb[1].mxu0  ;;  %v2435_v62 = vpop.f32.mrb[1].mxu1  ;;  %v4068_v57 = vld [vmem:[%s7027_s0 + $0x5e0] ss:$8 sps:$4 sm:$0xff]  }
  0xfa   :  { %v1924_v1 = vpop.f32.mrb[2].mxu0  ;;  %v2436_v2 = vpop.f32.mrb[2].mxu1  ;;  %v4071_v61 = vld [vmem:[%s7027_s0 + $0x5f4] ss:$8 sps:$4 sm:$0xff]  }
  0xfb   :  { %4267 = vtanh.f32 %v1922_v59  ;;  %v1925_v5 = vadd.f32 %v5217_v56, %v1924_v1  ;;  %v2437_v6 = vadd.f32 %v5217_v56, %v2436_v2  ;;  %v1926_v7 = vpop.f32.mrb[3].mxu0  ;;  %v2438_v8 = vpop.f32.mrb[3].mxu1 }
  0xfc   :  { %4269 = vtanh.f32 %v2434_v60  ;;  %v4069_v60 = vld [vmem:[%s7027_s0 + $0x1f4] ss:$8 sps:$4 sm:$0xff]  }
  0xfd   :  { %4271 = vtanh.f32 %v1925_v5  ;;  %2136 = vmatmul.mubr.bf16.gmra.mrb[108].mxu0 %v4049_v63  ;;  %2648 = vmatmul.mubr.bf16.gmra.mrb[108].mxu1 %v4050_v0 }
  0xfe   :  { %4273 = vtanh.f32 %v2437_v6  ;;  %3755 = vmatprep.mubr.msk.bf16.mxu0 %vm1502_vm0, %v4051_v3  ;;  %3819 = vmatprep.mubr.msk.bf16.mxu1 %vm1502_vm0, %v4053_v4 }
 0x100   :  { %v1929_v9 = vpop.f32.mrb[4].mxu0  ;;  %v2441_v10 = vpop.f32.mrb[4].mxu1 }
 0x101   :  { %v1930_v11 = vadd.f32 %v5217_v56, %v1929_v9  ;;  %v2442_v12 = vadd.f32 %v5217_v56, %v2441_v10  ;;  %v1931_v13 = vpop.f32.mrb[5].mxu0  ;;  %v2443_v14 = vpop.f32.mrb[5].mxu1 }
 0x102   :  { %v1932_v17 = vpop.f32.mrb[6].mxu0  ;;  %v2444_v18 = vpop.f32.mrb[6].mxu1  ;;  %v4074_v13 = vld [vmem:[%s7027_s0 + $0x5f0] ss:$8 sps:$4 sm:$0xff]  }
 0x103   :  { %4275 = vtanh.f32 %v1930_v11  ;;  %v1933_v21 = vadd.f32 %v5217_v56, %v1932_v17  ;;  %v2445_v22 = vadd.f32 %v5217_v56, %v2444_v18  ;;  %v1934_v23 = vpop.f32.mrb[7].mxu0  ;;  %v2446_v24 = vpop.f32.mrb[7].mxu1  ;;  %v4077_v17 = vld [vmem:[%s7027_s0 + $0x604] ss:$8 sps:$4 sm:$0xff]  }
 0x104   :  { %4277 = vtanh.f32 %v2442_v12  ;;  %v4073_v12 = vld [vmem:[%s7027_s0 + $0x1f0] ss:$8 sps:$4 sm:$0xff]  }
 0x105   :  { %v4268_v25 = vpop.eup %4267  ;;  %4279 = vtanh.f32 %v1933_v21  ;;  %2144 = vmatmul.mubr.bf16.gmra.mrb[112].mxu0 %v4055_v15  ;;  %2656 = vmatmul.mubr.bf16.gmra.mrb[112].mxu1 %v4056_v16  ;;  %v4075_v16 = vld [vmem:[%s7027_s0 + $0x204] ss:$8 sps:$4 sm:$0xff]  }
 0x106   :  { %v4270_v26 = vpop.eup %4269  ;;  %3201 = vst.msk [vmem:[%s7029_s3] sm:$0xff] %vm3200_vm1, %v4268_v25  ;;  %4281 = vtanh.f32 %v2445_v22  ;;  %3756 = vmatprep.mubr.msk.bf16.mxu0 %vm1502_vm0, %v4057_v19  ;;  %3820 = vmatprep.mubr.msk.bf16.mxu1 %vm1502_vm0, %v4059_v20 }
 0x107   :  { %v4272_v27 = vpop.eup %4271  ;;  %3329 = vst.msk [vmem:[%s7029_s3 + $0x400] sm:$0xff] %vm3200_vm1, %v4270_v26 }
 0x108   :  { %v4274_v28 = vpop.eup %4273  ;;  %3202 = vst.msk [vmem:[%s7029_s3 + $0x8] sm:$0xff] %vm3200_vm1, %v4272_v27  ;;  %v1937_v29 = vpop.f32.mrb[8].mxu0 }
 0x109   :  { %v2449_v30 = vpop.f32.mrb[8].mxu1  ;;  %3330 = vst.msk [vmem:[%s7029_s3 + $0x408] sm:$0xff] %vm3200_vm1, %v4274_v28  ;;  %v1938_v31 = vadd.f32 %v5217_v56, %v1937_v29  ;;  %v1939_v33 = vpop.f32.mrb[9].mxu0 }
 0x10a   :  { %v2450_v32 = vadd.f32 %v5217_v56, %v2449_v30  ;;  %v2451_v34 = vpop.f32.mrb[9].mxu1  ;;  %v1940_v37 = vpop.f32.mrb[10].mxu0  ;;  %v4080_v33 = vld [vmem:[%s7027_s0 + $0x600] ss:$8 sps:$4 sm:$0xff]  }
 0x10b   :  { %v2452_v38 = vpop.f32.mrb[10].mxu1  ;;  %4283 = vtanh.f32 %v1938_v31  ;;  %v1941_v41 = vadd.f32 %v5217_v56, %v1940_v37  ;;  %v1942_v43 = vpop.f32.mrb[11].mxu0  ;;  %v4083_v37 = vld [vmem:[%s7027_s0 + $0x614] ss:$8 sps:$4 sm:$0xff]  }
 0x10c   :  { %v2453_v42 = vadd.f32 %v5217_v56, %v2452_v38  ;;  %v2454_v44 = vpop.f32.mrb[11].mxu1  ;;  %4285 = vtanh.f32 %v2450_v32  ;;  %v4079_v32 = vld [vmem:[%s7027_s0 + $0x200] ss:$8 sps:$4 sm:$0xff]  }
 0x10d   :  { %v4276_v45 = vpop.eup %4275  ;;  %4287 = vtanh.f32 %v1941_v41  ;;  %2152 = vmatmul.mubr.bf16.gmra.mrb[116].mxu0 %v4061_v35  ;;  %2664 = vmatmul.mubr.bf16.gmra.mrb[116].mxu1 %v4062_v36  ;;  %v4081_v36 = vld [vmem:[%s7027_s0 + $0x214] ss:$8 sps:$4 sm:$0xff]  }
 0x10e   :  { %v4278_v46 = vpop.eup %4277  ;;  %3203 = vst.msk [vmem:[%s7029_s3 + $0x10] sm:$0xff] %vm3200_vm1, %v4276_v45  ;;  %4289 = vtanh.f32 %v2453_v42  ;;  %3757 = vmatprep.mubr.msk.bf16.mxu0 %vm1502_vm0, %v4063_v39  ;;  %3821 = vmatprep.mubr.msk.bf16.mxu1 %vm1502_vm0, %v4065_v40 }
 0x10f   :  { %v4280_v47 = vpop.eup %4279  ;;  %3331 = vst.msk [vmem:[%s7029_s3 + $0x410] sm:$0xff] %vm3200_vm1, %v4278_v46 }
 0x110   :  { %v4282_v48 = vpop.eup %4281  ;;  %3204 = vst.msk [vmem:[%s7029_s3 + $0x18] sm:$0xff] %vm3200_vm1, %v4280_v47  ;;  %v1945_v49 = vpop.f32.mrb[12].mxu0 }
 0x111   :  { %v2457_v50 = vpop.f32.mrb[12].mxu1  ;;  %3332 = vst.msk [vmem:[%s7029_s3 + $0x418] sm:$0xff] %vm3200_vm1, %v4282_v48  ;;  %v1946_v51 = vadd.f32 %v5217_v56, %v1945_v49  ;;  %v1947_v53 = vpop.f32.mrb[13].mxu0 }
 0x112   :  { %v2458_v52 = vadd.f32 %v5217_v56, %v2457_v50  ;;  %v2459_v54 = vpop.f32.mrb[13].mxu1  ;;  %v1948_v58 = vpop.f32.mrb[14].mxu0  ;;  %v4086_v53 = vld [vmem:[%s7027_s0 + $0x610] ss:$8 sps:$4 sm:$0xff]  }
 0x113   :  { %v2460_v59 = vpop.f32.mrb[14].mxu1  ;;  %4291 = vtanh.f32 %v1946_v51  ;;  %v1949_v62 = vadd.f32 %v5217_v56, %v1948_v58  ;;  %v1950_v0 = vpop.f32.mrb[15].mxu0  ;;  %v4089_v58 = vld [vmem:[%s7027_s0 + $0x624] ss:$8 sps:$4 sm:$0xff]  }
 0x114   :  { %v2461_v63 = vadd.f32 %v5217_v56, %v2460_v59  ;;  %v2462_v1 = vpop.f32.mrb[15].mxu1  ;;  %4293 = vtanh.f32 %v2458_v52  ;;  %v4085_v52 = vld [vmem:[%s7027_s0 + $0x210] ss:$8 sps:$4 sm:$0xff]  }
 0x115   :  { %v4284_v2 = vpop.eup %4283  ;;  %4295 = vtanh.f32 %v1949_v62  ;;  %2160 = vmatmul.mubr.bf16.gmra.mrb[120].mxu0 %v4067_v55  ;;  %2672 = vmatmul.mubr.bf16.gmra.mrb[120].mxu1 %v4068_v57  ;;  %v4087_v57 = vld [vmem:[%s7027_s0 + $0x224] ss:$8 sps:$4 sm:$0xff]  }
 0x116   :  { %v4286_v3 = vpop.eup %4285  ;;  %3205 = vst.msk [vmem:[%s7029_s3 + $0x20] sm:$0xff] %vm3200_vm1, %v4284_v2  ;;  %4297 = vtanh.f32 %v2461_v63  ;;  %3758 = vmatprep.mubr.msk.bf16.mxu0 %vm1502_vm0, %v4069_v60  ;;  %3822 = vmatprep.mubr.msk.bf16.mxu1 %vm1502_vm0, %v4071_v61 }
 0x117   :  { %v4288_v4 = vpop.eup %4287  ;;  %3333 = vst.msk [vmem:[%s7029_s3 + $0x420] sm:$0xff] %vm3200_vm1, %v4286_v3 }
 0x118   :  { %v4290_v5 = vpop.eup %4289  ;;  %3206 = vst.msk [vmem:[%s7029_s3 + $0x28] sm:$0xff] %vm3200_vm1, %v4288_v4  ;;  %v1953_v6 = vpop.f32.mrb[16].mxu0 }
 0x119   :  { %v2465_v7 = vpop.f32.mrb[16].mxu1  ;;  %3334 = vst.msk [vmem:[%s7029_s3 + $0x428] sm:$0xff] %vm3200_vm1, %v4290_v5  ;;  %v1954_v8 = vadd.f32 %v5217_v56, %v1953_v6  ;;  %v1955_v10 = vpop.f32.mrb[17].mxu0 }
 0x11a   :  { %v2466_v9 = vadd.f32 %v5217_v56, %v2465_v7  ;;  %v2467_v11 = vpop.f32.mrb[17].mxu1  ;;  %v1956_v14 = vpop.f32.mrb[18].mxu0  ;;  %v4092_v10 = vld [vmem:[%s7027_s0 + $0x620] ss:$8 sps:$4 sm:$0xff]  }
 0x11b   :  { %v2468_v15 = vpop.f32.mrb[18].mxu1  ;;  %4299 = vtanh.f32 %v1954_v8  ;;  %v1957_v18 = vadd.f32 %v5217_v56, %v1956_v14  ;;  %v1958_v20 = vpop.f32.mrb[19].mxu0  ;;  %v4095_v14 = vld [vmem:[%s7027_s0 + $0x634] ss:$8 sps:$4 sm:$0xff]  }
 0x11c   :  { %v2469_v19 = vadd.f32 %v5217_v56, %v2468_v15  ;;  %v2470_v21 = vpop.f32.mrb[19].mxu1  ;;  %4301 = vtanh.f32 %v2466_v9  ;;  %v4091_v9 = vld [vmem:[%s7027_s0 + $0x220] ss:$8 sps:$4 sm:$0xff]  }
 0x11d   :  { %v4292_v22 = vpop.eup %4291  ;;  %4303 = vtanh.f32 %v1957_v18  ;;  %2168 = vmatmul.mubr.bf16.gmra.mrb[124].mxu0 %v4073_v12  ;;  %2680 = vmatmul.mubr.bf16.gmra.mrb[124].mxu1 %v4074_v13  ;;  %v4093_v13 = vld [vmem:[%s7027_s0 + $0x234] ss:$8 sps:$4 sm:$0xff]  }
 0x11e   :  { %v4294_v23 = vpop.eup %4293  ;;  %3207 = vst.msk [vmem:[%s7029_s3 + $0x30] sm:$0xff] %vm3200_vm1, %v4292_v22  ;;  %4305 = vtanh.f32 %v2469_v19  ;;  %3759 = vmatprep.mubr.msk.bf16.mxu0 %vm1502_vm0, %v4075_v16  ;;  %3823 = vmatprep.mubr.msk.bf16.mxu1 %vm1502_vm0, %v4077_v17 }
 0x11f   :  { %v4296_v24 = vpop.eup %4295  ;;  %3335 = vst.msk [vmem:[%s7029_s3 + $0x430] sm:$0xff] %vm3200_vm1, %v4294_v23 }
 0x120   :  { %v4298_v25 = vpop.eup %4297  ;;  %3208 = vst.msk [vmem:[%s7029_s3 + $0x38] sm:$0xff] %vm3200_vm1, %v4296_v24  ;;  %v1961_v26 = vpop.f32.mrb[20].mxu0 }
 0x121   :  { %v2473_v27 = vpop.f32.mrb[20].mxu1  ;;  %3336 = vst.msk [vmem:[%s7029_s3 + $0x438] sm:$0xff] %vm3200_vm1, %v4298_v25  ;;  %v1962_v28 = vadd.f32 %v5217_v56, %v1961_v26  ;;  %v1963_v30 = vpop.f32.mrb[21].mxu0 }
 0x122   :  { %v2474_v29 = vadd.f32 %v5217_v56, %v2473_v27  ;;  %v2475_v31 = vpop.f32.mrb[21].mxu1  ;;  %v1964_v34 = vpop.f32.mrb[22].mxu0  ;;  %v4098_v30 = vld [vmem:[%s7027_s0 + $0x630] ss:$8 sps:$4 sm:$0xff]  }
 0x123   :  { %v2476_v35 = vpop.f32.mrb[22].mxu1  ;;  %4307 = vtanh.f32 %v1962_v28  ;;  %v1965_v38 = vadd.f32 %v5217_v56, %v1964_v34  ;;  %v1966_v40 = vpop.f32.mrb[23].mxu0  ;;  %v4101_v34 = vld [vmem:[%s7027_s0 + $0x644] ss:$8 sps:$4 sm:$0xff]  }
 0x124   :  { %v2477_v39 = vadd.f32 %v5217_v56, %v2476_v35  ;;  %v2478_v41 = vpop.f32.mrb[23].mxu1  ;;  %4309 = vtanh.f32 %v2474_v29  ;;  %v4097_v29 = vld [vmem:[%s7027_s0 + $0x230] ss:$8 sps:$4 sm:$0xff]  }
 0x125   :  { %v4300_v42 = vpop.eup %4299  ;;  %4311 = vtanh.f32 %v1965_v38  ;;  %2176 = vmatmul.mubr.bf16.gmra.mrb[128].mxu0 %v4079_v32  ;;  %2688 = vmatmul.mubr.bf16.gmra.mrb[128].mxu1 %v4080_v33  ;;  %v4099_v33 = vld [vmem:[%s7027_s0 + $0x244] ss:$8 sps:$4 sm:$0xff]  }
 0x126   :  { %v4302_v43 = vpop.eup %4301  ;;  %3209 = vst.msk [vmem:[%s7029_s3 + $0x40] sm:$0xff] %vm3200_vm1, %v4300_v42  ;;  %4313 = vtanh.f32 %v2477_v39  ;;  %3760 = vmatprep.mubr.msk.bf16.mxu0 %vm1502_vm0, %v4081_v36  ;;  %3824 = vmatprep.mubr.msk.bf16.mxu1 %vm1502_vm0, %v4083_v37 }
 0x127   :  { %v4304_v44 = vpop.eup %4303  ;;  %3337 = vst.msk [vmem:[%s7029_s3 + $0x440] sm:$0xff] %vm3200_vm1, %v4302_v43 }
 0x128   :  { %v4306_v45 = vpop.eup %4305  ;;  %3210 = vst.msk [vmem:[%s7029_s3 + $0x48] sm:$0xff] %vm3200_vm1, %v4304_v44  ;;  %v1969_v46 = vpop.f32.mrb[24].mxu0 }
 0x129   :  { %v2481_v47 = vpop.f32.mrb[24].mxu1  ;;  %3338 = vst.msk [vmem:[%s7029_s3 + $0x448] sm:$0xff] %vm3200_vm1, %v4306_v45  ;;  %v1970_v48 = vadd.f32 %v5217_v56, %v1969_v46  ;;  %v1971_v50 = vpop.f32.mrb[25].mxu0 }
 0x12a   :  { %v2482_v49 = vadd.f32 %v5217_v56, %v2481_v47  ;;  %v2483_v51 = vpop.f32.mrb[25].mxu1  ;;  %v1972_v54 = vpop.f32.mrb[26].mxu0  ;;  %v4104_v50 = vld [vmem:[%s7027_s0 + $0x640] ss:$8 sps:$4 sm:$0xff]  }
 0x12b   :  { %v2484_v55 = vpop.f32.mrb[26].mxu1  ;;  %4315 = vtanh.f32 %v1970_v48  ;;  %v1973_v59 = vadd.f32 %v5217_v56, %v1972_v54  ;;  %v1974_v61 = vpop.f32.mrb[27].mxu0  ;;  %v4107_v54 = vld [vmem:[%s7027_s0 + $0x654] ss:$8 sps:$4 sm:$0xff]  }
 0x12c   :  { %v2485_v60 = vadd.f32 %v5217_v56, %v2484_v55  ;;  %v2486_v62 = vpop.f32.mrb[27].mxu1  ;;  %4317 = vtanh.f32 %v2482_v49  ;;  %v4103_v49 = vld [vmem:[%s7027_s0 + $0x240] ss:$8 sps:$4 sm:$0xff]  }
 0x12d   :  { %v4308_v63 = vpop.eup %4307  ;;  %4319 = vtanh.f32 %v1973_v59  ;;  %2184 = vmatmul.mubr.bf16.gmra.mrb[132].mxu0 %v4085_v52  ;;  %2696 = vmatmul.mubr.bf16.gmra.mrb[132].mxu1 %v4086_v53  ;;  %v4105_v53 = vld [vmem:[%s7027_s0 + $0x254] ss:$8 sps:$4 sm:$0xff]  }
 0x12e   :  { %v4310_v0 = vpop.eup %4309  ;;  %3211 = vst.msk [vmem:[%s7029_s3 + $0x50] sm:$0xff] %vm3200_vm1, %v4308_v63  ;;  %4321 = vtanh.f32 %v2485_v60  ;;  %3761 = vmatprep.mubr.msk.bf16.mxu0 %vm1502_vm0, %v4087_v57  ;;  %3825 = vmatprep.mubr.msk.bf16.mxu1 %vm1502_vm0, %v4089_v58 }
 0x12f   :  { %v4312_v1 = vpop.eup %4311  ;;  %3339 = vst.msk [vmem:[%s7029_s3 + $0x450] sm:$0xff] %vm3200_vm1, %v4310_v0 }
 0x130   :  { %v4314_v2 = vpop.eup %4313  ;;  %3212 = vst.msk [vmem:[%s7029_s3 + $0x58] sm:$0xff] %vm3200_vm1, %v4312_v1  ;;  %v1977_v3 = vpop.f32.mrb[28].mxu0 }
 0x131   :  { %v2489_v4 = vpop.f32.mrb[28].mxu1  ;;  %3340 = vst.msk [vmem:[%s7029_s3 + $0x458] sm:$0xff] %vm3200_vm1, %v4314_v2  ;;  %v1978_v5 = vadd.f32 %v5217_v56, %v1977_v3  ;;  %v1979_v7 = vpop.f32.mrb[29].mxu0 }
 0x132   :  { %v2490_v6 = vadd.f32 %v5217_v56, %v2489_v4  ;;  %v2491_v8 = vpop.f32.mrb[29].mxu1  ;;  %v1980_v11 = vpop.f32.mrb[30].mxu0  ;;  %v4110_v7 = vld [vmem:[%s7027_s0 + $0x650] ss:$8 sps:$4 sm:$0xff]  }
 0x133   :  { %v2492_v12 = vpop.f32.mrb[30].mxu1  ;;  %4323 = vtanh.f32 %v1978_v5  ;;  %v1981_v15 = vadd.f32 %v5217_v56, %v1980_v11  ;;  %v1982_v17 = vpop.f32.mrb[31].mxu0  ;;  %v4113_v11 = vld [vmem:[%s7027_s0 + $0x664] ss:$8 sps:$4 sm:$0xff]  }
 0x134   :  { %v2493_v16 = vadd.f32 %v5217_v56, %v2492_v12  ;;  %v2494_v18 = vpop.f32.mrb[31].mxu1  ;;  %4325 = vtanh.f32 %v2490_v6  ;;  %v4109_v6 = vld [vmem:[%s7027_s0 + $0x250] ss:$8 sps:$4 sm:$0xff]  }
 0x135   :  { %v4316_v19 = vpop.eup %4315  ;;  %4327 = vtanh.f32 %v1981_v15  ;;  %2192 = vmatmul.mubr.bf16.gmra.mrb[136].mxu0 %v4091_v9  ;;  %2704 = vmatmul.mubr.bf16.gmra.mrb[136].mxu1 %v4092_v10  ;;  %v4111_v10 = vld [vmem:[%s7027_s0 + $0x264] ss:$8 sps:$4 sm:$0xff]  }
 0x136   :  { %v4318_v20 = vpop.eup %4317  ;;  %3213 = vst.msk [vmem:[%s7029_s3 + $0x60] sm:$0xff] %vm3200_vm1, %v4316_v19  ;;  %4329 = vtanh.f32 %v2493_v16  ;;  %3762 = vmatprep.mubr.msk.bf16.mxu0 %vm1502_vm0, %v4093_v13  ;;  %3826 = vmatprep.mubr.msk.bf16.mxu1 %vm1502_vm0, %v4095_v14 }
 0x137   :  { %v4320_v21 = vpop.eup %4319  ;;  %3341 = vst.msk [vmem:[%s7029_s3 + $0x460] sm:$0xff] %vm3200_vm1, %v4318_v20 }
 0x138   :  { %v4322_v22 = vpop.eup %4321  ;;  %3214 = vst.msk [vmem:[%s7029_s3 + $0x68] sm:$0xff] %vm3200_vm1, %v4320_v21  ;;  %v1985_v23 = vpop.f32.mrb[32].mxu0 }
 0x139   :  { %v2497_v24 = vpop.f32.mrb[32].mxu1  ;;  %3342 = vst.msk [vmem:[%s7029_s3 + $0x468] sm:$0xff] %vm3200_vm1, %v4322_v22  ;;  %v1986_v25 = vadd.f32 %v5217_v56, %v1985_v23  ;;  %v1987_v27 = vpop.f32.mrb[33].mxu0 }
 0x13a   :  { %v2498_v26 = vadd.f32 %v5217_v56, %v2497_v24  ;;  %v2499_v28 = vpop.f32.mrb[33].mxu1  ;;  %v1988_v31 = vpop.f32.mrb[34].mxu0  ;;  %v4116_v27 = vld [vmem:[%s7027_s0 + $0x660] ss:$8 sps:$4 sm:$0xff]  }
 0x13b   :  { %v2500_v32 = vpop.f32.mrb[34].mxu1  ;;  %4331 = vtanh.f32 %v1986_v25  ;;  %v1989_v35 = vadd.f32 %v5217_v56, %v1988_v31  ;;  %v1990_v37 = vpop.f32.mrb[35].mxu0  ;;  %v4119_v31 = vld [vmem:[%s7027_s0 + $0x674] ss:$8 sps:$4 sm:$0xff]  }
 0x13c   :  { %v2501_v36 = vadd.f32 %v5217_v56, %v2500_v32  ;;  %v2502_v38 = vpop.f32.mrb[35].mxu1  ;;  %4333 = vtanh.f32 %v2498_v26  ;;  %v4115_v26 = vld [vmem:[%s7027_s0 + $0x260] ss:$8 sps:$4 sm:$0xff]  }
 0x13d   :  { %v4324_v39 = vpop.eup %4323  ;;  %4335 = vtanh.f32 %v1989_v35  ;;  %2200 = vmatmul.mubr.bf16.gmra.mrb[140].mxu0 %v4097_v29  ;;  %2712 = vmatmul.mubr.bf16.gmra.mrb[140].mxu1 %v4098_v30  ;;  %v4117_v30 = vld [vmem:[%s7027_s0 + $0x274] ss:$8 sps:$4 sm:$0xff]  }
 0x13e   :  { %v4326_v40 = vpop.eup %4325  ;;  %3215 = vst.msk [vmem:[%s7029_s3 + $0x70] sm:$0xff] %vm3200_vm1, %v4324_v39  ;;  %4337 = vtanh.f32 %v2501_v36  ;;  %3763 = vmatprep.mubr.msk.bf16.mxu0 %vm1502_vm0, %v4099_v33  ;;  %3827 = vmatprep.mubr.msk.bf16.mxu1 %vm1502_vm0, %v4101_v34 }
 0x13f   :  { %v4328_v41 = vpop.eup %4327  ;;  %3343 = vst.msk [vmem:[%s7029_s3 + $0x470] sm:$0xff] %vm3200_vm1, %v4326_v40 }
 0x140   :  { %v4330_v42 = vpop.eup %4329  ;;  %3216 = vst.msk [vmem:[%s7029_s3 + $0x78] sm:$0xff] %vm3200_vm1, %v4328_v41  ;;  %v1993_v43 = vpop.f32.mrb[36].mxu0 }
 0x141   :  { %v2505_v44 = vpop.f32.mrb[36].mxu1  ;;  %3344 = vst.msk [vmem:[%s7029_s3 + $0x478] sm:$0xff] %vm3200_vm1, %v4330_v42  ;;  %v1994_v45 = vadd.f32 %v5217_v56, %v1993_v43  ;;  %v1995_v47 = vpop.f32.mrb[37].mxu0 }
 0x142   :  { %v2506_v46 = vadd.f32 %v5217_v56, %v2505_v44  ;;  %v2507_v48 = vpop.f32.mrb[37].mxu1  ;;  %v1996_v51 = vpop.f32.mrb[38].mxu0  ;;  %v4122_v47 = vld [vmem:[%s7027_s0 + $0x670] ss:$8 sps:$4 sm:$0xff]  }
 0x143   :  { %v2508_v52 = vpop.f32.mrb[38].mxu1  ;;  %4339 = vtanh.f32 %v1994_v45  ;;  %v1997_v55 = vadd.f32 %v5217_v56, %v1996_v51  ;;  %v1998_v58 = vpop.f32.mrb[39].mxu0  ;;  %v4125_v51 = vld [vmem:[%s7027_s0 + $0x684] ss:$8 sps:$4 sm:$0xff]  }
 0x144   :  { %v2509_v57 = vadd.f32 %v5217_v56, %v2508_v52  ;;  %v2510_v59 = vpop.f32.mrb[39].mxu1  ;;  %4341 = vtanh.f32 %v2506_v46  ;;  %v4121_v46 = vld [vmem:[%s7027_s0 + $0x270] ss:$8 sps:$4 sm:$0xff]  }
 0x145   :  { %v4332_v60 = vpop.eup %4331  ;;  %4343 = vtanh.f32 %v1997_v55  ;;  %2208 = vmatmul.mubr.bf16.gmra.mrb[144].mxu0 %v4103_v49  ;;  %2720 = vmatmul.mubr.bf16.gmra.mrb[144].mxu1 %v4104_v50  ;;  %v4123_v50 = vld [vmem:[%s7027_s0 + $0x284] ss:$8 sps:$4 sm:$0xff]  }
 0x146   :  { %v4334_v61 = vpop.eup %4333  ;;  %3217 = vst.msk [vmem:[%s7029_s3 + $0x80] sm:$0xff] %vm3200_vm1, %v4332_v60  ;;  %4345 = vtanh.f32 %v2509_v57  ;;  %3764 = vmatprep.mubr.msk.bf16.mxu0 %vm1502_vm0, %v4105_v53  ;;  %3828 = vmatprep.mubr.msk.bf16.mxu1 %vm1502_vm0, %v4107_v54 }
 0x147   :  { %v4336_v62 = vpop.eup %4335  ;;  %3345 = vst.msk [vmem:[%s7029_s3 + $0x480] sm:$0xff] %vm3200_vm1, %v4334_v61 }
 0x148   :  { %v4338_v63 = vpop.eup %4337  ;;  %3218 = vst.msk [vmem:[%s7029_s3 + $0x88] sm:$0xff] %vm3200_vm1, %v4336_v62  ;;  %v2001_v0 = vpop.f32.mrb[40].mxu0 }
 0x149   :  { %v2513_v1 = vpop.f32.mrb[40].mxu1  ;;  %3346 = vst.msk [vmem:[%s7029_s3 + $0x488] sm:$0xff] %vm3200_vm1, %v4338_v63  ;;  %v2002_v2 = vadd.f32 %v5217_v56, %v2001_v0  ;;  %v2003_v4 = vpop.f32.mrb[41].mxu0 }
 0x14a   :  { %v2514_v3 = vadd.f32 %v5217_v56, %v2513_v1  ;;  %v2515_v5 = vpop.f32.mrb[41].mxu1  ;;  %v2004_v8 = vpop.f32.mrb[42].mxu0  ;;  %v4128_v4 = vld [vmem:[%s7027_s0 + $0x680] ss:$8 sps:$4 sm:$0xff]  }
 0x14b   :  { %v2516_v9 = vpop.f32.mrb[42].mxu1  ;;  %4347 = vtanh.f32 %v2002_v2  ;;  %v2005_v12 = vadd.f32 %v5217_v56, %v2004_v8  ;;  %v2006_v14 = vpop.f32.mrb[43].mxu0  ;;  %v4131_v8 = vld [vmem:[%s7027_s0 + $0x694] ss:$8 sps:$4 sm:$0xff]  }
 0x14c   :  { %v2517_v13 = vadd.f32 %v5217_v56, %v2516_v9  ;;  %v2518_v15 = vpop.f32.mrb[43].mxu1  ;;  %4349 = vtanh.f32 %v2514_v3  ;;  %v4127_v3 = vld [vmem:[%s7027_s0 + $0x280] ss:$8 sps:$4 sm:$0xff]  }
 0x14d   :  { %v4340_v16 = vpop.eup %4339  ;;  %4351 = vtanh.f32 %v2005_v12  ;;  %2216 = vmatmul.mubr.bf16.gmra.mrb[148].mxu0 %v4109_v6  ;;  %2728 = vmatmul.mubr.bf16.gmra.mrb[148].mxu1 %v4110_v7  ;;  %v4129_v7 = vld [vmem:[%s7027_s0 + $0x294] ss:$8 sps:$4 sm:$0xff]  }
 0x14e   :  { %v4342_v17 = vpop.eup %4341  ;;  %3219 = vst.msk [vmem:[%s7029_s3 + $0x90] sm:$0xff] %vm3200_vm1, %v4340_v16  ;;  %4353 = vtanh.f32 %v2517_v13  ;;  %3765 = vmatprep.mubr.msk.bf16.mxu0 %vm1502_vm0, %v4111_v10  ;;  %3829 = vmatprep.mubr.msk.bf16.mxu1 %vm1502_vm0, %v4113_v11 }
 0x14f   :  { %v4344_v18 = vpop.eup %4343  ;;  %3347 = vst.msk [vmem:[%s7029_s3 + $0x490] sm:$0xff] %vm3200_vm1, %v4342_v17 }
 0x150   :  { %v4346_v19 = vpop.eup %4345  ;;  %3220 = vst.msk [vmem:[%s7029_s3 + $0x98] sm:$0xff] %vm3200_vm1, %v4344_v18  ;;  %v2009_v20 = vpop.f32.mrb[44].mxu0 }
 0x151   :  { %v2521_v21 = vpop.f32.mrb[44].mxu1  ;;  %3348 = vst.msk [vmem:[%s7029_s3 + $0x498] sm:$0xff] %vm3200_vm1, %v4346_v19  ;;  %v2010_v22 = vadd.f32 %v5217_v56, %v2009_v20  ;;  %v2011_v24 = vpop.f32.mrb[45].mxu0 }
 0x152   :  { %v2522_v23 = vadd.f32 %v5217_v56, %v2521_v21  ;;  %v2523_v25 = vpop.f32.mrb[45].mxu1  ;;  %v2012_v28 = vpop.f32.mrb[46].mxu0  ;;  %v4134_v24 = vld [vmem:[%s7027_s0 + $0x690] ss:$8 sps:$4 sm:$0xff]  }
 0x153   :  { %v2524_v29 = vpop.f32.mrb[46].mxu1  ;;  %4355 = vtanh.f32 %v2010_v22  ;;  %v2013_v32 = vadd.f32 %v5217_v56, %v2012_v28  ;;  %v2014_v34 = vpop.f32.mrb[47].mxu0  ;;  %v4137_v28 = vld [vmem:[%s7027_s0 + $0x6a4] ss:$8 sps:$4 sm:$0xff]  }
 0x154   :  { %v2525_v33 = vadd.f32 %v5217_v56, %v2524_v29  ;;  %v2526_v35 = vpop.f32.mrb[47].mxu1  ;;  %4357 = vtanh.f32 %v2522_v23  ;;  %v4133_v23 = vld [vmem:[%s7027_s0 + $0x290] ss:$8 sps:$4 sm:$0xff]  }
 0x155   :  { %v4348_v36 = vpop.eup %4347  ;;  %4359 = vtanh.f32 %v2013_v32  ;;  %2224 = vmatmul.mubr.bf16.gmra.mrb[152].mxu0 %v4115_v26  ;;  %2736 = vmatmul.mubr.bf16.gmra.mrb[152].mxu1 %v4116_v27  ;;  %v4135_v27 = vld [vmem:[%s7027_s0 + $0x2a4] ss:$8 sps:$4 sm:$0xff]  }
 0x156   :  { %v4350_v37 = vpop.eup %4349  ;;  %3221 = vst.msk [vmem:[%s7029_s3 + $0xa0] sm:$0xff] %vm3200_vm1, %v4348_v36  ;;  %4361 = vtanh.f32 %v2525_v33  ;;  %3766 = vmatprep.mubr.msk.bf16.mxu0 %vm1502_vm0, %v4117_v30  ;;  %3830 = vmatprep.mubr.msk.bf16.mxu1 %vm1502_vm0, %v4119_v31 }
 0x157   :  { %v4352_v38 = vpop.eup %4351  ;;  %3349 = vst.msk [vmem:[%s7029_s3 + $0x4a0] sm:$0xff] %vm3200_vm1, %v4350_v37 }
 0x158   :  { %v4354_v39 = vpop.eup %4353  ;;  %3222 = vst.msk [vmem:[%s7029_s3 + $0xa8] sm:$0xff] %vm3200_vm1, %v4352_v38  ;;  %v2017_v40 = vpop.f32.mrb[48].mxu0 }
 0x159   :  { %v2529_v41 = vpop.f32.mrb[48].mxu1  ;;  %3350 = vst.msk [vmem:[%s7029_s3 + $0x4a8] sm:$0xff] %vm3200_vm1, %v4354_v39  ;;  %v2018_v42 = vadd.f32 %v5217_v56, %v2017_v40  ;;  %v2019_v44 = vpop.f32.mrb[49].mxu0 }
 0x15a   :  { %v2530_v43 = vadd.f32 %v5217_v56, %v2529_v41  ;;  %v2531_v45 = vpop.f32.mrb[49].mxu1  ;;  %v2020_v48 = vpop.f32.mrb[50].mxu0  ;;  %v4140_v44 = vld [vmem:[%s7027_s0 + $0x6a0] ss:$8 sps:$4 sm:$0xff]  }
 0x15b   :  { %v2532_v49 = vpop.f32.mrb[50].mxu1  ;;  %4363 = vtanh.f32 %v2018_v42  ;;  %v2021_v52 = vadd.f32 %v5217_v56, %v2020_v48  ;;  %v2022_v54 = vpop.f32.mrb[51].mxu0  ;;  %v4143_v48 = vld [vmem:[%s7027_s0 + $0x6b4] ss:$8 sps:$4 sm:$0xff]  }
 0x15c   :  { %v2533_v53 = vadd.f32 %v5217_v56, %v2532_v49  ;;  %v2534_v55 = vpop.f32.mrb[51].mxu1  ;;  %4365 = vtanh.f32 %v2530_v43  ;;  %v4139_v43 = vld [vmem:[%s7027_s0 + $0x2a0] ss:$8 sps:$4 sm:$0xff]  }
 0x15d   :  { %v4356_v57 = vpop.eup %4355  ;;  %4367 = vtanh.f32 %v2021_v52  ;;  %2232 = vmatmul.mubr.bf16.gmra.mrb[156].mxu0 %v4121_v46  ;;  %2744 = vmatmul.mubr.bf16.gmra.mrb[156].mxu1 %v4122_v47  ;;  %v4141_v47 = vld [vmem:[%s7027_s0 + $0x2b4] ss:$8 sps:$4 sm:$0xff]  }
 0x15e   :  { %v4358_v58 = vpop.eup %4357  ;;  %3223 = vst.msk [vmem:[%s7029_s3 + $0xb0] sm:$0xff] %vm3200_vm1, %v4356_v57  ;;  %4369 = vtanh.f32 %v2533_v53  ;;  %3767 = vmatprep.mubr.msk.bf16.mxu0 %vm1502_vm0, %v4123_v50  ;;  %3831 = vmatprep.mubr.msk.bf16.mxu1 %vm1502_vm0, %v4125_v51 }
 0x15f   :  { %v4360_v59 = vpop.eup %4359  ;;  %3351 = vst.msk [vmem:[%s7029_s3 + $0x4b0] sm:$0xff] %vm3200_vm1, %v4358_v58 }
 0x160   :  { %v4362_v60 = vpop.eup %4361  ;;  %3224 = vst.msk [vmem:[%s7029_s3 + $0xb8] sm:$0xff] %vm3200_vm1, %v4360_v59  ;;  %v2025_v61 = vpop.f32.mrb[52].mxu0 }
 0x161   :  { %v2537_v62 = vpop.f32.mrb[52].mxu1  ;;  %3352 = vst.msk [vmem:[%s7029_s3 + $0x4b8] sm:$0xff] %vm3200_vm1, %v4362_v60  ;;  %v2026_v63 = vadd.f32 %v5217_v56, %v2025_v61  ;;  %v2027_v1 = vpop.f32.mrb[53].mxu0  ;;  %v5753_v61 = vld [vmem:[%s7028_s2] ss:$0 sm:$0xff] }
 0x162   :  { %v2538_v0 = vadd.f32 %v5217_v56, %v2537_v62  ;;  %v2539_v2 = vpop.f32.mrb[53].mxu1  ;;  %v2028_v5 = vpop.f32.mrb[54].mxu0  ;;  %v4145_v1 = vld [vmem:[%s7027_s0 + $0x2b0] ss:$8 sps:$4 sm:$0xff]  }
 0x163   :  { %v2540_v6 = vpop.f32.mrb[54].mxu1  ;;  %4371 = vtanh.f32 %v2026_v63  ;;  %v2029_v9 = vadd.f32 %v5217_v56, %v2028_v5  ;;  %v2030_v11 = vpop.f32.mrb[55].mxu0  ;;  %v4146_v2 = vld [vmem:[%s7027_s0 + $0x6b0] ss:$8 sps:$4 sm:$0xff]   ;;  %v4149_v5 = vld [vmem:[%s7027_s0 + $0x6c4] ss:$8 sps:$4 sm:$0xff]  }
 0x164   :  { %v2541_v10 = vadd.f32 %v5217_v56, %v2540_v6  ;;  %v2542_v12 = vpop.f32.mrb[55].mxu1  ;;  %4373 = vtanh.f32 %v2538_v0 }
 0x165   :  { %v4364_v13 = vpop.eup %4363  ;;  %4375 = vtanh.f32 %v2029_v9  ;;  %2240 = vmatmul.mubr.bf16.gmra.mrb[160].mxu0 %v4127_v3  ;;  %2752 = vmatmul.mubr.bf16.gmra.mrb[160].mxu1 %v4128_v4 }
 0x166   :  { %v4366_v14 = vpop.eup %4365  ;;  %3225 = vst.msk [vmem:[%s7029_s3 + $0xc0] sm:$0xff] %vm3200_vm1, %v4364_v13  ;;  %4377 = vtanh.f32 %v2541_v10  ;;  %3768 = vmatprep.mubr.msk.bf16.mxu0 %vm1502_vm0, %v4129_v7  ;;  %3832 = vmatprep.mubr.msk.bf16.mxu1 %vm1502_vm0, %v4131_v8 }
 0x167   :  { %v4368_v15 = vpop.eup %4367  ;;  %3353 = vst.msk [vmem:[%s7029_s3 + $0x4c0] sm:$0xff] %vm3200_vm1, %v4366_v14 }
 0x168   :  { %v4370_v16 = vpop.eup %4369  ;;  %3226 = vst.msk [vmem:[%s7029_s3 + $0xc8] sm:$0xff] %vm3200_vm1, %v4368_v15  ;;  %v2033_v17 = vpop.f32.mrb[56].mxu0 }
 0x169   :  { %v2545_v18 = vpop.f32.mrb[56].mxu1  ;;  %3354 = vst.msk [vmem:[%s7029_s3 + $0x4c8] sm:$0xff] %vm3200_vm1, %v4370_v16  ;;  %v2034_v19 = vadd.f32 %v5217_v56, %v2033_v17  ;;  %v2035_v21 = vpop.f32.mrb[57].mxu0 }
 0x16a   :  { %v2546_v20 = vadd.f32 %v5217_v56, %v2545_v18  ;;  %v2547_v22 = vpop.f32.mrb[57].mxu1  ;;  %v2036_v25 = vpop.f32.mrb[58].mxu0  ;;  %v4152_v21 = vld [vmem:[%s7027_s0 + $0x6c0] ss:$8 sps:$4 sm:$0xff]  }
 0x16b   :  { %v2548_v26 = vpop.f32.mrb[58].mxu1  ;;  %4379 = vtanh.f32 %v2034_v19  ;;  %v2037_v29 = vadd.f32 %v5217_v56, %v2036_v25  ;;  %v2038_v31 = vpop.f32.mrb[59].mxu0  ;;  %v4155_v25 = vld [vmem:[%s7027_s0 + $0x6d4] ss:$8 sps:$4 sm:$0xff]  }
 0x16c   :  { %v2549_v30 = vadd.f32 %v5217_v56, %v2548_v26  ;;  %v2550_v32 = vpop.f32.mrb[59].mxu1  ;;  %4381 = vtanh.f32 %v2546_v20  ;;  %v4151_v20 = vld [vmem:[%s7027_s0 + $0x2c0] ss:$8 sps:$4 sm:$0xff]  }
 0x16d   :  { %v4372_v33 = vpop.eup %4371  ;;  %4383 = vtanh.f32 %v2037_v29  ;;  %2248 = vmatmul.mubr.bf16.gmra.mrb[164].mxu0 %v4133_v23  ;;  %2760 = vmatmul.mubr.bf16.gmra.mrb[164].mxu1 %v4134_v24  ;;  %v4153_v24 = vld [vmem:[%s7027_s0 + $0x2d4] ss:$8 sps:$4 sm:$0xff]  }
 0x16e   :  { %v4374_v34 = vpop.eup %4373  ;;  %3227 = vst.msk [vmem:[%s7029_s3 + $0xd0] sm:$0xff] %vm3200_vm1, %v4372_v33  ;;  %4385 = vtanh.f32 %v2549_v30  ;;  %3769 = vmatprep.mubr.msk.bf16.mxu0 %vm1502_vm0, %v4135_v27  ;;  %3833 = vmatprep.mubr.msk.bf16.mxu1 %vm1502_vm0, %v4137_v28 }
 0x16f   :  { %v4376_v35 = vpop.eup %4375  ;;  %3355 = vst.msk [vmem:[%s7029_s3 + $0x4d0] sm:$0xff] %vm3200_vm1, %v4374_v34 }
 0x170   :  { %v4378_v36 = vpop.eup %4377  ;;  %3228 = vst.msk [vmem:[%s7029_s3 + $0xd8] sm:$0xff] %vm3200_vm1, %v4376_v35  ;;  %v2041_v37 = vpop.f32.mrb[60].mxu0 }
 0x171   :  { %v2553_v38 = vpop.f32.mrb[60].mxu1  ;;  %3356 = vst.msk [vmem:[%s7029_s3 + $0x4d8] sm:$0xff] %vm3200_vm1, %v4378_v36  ;;  %v2042_v39 = vadd.f32 %v5217_v56, %v2041_v37  ;;  %v2043_v41 = vpop.f32.mrb[61].mxu0 }
 0x172   :  { %v2554_v40 = vadd.f32 %v5217_v56, %v2553_v38  ;;  %v2555_v42 = vpop.f32.mrb[61].mxu1  ;;  %v2044_v45 = vpop.f32.mrb[62].mxu0  ;;  %v4158_v41 = vld [vmem:[%s7027_s0 + $0x6d0] ss:$8 sps:$4 sm:$0xff]  }
 0x173   :  { %v2556_v46 = vpop.f32.mrb[62].mxu1  ;;  %4387 = vtanh.f32 %v2042_v39  ;;  %v2045_v49 = vadd.f32 %v5217_v56, %v2044_v45  ;;  %v2046_v51 = vpop.f32.mrb[63].mxu0  ;;  %v4161_v45 = vld [vmem:[%s7027_s0 + $0x6e4] ss:$8 sps:$4 sm:$0xff]  }
 0x174   :  { %v2557_v50 = vadd.f32 %v5217_v56, %v2556_v46  ;;  %v2558_v52 = vpop.f32.mrb[63].mxu1  ;;  %4389 = vtanh.f32 %v2554_v40  ;;  %v4157_v40 = vld [vmem:[%s7027_s0 + $0x2d0] ss:$8 sps:$4 sm:$0xff]  }
 0x175   :  { %v4380_v53 = vpop.eup %4379  ;;  %4391 = vtanh.f32 %v2045_v49  ;;  %2256 = vmatmul.mubr.bf16.gmra.mrb[168].mxu0 %v4139_v43  ;;  %2768 = vmatmul.mubr.bf16.gmra.mrb[168].mxu1 %v4140_v44  ;;  %v4159_v44 = vld [vmem:[%s7027_s0 + $0x2e4] ss:$8 sps:$4 sm:$0xff]  }
 0x176   :  { %v4382_v54 = vpop.eup %4381  ;;  %3229 = vst.msk [vmem:[%s7029_s3 + $0xe0] sm:$0xff] %vm3200_vm1, %v4380_v53  ;;  %4393 = vtanh.f32 %v2557_v50  ;;  %3770 = vmatprep.mubr.msk.bf16.mxu0 %vm1502_vm0, %v4141_v47  ;;  %3834 = vmatprep.mubr.msk.bf16.mxu1 %vm1502_vm0, %v4143_v48 }
 0x177   :  { %v4384_v55 = vpop.eup %4383  ;;  %3357 = vst.msk [vmem:[%s7029_s3 + $0x4e0] sm:$0xff] %vm3200_vm1, %v4382_v54 }
 0x178   :  { %v4386_v57 = vpop.eup %4385  ;;  %3230 = vst.msk [vmem:[%s7029_s3 + $0xe8] sm:$0xff] %vm3200_vm1, %v4384_v55  ;;  %v2049_v58 = vpop.f32.mrb[64].mxu0 }
 0x179   :  { %v2561_v59 = vpop.f32.mrb[64].mxu1  ;;  %3358 = vst.msk [vmem:[%s7029_s3 + $0x4e8] sm:$0xff] %vm3200_vm1, %v4386_v57  ;;  %v2050_v60 = vadd.f32 %v5217_v56, %v2049_v58  ;;  %v2051_v63 = vpop.f32.mrb[65].mxu0  ;;  %v4147_v56 = vld [vmem:[%s7027_s0 + $0x2c4] ss:$8 sps:$4 sm:$0xff]  }
 0x17a   :  { %v2562_v62 = vadd.f32 %v5753_v61, %v2561_v59  ;;  %v2563_v0 = vpop.f32.mrb[65].mxu1  ;;  %v2052_v3 = vpop.f32.mrb[66].mxu0  ;;  %v4164_v63 = vld [vmem:[%s7027_s0 + $0x6e0] ss:$8 sps:$4 sm:$0xff]  }
 0x17b   :  { %v2564_v4 = vpop.f32.mrb[66].mxu1  ;;  %4395 = vtanh.f32 %v2050_v60  ;;  %v2053_v6 = vadd.f32 %v5753_v61, %v2052_v3  ;;  %v2054_v8 = vpop.f32.mrb[67].mxu0  ;;  %v4167_v3 = vld [vmem:[%s7027_s0 + $0x6f4] ss:$8 sps:$4 sm:$0xff]  }
 0x17c   :  { %v2565_v7 = vadd.f32 %v5753_v61, %v2564_v4  ;;  %v2566_v9 = vpop.f32.mrb[67].mxu1  ;;  %4397 = vtanh.f32 %v2562_v62  ;;  %v4163_v62 = vld [vmem:[%s7027_s0 + $0x2e0] ss:$8 sps:$4 sm:$0xff]  }
 0x17d   :  { %v4388_v10 = vpop.eup %4387  ;;  %4399 = vtanh.f32 %v2053_v6  ;;  %2264 = vmatmul.mubr.bf16.gmra.mrb[172].mxu0 %v4145_v1  ;;  %2776 = vmatmul.mubr.bf16.gmra.mrb[172].mxu1 %v4146_v2  ;;  %v4165_v2 = vld [vmem:[%s7027_s0 + $0x2f4] ss:$8 sps:$4 sm:$0xff]  }
 0x17e   :  { %v4390_v11 = vpop.eup %4389  ;;  %3231 = vst.msk [vmem:[%s7029_s3 + $0xf0] sm:$0xff] %vm3200_vm1, %v4388_v10  ;;  %4401 = vtanh.f32 %v2565_v7  ;;  %3771 = vmatprep.mubr.msk.bf16.mxu0 %vm1502_vm0, %v4147_v56  ;;  %3835 = vmatprep.mubr.msk.bf16.mxu1 %vm1502_vm0, %v4149_v5 }
 0x17f   :  { %v4392_v12 = vpop.eup %4391  ;;  %3359 = vst.msk [vmem:[%s7029_s3 + $0x4f0] sm:$0xff] %vm3200_vm1, %v4390_v11 }
 0x180   :  { %v4394_v13 = vpop.eup %4393  ;;  %3232 = vst.msk [vmem:[%s7029_s3 + $0xf8] sm:$0xff] %vm3200_vm1, %v4392_v12  ;;  %v2057_v14 = vpop.f32.mrb[68].mxu0 }
 0x181   :  { %v2569_v15 = vpop.f32.mrb[68].mxu1  ;;  %3360 = vst.msk [vmem:[%s7029_s3 + $0x4f8] sm:$0xff] %vm3200_vm1, %v4394_v13  ;;  %v2058_v16 = vadd.f32 %v5753_v61, %v2057_v14  ;;  %v2059_v18 = vpop.f32.mrb[69].mxu0 }
 0x182   :  { %v2570_v17 = vadd.f32 %v5753_v61, %v2569_v15  ;;  %v2571_v19 = vpop.f32.mrb[69].mxu1  ;;  %v2060_v22 = vpop.f32.mrb[70].mxu0  ;;  %v4170_v18 = vld [vmem:[%s7027_s0 + $0x6f0] ss:$8 sps:$4 sm:$0xff]  }
 0x183   :  { %v2572_v23 = vpop.f32.mrb[70].mxu1  ;;  %4403 = vtanh.f32 %v2058_v16  ;;  %v2061_v26 = vadd.f32 %v5753_v61, %v2060_v22  ;;  %v2062_v28 = vpop.f32.mrb[71].mxu0  ;;  %v4173_v22 = vld [vmem:[%s7027_s0 + $0x704] ss:$8 sps:$4 sm:$0xff]  }
 0x184   :  { %v2573_v27 = vadd.f32 %v5753_v61, %v2572_v23  ;;  %v2574_v29 = vpop.f32.mrb[71].mxu1  ;;  %4405 = vtanh.f32 %v2570_v17  ;;  %v4169_v17 = vld [vmem:[%s7027_s0 + $0x2f0] ss:$8 sps:$4 sm:$0xff]  }
 0x185   :  { %v4396_v30 = vpop.eup %4395  ;;  %4407 = vtanh.f32 %v2061_v26  ;;  %2272 = vmatmul.mubr.bf16.gmra.mrb[176].mxu0 %v4151_v20  ;;  %2784 = vmatmul.mubr.bf16.gmra.mrb[176].mxu1 %v4152_v21  ;;  %v4171_v21 = vld [vmem:[%s7027_s0 + $0x304] ss:$8 sps:$4 sm:$0xff]  }
 0x186   :  { %v4398_v31 = vpop.eup %4397  ;;  %3233 = vst.msk [vmem:[%s7029_s3 + $0x100] sm:$0xff] %vm3200_vm1, %v4396_v30  ;;  %4409 = vtanh.f32 %v2573_v27  ;;  %3772 = vmatprep.mubr.msk.bf16.mxu0 %vm1502_vm0, %v4153_v24  ;;  %3836 = vmatprep.mubr.msk.bf16.mxu1 %vm1502_vm0, %v4155_v25 }
 0x187   :  { %v4400_v32 = vpop.eup %4399  ;;  %3361 = vst.msk [vmem:[%s7029_s3 + $0x500] sm:$0xff] %vm3200_vm1, %v4398_v31 }
 0x188   :  { %v4402_v33 = vpop.eup %4401  ;;  %3234 = vst.msk [vmem:[%s7029_s3 + $0x108] sm:$0xff] %vm3200_vm1, %v4400_v32  ;;  %v2065_v34 = vpop.f32.mrb[72].mxu0 }
 0x189   :  { %v2577_v35 = vpop.f32.mrb[72].mxu1  ;;  %3362 = vst.msk [vmem:[%s7029_s3 + $0x508] sm:$0xff] %vm3200_vm1, %v4402_v33  ;;  %v2066_v36 = vadd.f32 %v5753_v61, %v2065_v34  ;;  %v2067_v38 = vpop.f32.mrb[73].mxu0 }
 0x18a   :  { %v2578_v37 = vadd.f32 %v5753_v61, %v2577_v35  ;;  %v2579_v39 = vpop.f32.mrb[73].mxu1  ;;  %v2068_v42 = vpop.f32.mrb[74].mxu0  ;;  %v4176_v38 = vld [vmem:[%s7027_s0 + $0x700] ss:$8 sps:$4 sm:$0xff]  }
 0x18b   :  { %v2580_v43 = vpop.f32.mrb[74].mxu1  ;;  %4411 = vtanh.f32 %v2066_v36  ;;  %v2069_v46 = vadd.f32 %v5753_v61, %v2068_v42  ;;  %v2070_v48 = vpop.f32.mrb[75].mxu0  ;;  %v4179_v42 = vld [vmem:[%s7027_s0 + $0x714] ss:$8 sps:$4 sm:$0xff]  }
 0x18c   :  { %v2581_v47 = vadd.f32 %v5753_v61, %v2580_v43  ;;  %v2582_v49 = vpop.f32.mrb[75].mxu1  ;;  %4413 = vtanh.f32 %v2578_v37  ;;  %v4175_v37 = vld [vmem:[%s7027_s0 + $0x300] ss:$8 sps:$4 sm:$0xff]  }
 0x18d   :  { %v4404_v50 = vpop.eup %4403  ;;  %4415 = vtanh.f32 %v2069_v46  ;;  %2280 = vmatmul.mubr.bf16.gmra.mrb[180].mxu0 %v4157_v40  ;;  %2792 = vmatmul.mubr.bf16.gmra.mrb[180].mxu1 %v4158_v41  ;;  %v4177_v41 = vld [vmem:[%s7027_s0 + $0x314] ss:$8 sps:$4 sm:$0xff]  }
 0x18e   :  { %v4406_v51 = vpop.eup %4405  ;;  %3235 = vst.msk [vmem:[%s7029_s3 + $0x110] sm:$0xff] %vm3200_vm1, %v4404_v50  ;;  %4417 = vtanh.f32 %v2581_v47  ;;  %3773 = vmatprep.mubr.msk.bf16.mxu0 %vm1502_vm0, %v4159_v44  ;;  %3837 = vmatprep.mubr.msk.bf16.mxu1 %vm1502_vm0, %v4161_v45 }
 0x18f   :  { %v4408_v52 = vpop.eup %4407  ;;  %3363 = vst.msk [vmem:[%s7029_s3 + $0x510] sm:$0xff] %vm3200_vm1, %v4406_v51 }
 0x190   :  { %v4410_v53 = vpop.eup %4409  ;;  %3236 = vst.msk [vmem:[%s7029_s3 + $0x118] sm:$0xff] %vm3200_vm1, %v4408_v52  ;;  %v2073_v54 = vpop.f32.mrb[76].mxu0 }
 0x191   :  { %v2585_v55 = vpop.f32.mrb[76].mxu1  ;;  %3364 = vst.msk [vmem:[%s7029_s3 + $0x518] sm:$0xff] %vm3200_vm1, %v4410_v53  ;;  %v2074_v57 = vadd.f32 %v5753_v61, %v2073_v54  ;;  %v2075_v59 = vpop.f32.mrb[77].mxu0 }
 0x192   :  { %v2586_v58 = vadd.f32 %v5753_v61, %v2585_v55  ;;  %v2587_v60 = vpop.f32.mrb[77].mxu1  ;;  %v2076_v0 = vpop.f32.mrb[78].mxu0  ;;  %v4182_v59 = vld [vmem:[%s7027_s0 + $0x710] ss:$8 sps:$4 sm:$0xff]  }
 0x193   :  { %v2588_v1 = vpop.f32.mrb[78].mxu1  ;;  %4419 = vtanh.f32 %v2074_v57  ;;  %v2077_v4 = vadd.f32 %v5753_v61, %v2076_v0  ;;  %v2078_v5 = vpop.f32.mrb[79].mxu0  ;;  %v4185_v0 = vld [vmem:[%s7027_s0 + $0x724] ss:$8 sps:$4 sm:$0xff]  }
 0x194   :  { %v2589_v56 = vadd.f32 %v5753_v61, %v2588_v1  ;;  %v2590_v6 = vpop.f32.mrb[79].mxu1  ;;  %4421 = vtanh.f32 %v2586_v58  ;;  %v4181_v58 = vld [vmem:[%s7027_s0 + $0x310] ss:$8 sps:$4 sm:$0xff]  }
 0x195   :  { %v4412_v7 = vpop.eup %4411  ;;  %4423 = vtanh.f32 %v2077_v4  ;;  %2288 = vmatmul.mubr.bf16.gmra.mrb[184].mxu0 %v4163_v62  ;;  %2800 = vmatmul.mubr.bf16.gmra.mrb[184].mxu1 %v4164_v63  ;;  %v4183_v63 = vld [vmem:[%s7027_s0 + $0x324] ss:$8 sps:$4 sm:$0xff]  }
 0x196   :  { %v4414_v8 = vpop.eup %4413  ;;  %3237 = vst.msk [vmem:[%s7029_s3 + $0x120] sm:$0xff] %vm3200_vm1, %v4412_v7  ;;  %4425 = vtanh.f32 %v2589_v56  ;;  %3774 = vmatprep.mubr.msk.bf16.mxu0 %vm1502_vm0, %v4165_v2  ;;  %3838 = vmatprep.mubr.msk.bf16.mxu1 %vm1502_vm0, %v4167_v3 }
 0x197   :  { %v4416_v9 = vpop.eup %4415  ;;  %3365 = vst.msk [vmem:[%s7029_s3 + $0x520] sm:$0xff] %vm3200_vm1, %v4414_v8 }
 0x198   :  { %v4418_v10 = vpop.eup %4417  ;;  %3238 = vst.msk [vmem:[%s7029_s3 + $0x128] sm:$0xff] %vm3200_vm1, %v4416_v9  ;;  %v2081_v11 = vpop.f32.mrb[80].mxu0 }
 0x199   :  { %v2593_v12 = vpop.f32.mrb[80].mxu1  ;;  %3366 = vst.msk [vmem:[%s7029_s3 + $0x528] sm:$0xff] %vm3200_vm1, %v4418_v10  ;;  %v2082_v13 = vadd.f32 %v5753_v61, %v2081_v11  ;;  %v2083_v15 = vpop.f32.mrb[81].mxu0 }
 0x19a   :  { %v2594_v14 = vadd.f32 %v5753_v61, %v2593_v12  ;;  %v2595_v16 = vpop.f32.mrb[81].mxu1  ;;  %v2084_v19 = vpop.f32.mrb[82].mxu0  ;;  %v4188_v15 = vld [vmem:[%s7027_s0 + $0x720] ss:$8 sps:$4 sm:$0xff]  }
 0x19b   :  { %v2596_v20 = vpop.f32.mrb[82].mxu1  ;;  %4427 = vtanh.f32 %v2082_v13  ;;  %v2085_v23 = vadd.f32 %v5753_v61, %v2084_v19  ;;  %v2086_v25 = vpop.f32.mrb[83].mxu0  ;;  %v4191_v19 = vld [vmem:[%s7027_s0 + $0x734] ss:$8 sps:$4 sm:$0xff]  }
 0x19c   :  { %v2597_v24 = vadd.f32 %v5753_v61, %v2596_v20  ;;  %v2598_v26 = vpop.f32.mrb[83].mxu1  ;;  %4429 = vtanh.f32 %v2594_v14  ;;  %v4187_v14 = vld [vmem:[%s7027_s0 + $0x320] ss:$8 sps:$4 sm:$0xff]  }
 0x19d   :  { %v4420_v27 = vpop.eup %4419  ;;  %4431 = vtanh.f32 %v2085_v23  ;;  %2296 = vmatmul.mubr.bf16.gmra.mrb[188].mxu0 %v4169_v17  ;;  %2808 = vmatmul.mubr.bf16.gmra.mrb[188].mxu1 %v4170_v18  ;;  %v4189_v18 = vld [vmem:[%s7027_s0 + $0x334] ss:$8 sps:$4 sm:$0xff]  }
 0x19e   :  { %v4422_v28 = vpop.eup %4421  ;;  %3239 = vst.msk [vmem:[%s7029_s3 + $0x130] sm:$0xff] %vm3200_vm1, %v4420_v27  ;;  %4433 = vtanh.f32 %v2597_v24  ;;  %3775 = vmatprep.mubr.msk.bf16.mxu0 %vm1502_vm0, %v4171_v21  ;;  %3839 = vmatprep.mubr.msk.bf16.mxu1 %vm1502_vm0, %v4173_v22 }
 0x19f   :  { %v4424_v29 = vpop.eup %4423  ;;  %3367 = vst.msk [vmem:[%s7029_s3 + $0x530] sm:$0xff] %vm3200_vm1, %v4422_v28 }
 0x1a0   :  { %v4426_v30 = vpop.eup %4425  ;;  %3240 = vst.msk [vmem:[%s7029_s3 + $0x138] sm:$0xff] %vm3200_vm1, %v4424_v29  ;;  %v2089_v31 = vpop.f32.mrb[84].mxu0 }
 0x1a1   :  { %v2601_v32 = vpop.f32.mrb[84].mxu1  ;;  %3368 = vst.msk [vmem:[%s7029_s3 + $0x538] sm:$0xff] %vm3200_vm1, %v4426_v30  ;;  %v2090_v33 = vadd.f32 %v5753_v61, %v2089_v31  ;;  %v2091_v35 = vpop.f32.mrb[85].mxu0 }
 0x1a2   :  { %v2602_v34 = vadd.f32 %v5753_v61, %v2601_v32  ;;  %v2603_v36 = vpop.f32.mrb[85].mxu1  ;;  %v2092_v39 = vpop.f32.mrb[86].mxu0  ;;  %v4194_v35 = vld [vmem:[%s7027_s0 + $0x730] ss:$8 sps:$4 sm:$0xff]  }
 0x1a3   :  { %v2604_v40 = vpop.f32.mrb[86].mxu1  ;;  %4435 = vtanh.f32 %v2090_v33  ;;  %v2093_v43 = vadd.f32 %v5753_v61, %v2092_v39  ;;  %v2094_v45 = vpop.f32.mrb[87].mxu0  ;;  %v4197_v39 = vld [vmem:[%s7027_s0 + $0x744] ss:$8 sps:$4 sm:$0xff]  }
 0x1a4   :  { %v2605_v44 = vadd.f32 %v5753_v61, %v2604_v40  ;;  %v2606_v46 = vpop.f32.mrb[87].mxu1  ;;  %4437 = vtanh.f32 %v2602_v34  ;;  %v4193_v34 = vld [vmem:[%s7027_s0 + $0x330] ss:$8 sps:$4 sm:$0xff]  }
 0x1a5   :  { %v4428_v47 = vpop.eup %4427  ;;  %4439 = vtanh.f32 %v2093_v43  ;;  %2304 = vmatmul.mubr.bf16.gmra.mrb[192].mxu0 %v4175_v37  ;;  %2816 = vmatmul.mubr.bf16.gmra.mrb[192].mxu1 %v4176_v38  ;;  %v4195_v38 = vld [vmem:[%s7027_s0 + $0x344] ss:$8 sps:$4 sm:$0xff]  }
 0x1a6   :  { %v4430_v48 = vpop.eup %4429  ;;  %3241 = vst.msk [vmem:[%s7029_s3 + $0x140] sm:$0xff] %vm3200_vm1, %v4428_v47  ;;  %4441 = vtanh.f32 %v2605_v44  ;;  %3776 = vmatprep.mubr.msk.bf16.mxu0 %vm1502_vm0, %v4177_v41  ;;  %3840 = vmatprep.mubr.msk.bf16.mxu1 %vm1502_vm0, %v4179_v42 }
 0x1a7   :  { %v4432_v49 = vpop.eup %4431  ;;  %3369 = vst.msk [vmem:[%s7029_s3 + $0x540] sm:$0xff] %vm3200_vm1, %v4430_v48 }
 0x1a8   :  { %v4434_v50 = vpop.eup %4433  ;;  %3242 = vst.msk [vmem:[%s7029_s3 + $0x148] sm:$0xff] %vm3200_vm1, %v4432_v49  ;;  %v2097_v51 = vpop.f32.mrb[88].mxu0 }
 0x1a9   :  { %v2609_v52 = vpop.f32.mrb[88].mxu1  ;;  %3370 = vst.msk [vmem:[%s7029_s3 + $0x548] sm:$0xff] %vm3200_vm1, %v4434_v50  ;;  %v2098_v53 = vadd.f32 %v5753_v61, %v2097_v51  ;;  %v2099_v55 = vpop.f32.mrb[89].mxu0 }
 0x1aa   :  { %v2610_v54 = vadd.f32 %v5753_v61, %v2609_v52  ;;  %v2611_v57 = vpop.f32.mrb[89].mxu1  ;;  %v2100_v60 = vpop.f32.mrb[90].mxu0  ;;  %v4200_v55 = vld [vmem:[%s7027_s0 + $0x740] ss:$8 sps:$4 sm:$0xff]  }
 0x1ab   :  { %v2612_v62 = vpop.f32.mrb[90].mxu1  ;;  %4443 = vtanh.f32 %v2098_v53  ;;  %v2101_v1 = vadd.f32 %v5753_v61, %v2100_v60  ;;  %v2102_v3 = vpop.f32.mrb[91].mxu0  ;;  %v4203_v60 = vld [vmem:[%s7027_s0 + $0x754] ss:$8 sps:$4 sm:$0xff]  }
 0x1ac   :  { %v2613_v2 = vadd.f32 %v5753_v61, %v2612_v62  ;;  %v2614_v4 = vpop.f32.mrb[91].mxu1  ;;  %4445 = vtanh.f32 %v2610_v54  ;;  %v4199_v54 = vld [vmem:[%s7027_s0 + $0x340] ss:$8 sps:$4 sm:$0xff]  }
 0x1ad   :  { %v4436_v56 = vpop.eup %4435  ;;  %4447 = vtanh.f32 %v2101_v1  ;;  %2312 = vmatmul.mubr.bf16.gmra.mrb[196].mxu0 %v4181_v58  ;;  %2824 = vmatmul.mubr.bf16.gmra.mrb[196].mxu1 %v4182_v59  ;;  %v4201_v59 = vld [vmem:[%s7027_s0 + $0x354] ss:$8 sps:$4 sm:$0xff]  }
 0x1ae   :  { %v4438_v5 = vpop.eup %4437  ;;  %3243 = vst.msk [vmem:[%s7029_s3 + $0x150] sm:$0xff] %vm3200_vm1, %v4436_v56  ;;  %4449 = vtanh.f32 %v2613_v2  ;;  %3777 = vmatprep.mubr.msk.bf16.mxu0 %vm1502_vm0, %v4183_v63  ;;  %3841 = vmatprep.mubr.msk.bf16.mxu1 %vm1502_vm0, %v4185_v0 }
 0x1af   :  { %v4440_v6 = vpop.eup %4439  ;;  %3371 = vst.msk [vmem:[%s7029_s3 + $0x550] sm:$0xff] %vm3200_vm1, %v4438_v5 }
 0x1b0   :  { %v4442_v7 = vpop.eup %4441  ;;  %3244 = vst.msk [vmem:[%s7029_s3 + $0x158] sm:$0xff] %vm3200_vm1, %v4440_v6  ;;  %v2105_v8 = vpop.f32.mrb[92].mxu0 }
 0x1b1   :  { %v2617_v9 = vpop.f32.mrb[92].mxu1  ;;  %3372 = vst.msk [vmem:[%s7029_s3 + $0x558] sm:$0xff] %vm3200_vm1, %v4442_v7  ;;  %v2106_v10 = vadd.f32 %v5753_v61, %v2105_v8  ;;  %v2107_v12 = vpop.f32.mrb[93].mxu0 }
 0x1b2   :  { %v2618_v11 = vadd.f32 %v5753_v61, %v2617_v9  ;;  %v2619_v13 = vpop.f32.mrb[93].mxu1  ;;  %v2108_v16 = vpop.f32.mrb[94].mxu0  ;;  %v4206_v12 = vld [vmem:[%s7027_s0 + $0x750] ss:$8 sps:$4 sm:$0xff]  }
 0x1b3   :  { %v2620_v17 = vpop.f32.mrb[94].mxu1  ;;  %4451 = vtanh.f32 %v2106_v10  ;;  %v2109_v20 = vadd.f32 %v5753_v61, %v2108_v16  ;;  %v2110_v22 = vpop.f32.mrb[95].mxu0  ;;  %v4209_v16 = vld [vmem:[%s7027_s0 + $0x764] ss:$8 sps:$4 sm:$0xff]  }
 0x1b4   :  { %v2621_v21 = vadd.f32 %v5753_v61, %v2620_v17  ;;  %v2622_v23 = vpop.f32.mrb[95].mxu1  ;;  %4453 = vtanh.f32 %v2618_v11  ;;  %v4205_v11 = vld [vmem:[%s7027_s0 + $0x350] ss:$8 sps:$4 sm:$0xff]  }
 0x1b5   :  { %v4444_v24 = vpop.eup %4443  ;;  %4455 = vtanh.f32 %v2109_v20  ;;  %2320 = vmatmul.mubr.bf16.gmra.mrb[200].mxu0 %v4187_v14  ;;  %2832 = vmatmul.mubr.bf16.gmra.mrb[200].mxu1 %v4188_v15  ;;  %v4207_v15 = vld [vmem:[%s7027_s0 + $0x364] ss:$8 sps:$4 sm:$0xff]  }
 0x1b6   :  { %v4446_v25 = vpop.eup %4445  ;;  %3245 = vst.msk [vmem:[%s7029_s3 + $0x160] sm:$0xff] %vm3200_vm1, %v4444_v24  ;;  %4457 = vtanh.f32 %v2621_v21  ;;  %3778 = vmatprep.mubr.msk.bf16.mxu0 %vm1502_vm0, %v4189_v18  ;;  %3842 = vmatprep.mubr.msk.bf16.mxu1 %vm1502_vm0, %v4191_v19 }
 0x1b7   :  { %v4448_v26 = vpop.eup %4447  ;;  %3373 = vst.msk [vmem:[%s7029_s3 + $0x560] sm:$0xff] %vm3200_vm1, %v4446_v25 }
 0x1b8   :  { %v4450_v27 = vpop.eup %4449  ;;  %3246 = vst.msk [vmem:[%s7029_s3 + $0x168] sm:$0xff] %vm3200_vm1, %v4448_v26  ;;  %v2113_v28 = vpop.f32.mrb[96].mxu0 }
 0x1b9   :  { %v2625_v29 = vpop.f32.mrb[96].mxu1  ;;  %3374 = vst.msk [vmem:[%s7029_s3 + $0x568] sm:$0xff] %vm3200_vm1, %v4450_v27  ;;  %v2114_v30 = vadd.f32 %v5753_v61, %v2113_v28  ;;  %v2115_v32 = vpop.f32.mrb[97].mxu0 }
 0x1ba   :  { %v2626_v31 = vadd.f32 %v5753_v61, %v2625_v29  ;;  %v2627_v33 = vpop.f32.mrb[97].mxu1  ;;  %v2116_v36 = vpop.f32.mrb[98].mxu0  ;;  %v4212_v32 = vld [vmem:[%s7027_s0 + $0x760] ss:$8 sps:$4 sm:$0xff]  }
 0x1bb   :  { %v2628_v37 = vpop.f32.mrb[98].mxu1  ;;  %4459 = vtanh.f32 %v2114_v30  ;;  %v2117_v40 = vadd.f32 %v5753_v61, %v2116_v36  ;;  %v2118_v42 = vpop.f32.mrb[99].mxu0  ;;  %v4215_v36 = vld [vmem:[%s7027_s0 + $0x774] ss:$8 sps:$4 sm:$0xff]  }
 0x1bc   :  { %v2629_v41 = vadd.f32 %v5753_v61, %v2628_v37  ;;  %v2630_v43 = vpop.f32.mrb[99].mxu1  ;;  %4461 = vtanh.f32 %v2626_v31  ;;  %v4211_v31 = vld [vmem:[%s7027_s0 + $0x360] ss:$8 sps:$4 sm:$0xff]  }
 0x1bd   :  { %v4452_v44 = vpop.eup %4451  ;;  %4463 = vtanh.f32 %v2117_v40  ;;  %2328 = vmatmul.mubr.bf16.gmra.mrb[204].mxu0 %v4193_v34  ;;  %2840 = vmatmul.mubr.bf16.gmra.mrb[204].mxu1 %v4194_v35  ;;  %v4213_v35 = vld [vmem:[%s7027_s0 + $0x374] ss:$8 sps:$4 sm:$0xff]  }
 0x1be   :  { %v4454_v45 = vpop.eup %4453  ;;  %3247 = vst.msk [vmem:[%s7029_s3 + $0x170] sm:$0xff] %vm3200_vm1, %v4452_v44  ;;  %4465 = vtanh.f32 %v2629_v41  ;;  %3779 = vmatprep.mubr.msk.bf16.mxu0 %vm1502_vm0, %v4195_v38  ;;  %3843 = vmatprep.mubr.msk.bf16.mxu1 %vm1502_vm0, %v4197_v39 }
 0x1bf   :  { %v4456_v46 = vpop.eup %4455  ;;  %3375 = vst.msk [vmem:[%s7029_s3 + $0x570] sm:$0xff] %vm3200_vm1, %v4454_v45 }
 0x1c0   :  { %v4458_v47 = vpop.eup %4457  ;;  %3248 = vst.msk [vmem:[%s7029_s3 + $0x178] sm:$0xff] %vm3200_vm1, %v4456_v46  ;;  %v2121_v48 = vpop.f32.mrb[100].mxu0 }
 0x1c1   :  { %v2633_v49 = vpop.f32.mrb[100].mxu1  ;;  %3376 = vst.msk [vmem:[%s7029_s3 + $0x578] sm:$0xff] %vm3200_vm1, %v4458_v47  ;;  %v2122_v50 = vadd.f32 %v5753_v61, %v2121_v48  ;;  %v2123_v52 = vpop.f32.mrb[101].mxu0 }
 0x1c2   :  { %v2634_v51 = vadd.f32 %v5753_v61, %v2633_v49  ;;  %v2635_v53 = vpop.f32.mrb[101].mxu1  ;;  %v2124_v57 = vpop.f32.mrb[102].mxu0  ;;  %v4218_v52 = vld [vmem:[%s7027_s0 + $0x770] ss:$8 sps:$4 sm:$0xff]  }
 0x1c3   :  { %v2636_v58 = vpop.f32.mrb[102].mxu1  ;;  %4467 = vtanh.f32 %v2122_v50  ;;  %v2125_v62 = vadd.f32 %v5753_v61, %v2124_v57  ;;  %v2126_v0 = vpop.f32.mrb[103].mxu0  ;;  %v4221_v57 = vld [vmem:[%s7027_s0 + $0x784] ss:$8 sps:$4 sm:$0xff]  }
 0x1c4   :  { %v2637_v63 = vadd.f32 %v5753_v61, %v2636_v58  ;;  %v2638_v1 = vpop.f32.mrb[103].mxu1  ;;  %4469 = vtanh.f32 %v2634_v51  ;;  %v4217_v51 = vld [vmem:[%s7027_s0 + $0x370] ss:$8 sps:$4 sm:$0xff]  }
 0x1c5   :  { %v4460_v2 = vpop.eup %4459  ;;  %4471 = vtanh.f32 %v2125_v62  ;;  %2336 = vmatmul.mubr.bf16.gmra.mrb[208].mxu0 %v4199_v54  ;;  %2848 = vmatmul.mubr.bf16.gmra.mrb[208].mxu1 %v4200_v55  ;;  %v4219_v55 = vld [vmem:[%s7027_s0 + $0x384] ss:$8 sps:$4 sm:$0xff]  }
 0x1c6   :  { %v4462_v3 = vpop.eup %4461  ;;  %3249 = vst.msk [vmem:[%s7029_s3 + $0x180] sm:$0xff] %vm3200_vm1, %v4460_v2  ;;  %4473 = vtanh.f32 %v2637_v63  ;;  %3780 = vmatprep.mubr.msk.bf16.mxu0 %vm1502_vm0, %v4201_v59  ;;  %3844 = vmatprep.mubr.msk.bf16.mxu1 %vm1502_vm0, %v4203_v60 }
 0x1c7   :  { %v4464_v4 = vpop.eup %4463  ;;  %3377 = vst.msk [vmem:[%s7029_s3 + $0x580] sm:$0xff] %vm3200_vm1, %v4462_v3 }
 0x1c8   :  { %v4466_v56 = vpop.eup %4465  ;;  %3250 = vst.msk [vmem:[%s7029_s3 + $0x188] sm:$0xff] %vm3200_vm1, %v4464_v4  ;;  %v2129_v5 = vpop.f32.mrb[104].mxu0 }
 0x1c9   :  { %v2641_v6 = vpop.f32.mrb[104].mxu1  ;;  %3378 = vst.msk [vmem:[%s7029_s3 + $0x588] sm:$0xff] %vm3200_vm1, %v4466_v56  ;;  %v2130_v7 = vadd.f32 %v5753_v61, %v2129_v5  ;;  %v2131_v9 = vpop.f32.mrb[105].mxu0 }
 0x1ca   :  { %v2642_v8 = vadd.f32 %v5753_v61, %v2641_v6  ;;  %v2643_v10 = vpop.f32.mrb[105].mxu1  ;;  %v2132_v13 = vpop.f32.mrb[106].mxu0  ;;  %v4224_v9 = vld [vmem:[%s7027_s0 + $0x780] ss:$8 sps:$4 sm:$0xff]  }
 0x1cb   :  { %v2644_v14 = vpop.f32.mrb[106].mxu1  ;;  %4475 = vtanh.f32 %v2130_v7  ;;  %v2133_v17 = vadd.f32 %v5753_v61, %v2132_v13  ;;  %v2134_v19 = vpop.f32.mrb[107].mxu0  ;;  %v4227_v13 = vld [vmem:[%s7027_s0 + $0x794] ss:$8 sps:$4 sm:$0xff]  }
 0x1cc   :  { %v2645_v18 = vadd.f32 %v5753_v61, %v2644_v14  ;;  %v2646_v20 = vpop.f32.mrb[107].mxu1  ;;  %4477 = vtanh.f32 %v2642_v8  ;;  %v4223_v8 = vld [vmem:[%s7027_s0 + $0x380] ss:$8 sps:$4 sm:$0xff]  }
 0x1cd   :  { %v4468_v21 = vpop.eup %4467  ;;  %4479 = vtanh.f32 %v2133_v17  ;;  %2344 = vmatmul.mubr.bf16.gmra.mrb[212].mxu0 %v4205_v11  ;;  %2856 = vmatmul.mubr.bf16.gmra.mrb[212].mxu1 %v4206_v12  ;;  %v4225_v12 = vld [vmem:[%s7027_s0 + $0x394] ss:$8 sps:$4 sm:$0xff]  }
 0x1ce   :  { %v4470_v22 = vpop.eup %4469  ;;  %3251 = vst.msk [vmem:[%s7029_s3 + $0x190] sm:$0xff] %vm3200_vm1, %v4468_v21  ;;  %4481 = vtanh.f32 %v2645_v18  ;;  %3781 = vmatprep.mubr.msk.bf16.mxu0 %vm1502_vm0, %v4207_v15  ;;  %3845 = vmatprep.mubr.msk.bf16.mxu1 %vm1502_vm0, %v4209_v16 }
 0x1cf   :  { %v4472_v23 = vpop.eup %4471  ;;  %3379 = vst.msk [vmem:[%s7029_s3 + $0x590] sm:$0xff] %vm3200_vm1, %v4470_v22 }
 0x1d0   :  { %v4474_v24 = vpop.eup %4473  ;;  %3252 = vst.msk [vmem:[%s7029_s3 + $0x198] sm:$0xff] %vm3200_vm1, %v4472_v23  ;;  %v2137_v25 = vpop.f32.mrb[108].mxu0 }
 0x1d1   :  { %v2649_v26 = vpop.f32.mrb[108].mxu1  ;;  %3380 = vst.msk [vmem:[%s7029_s3 + $0x598] sm:$0xff] %vm3200_vm1, %v4474_v24  ;;  %v2138_v27 = vadd.f32 %v5753_v61, %v2137_v25  ;;  %v2139_v29 = vpop.f32.mrb[109].mxu0 }
 0x1d2   :  { %v2650_v28 = vadd.f32 %v5753_v61, %v2649_v26  ;;  %v2651_v30 = vpop.f32.mrb[109].mxu1  ;;  %v2140_v33 = vpop.f32.mrb[110].mxu0  ;;  %v4230_v29 = vld [vmem:[%s7027_s0 + $0x790] ss:$8 sps:$4 sm:$0xff]  }
 0x1d3   :  { %v2652_v34 = vpop.f32.mrb[110].mxu1  ;;  %4483 = vtanh.f32 %v2138_v27  ;;  %v2141_v37 = vadd.f32 %v5753_v61, %v2140_v33  ;;  %v2142_v39 = vpop.f32.mrb[111].mxu0  ;;  %v4233_v33 = vld [vmem:[%s7027_s0 + $0x7a4] ss:$8 sps:$4 sm:$0xff]  }
 0x1d4   :  { %v2653_v38 = vadd.f32 %v5753_v61, %v2652_v34  ;;  %v2654_v40 = vpop.f32.mrb[111].mxu1  ;;  %4485 = vtanh.f32 %v2650_v28  ;;  %v4229_v28 = vld [vmem:[%s7027_s0 + $0x390] ss:$8 sps:$4 sm:$0xff]  }
 0x1d5   :  { %v4476_v41 = vpop.eup %4475  ;;  %4487 = vtanh.f32 %v2141_v37  ;;  %2352 = vmatmul.mubr.bf16.gmra.mrb[216].mxu0 %v4211_v31  ;;  %2864 = vmatmul.mubr.bf16.gmra.mrb[216].mxu1 %v4212_v32  ;;  %v4231_v32 = vld [vmem:[%s7027_s0 + $0x3a4] ss:$8 sps:$4 sm:$0xff]  }
 0x1d6   :  { %v4478_v42 = vpop.eup %4477  ;;  %3253 = vst.msk [vmem:[%s7029_s3 + $0x1a0] sm:$0xff] %vm3200_vm1, %v4476_v41  ;;  %4489 = vtanh.f32 %v2653_v38  ;;  %3782 = vmatprep.mubr.msk.bf16.mxu0 %vm1502_vm0, %v4213_v35  ;;  %3846 = vmatprep.mubr.msk.bf16.mxu1 %vm1502_vm0, %v4215_v36 }
 0x1d7   :  { %v4480_v43 = vpop.eup %4479  ;;  %3381 = vst.msk [vmem:[%s7029_s3 + $0x5a0] sm:$0xff] %vm3200_vm1, %v4478_v42 }
 0x1d8   :  { %v4482_v44 = vpop.eup %4481  ;;  %3254 = vst.msk [vmem:[%s7029_s3 + $0x1a8] sm:$0xff] %vm3200_vm1, %v4480_v43  ;;  %v2145_v45 = vpop.f32.mrb[112].mxu0 }
 0x1d9   :  { %v2657_v46 = vpop.f32.mrb[112].mxu1  ;;  %3382 = vst.msk [vmem:[%s7029_s3 + $0x5a8] sm:$0xff] %vm3200_vm1, %v4482_v44  ;;  %v2146_v47 = vadd.f32 %v5753_v61, %v2145_v45  ;;  %v2147_v49 = vpop.f32.mrb[113].mxu0 }
 0x1da   :  { %v2658_v48 = vadd.f32 %v5753_v61, %v2657_v46  ;;  %v2659_v50 = vpop.f32.mrb[113].mxu1  ;;  %v2148_v53 = vpop.f32.mrb[114].mxu0  ;;  %v4236_v49 = vld [vmem:[%s7027_s0 + $0x7a0] ss:$8 sps:$4 sm:$0xff]  }
 0x1db   :  { %v2660_v54 = vpop.f32.mrb[114].mxu1  ;;  %4491 = vtanh.f32 %v2146_v47  ;;  %v2149_v58 = vadd.f32 %v5753_v61, %v2148_v53  ;;  %v2150_v60 = vpop.f32.mrb[115].mxu0  ;;  %v4239_v53 = vld [vmem:[%s7027_s0 + $0x7b4] ss:$8 sps:$4 sm:$0xff]  }
 0x1dc   :  { %v2661_v59 = vadd.f32 %v5753_v61, %v2660_v54  ;;  %v2662_v62 = vpop.f32.mrb[115].mxu1  ;;  %4493 = vtanh.f32 %v2658_v48  ;;  %v4235_v48 = vld [vmem:[%s7027_s0 + $0x3a0] ss:$8 sps:$4 sm:$0xff]  }
 0x1dd   :  { %v4484_v63 = vpop.eup %4483  ;;  %4495 = vtanh.f32 %v2149_v58  ;;  %2360 = vmatmul.mubr.bf16.gmra.mrb[220].mxu0 %v4217_v51  ;;  %2872 = vmatmul.mubr.bf16.gmra.mrb[220].mxu1 %v4218_v52  ;;  %v4237_v52 = vld [vmem:[%s7027_s0 + $0x3b4] ss:$8 sps:$4 sm:$0xff]  }
 0x1de   :  { %v4486_v0 = vpop.eup %4485  ;;  %3255 = vst.msk [vmem:[%s7029_s3 + $0x1b0] sm:$0xff] %vm3200_vm1, %v4484_v63  ;;  %4497 = vtanh.f32 %v2661_v59  ;;  %3783 = vmatprep.mubr.msk.bf16.mxu0 %vm1502_vm0, %v4219_v55  ;;  %3847 = vmatprep.mubr.msk.bf16.mxu1 %vm1502_vm0, %v4221_v57 }
 0x1df   :  { %v4488_v1 = vpop.eup %4487  ;;  %3383 = vst.msk [vmem:[%s7029_s3 + $0x5b0] sm:$0xff] %vm3200_vm1, %v4486_v0 }
 0x1e0   :  { %v4490_v2 = vpop.eup %4489  ;;  %3256 = vst.msk [vmem:[%s7029_s3 + $0x1b8] sm:$0xff] %vm3200_vm1, %v4488_v1  ;;  %v2153_v3 = vpop.f32.mrb[116].mxu0 }
 0x1e1   :  { %v2665_v4 = vpop.f32.mrb[116].mxu1  ;;  %3384 = vst.msk [vmem:[%s7029_s3 + $0x5b8] sm:$0xff] %vm3200_vm1, %v4490_v2  ;;  %v2154_v56 = vadd.f32 %v5753_v61, %v2153_v3  ;;  %v2155_v6 = vpop.f32.mrb[117].mxu0  ;;  %v6302_v3 = vld [vmem:[%s7028_s2] ss:$0 sm:$0xff] }
 0x1e2   :  { %v2666_v5 = vadd.f32 %v5753_v61, %v2665_v4  ;;  %v2667_v7 = vpop.f32.mrb[117].mxu1  ;;  %v2156_v10 = vpop.f32.mrb[118].mxu0  ;;  %v4241_v6 = vld [vmem:[%s7027_s0 + $0x3b0] ss:$8 sps:$4 sm:$0xff]  }
 0x1e3   :  { %v2668_v11 = vpop.f32.mrb[118].mxu1  ;;  %4499 = vtanh.f32 %v2154_v56  ;;  %v2157_v14 = vadd.f32 %v5753_v61, %v2156_v10  ;;  %v2158_v16 = vpop.f32.mrb[119].mxu0  ;;  %v4242_v7 = vld [vmem:[%s7027_s0 + $0x7b0] ss:$8 sps:$4 sm:$0xff]   ;;  %v4245_v10 = vld [vmem:[%s7027_s0 + $0x7c4] ss:$8 sps:$4 sm:$0xff]  }
 0x1e4   :  { %v2669_v15 = vadd.f32 %v5753_v61, %v2668_v11  ;;  %v2670_v17 = vpop.f32.mrb[119].mxu1  ;;  %4501 = vtanh.f32 %v2666_v5 }
 0x1e5   :  { %v4492_v18 = vpop.eup %4491  ;;  %4503 = vtanh.f32 %v2157_v14  ;;  %2368 = vmatmul.mubr.bf16.gmra.mrb[224].mxu0 %v4223_v8  ;;  %2880 = vmatmul.mubr.bf16.gmra.mrb[224].mxu1 %v4224_v9 }
 0x1e6   :  { %v4494_v19 = vpop.eup %4493  ;;  %3257 = vst.msk [vmem:[%s7029_s3 + $0x1c0] sm:$0xff] %vm3200_vm1, %v4492_v18  ;;  %4505 = vtanh.f32 %v2669_v15  ;;  %3784 = vmatprep.mubr.msk.bf16.mxu0 %vm1502_vm0, %v4225_v12  ;;  %3848 = vmatprep.mubr.msk.bf16.mxu1 %vm1502_vm0, %v4227_v13 }
 0x1e7   :  { %v4496_v20 = vpop.eup %4495  ;;  %3385 = vst.msk [vmem:[%s7029_s3 + $0x5c0] sm:$0xff] %vm3200_vm1, %v4494_v19 }
 0x1e8   :  { %v4498_v21 = vpop.eup %4497  ;;  %3258 = vst.msk [vmem:[%s7029_s3 + $0x1c8] sm:$0xff] %vm3200_vm1, %v4496_v20  ;;  %v2161_v22 = vpop.f32.mrb[120].mxu0 }
 0x1e9   :  { %v2673_v23 = vpop.f32.mrb[120].mxu1  ;;  %3386 = vst.msk [vmem:[%s7029_s3 + $0x5c8] sm:$0xff] %vm3200_vm1, %v4498_v21  ;;  %v2162_v24 = vadd.f32 %v5753_v61, %v2161_v22  ;;  %v2163_v26 = vpop.f32.mrb[121].mxu0 }
 0x1ea   :  { %v2674_v25 = vadd.f32 %v5753_v61, %v2673_v23  ;;  %v2675_v27 = vpop.f32.mrb[121].mxu1  ;;  %v2164_v30 = vpop.f32.mrb[122].mxu0  ;;  %v4248_v26 = vld [vmem:[%s7027_s0 + $0x7c0] ss:$8 sps:$4 sm:$0xff]  }
 0x1eb   :  { %v2676_v31 = vpop.f32.mrb[122].mxu1  ;;  %4507 = vtanh.f32 %v2162_v24  ;;  %v2165_v34 = vadd.f32 %v5753_v61, %v2164_v30  ;;  %v2166_v36 = vpop.f32.mrb[123].mxu0  ;;  %v4251_v30 = vld [vmem:[%s7027_s0 + $0x7d4] ss:$8 sps:$4 sm:$0xff]  }
 0x1ec   :  { %v2677_v35 = vadd.f32 %v5753_v61, %v2676_v31  ;;  %v2678_v37 = vpop.f32.mrb[123].mxu1  ;;  %4509 = vtanh.f32 %v2674_v25  ;;  %v4247_v25 = vld [vmem:[%s7027_s0 + $0x3c0] ss:$8 sps:$4 sm:$0xff]  }
 0x1ed   :  { %v4500_v38 = vpop.eup %4499  ;;  %4511 = vtanh.f32 %v2165_v34  ;;  %2376 = vmatmul.mubr.bf16.gmra.mrb[228].mxu0 %v4229_v28  ;;  %2888 = vmatmul.mubr.bf16.gmra.mrb[228].mxu1 %v4230_v29  ;;  %v4249_v29 = vld [vmem:[%s7027_s0 + $0x3d4] ss:$8 sps:$4 sm:$0xff]  }
 0x1ee   :  { %v4502_v39 = vpop.eup %4501  ;;  %3259 = vst.msk [vmem:[%s7029_s3 + $0x1d0] sm:$0xff] %vm3200_vm1, %v4500_v38  ;;  %4513 = vtanh.f32 %v2677_v35  ;;  %3785 = vmatprep.mubr.msk.bf16.mxu0 %vm1502_vm0, %v4231_v32  ;;  %3849 = vmatprep.mubr.msk.bf16.mxu1 %vm1502_vm0, %v4233_v33 }
 0x1ef   :  { %v4504_v40 = vpop.eup %4503  ;;  %3387 = vst.msk [vmem:[%s7029_s3 + $0x5d0] sm:$0xff] %vm3200_vm1, %v4502_v39 }
 0x1f0   :  { %v4506_v41 = vpop.eup %4505  ;;  %3260 = vst.msk [vmem:[%s7029_s3 + $0x1d8] sm:$0xff] %vm3200_vm1, %v4504_v40  ;;  %v2169_v42 = vpop.f32.mrb[124].mxu0 }
 0x1f1   :  { %v2681_v43 = vpop.f32.mrb[124].mxu1  ;;  %3388 = vst.msk [vmem:[%s7029_s3 + $0x5d8] sm:$0xff] %vm3200_vm1, %v4506_v41  ;;  %v2170_v44 = vadd.f32 %v5753_v61, %v2169_v42  ;;  %v2171_v46 = vpop.f32.mrb[125].mxu0 }
 0x1f2   :  { %v2682_v45 = vadd.f32 %v5753_v61, %v2681_v43  ;;  %v2683_v47 = vpop.f32.mrb[125].mxu1  ;;  %v2172_v50 = vpop.f32.mrb[126].mxu0  ;;  %v4254_v46 = vld [vmem:[%s7027_s0 + $0x7d0] ss:$8 sps:$4 sm:$0xff]  }
 0x1f3   :  { %v2684_v51 = vpop.f32.mrb[126].mxu1  ;;  %4515 = vtanh.f32 %v2170_v44  ;;  %v2173_v54 = vadd.f32 %v5753_v61, %v2172_v50  ;;  %v2174_v57 = vpop.f32.mrb[127].mxu0  ;;  %v4257_v50 = vld [vmem:[%s7027_s0 + $0x7e4] ss:$8 sps:$4 sm:$0xff]  }
 0x1f4   :  { %v2685_v55 = vadd.f32 %v5753_v61, %v2684_v51  ;;  %v2686_v58 = vpop.f32.mrb[127].mxu1  ;;  %4517 = vtanh.f32 %v2682_v45  ;;  %v4253_v45 = vld [vmem:[%s7027_s0 + $0x3d0] ss:$8 sps:$4 sm:$0xff]  }
 0x1f5   :  { %v4508_v59 = vpop.eup %4507  ;;  %4519 = vtanh.f32 %v2173_v54  ;;  %2384 = vmatmul.mubr.bf16.gmra.mrb[232].mxu0 %v4235_v48  ;;  %2896 = vmatmul.mubr.bf16.gmra.mrb[232].mxu1 %v4236_v49  ;;  %v4255_v49 = vld [vmem:[%s7027_s0 + $0x3e4] ss:$8 sps:$4 sm:$0xff]  }
 0x1f6   :  { %v4510_v60 = vpop.eup %4509  ;;  %3261 = vst.msk [vmem:[%s7029_s3 + $0x1e0] sm:$0xff] %vm3200_vm1, %v4508_v59  ;;  %4521 = vtanh.f32 %v2685_v55  ;;  %3786 = vmatprep.mubr.msk.bf16.mxu0 %vm1502_vm0, %v4237_v52  ;;  %3850 = vmatprep.mubr.msk.bf16.mxu1 %vm1502_vm0, %v4239_v53 }
 0x1f7   :  { %v4512_v62 = vpop.eup %4511  ;;  %3389 = vst.msk [vmem:[%s7029_s3 + $0x5e0] sm:$0xff] %vm3200_vm1, %v4510_v60 }
 0x1f8   :  { %v4514_v63 = vpop.eup %4513  ;;  %3262 = vst.msk [vmem:[%s7029_s3 + $0x1e8] sm:$0xff] %vm3200_vm1, %v4512_v62  ;;  %v2177_v0 = vpop.f32.mrb[128].mxu0 }
 0x1f9   :  { %v2689_v1 = vpop.f32.mrb[128].mxu1  ;;  %3390 = vst.msk [vmem:[%s7029_s3 + $0x5e8] sm:$0xff] %vm3200_vm1, %v4514_v63  ;;  %v2178_v2 = vadd.f32 %v5753_v61, %v2177_v0  ;;  %v2179_v56 = vpop.f32.mrb[129].mxu0  ;;  %v4243_v61 = vld [vmem:[%s7027_s0 + $0x3c4] ss:$8 sps:$4 sm:$0xff]  }
 0x1fa   :  { %v2690_v4 = vadd.f32 %v6302_v3, %v2689_v1  ;;  %v2691_v5 = vpop.f32.mrb[129].mxu1  ;;  %v2180_v8 = vpop.f32.mrb[130].mxu0  ;;  %v4260_v56 = vld [vmem:[%s7027_s0 + $0x7e0] ss:$8 sps:$4 sm:$0xff]  }
 0x1fb   :  { %v2692_v9 = vpop.f32.mrb[130].mxu1  ;;  %4523 = vtanh.f32 %v2178_v2  ;;  %v2181_v11 = vadd.f32 %v6302_v3, %v2180_v8  ;;  %v2182_v13 = vpop.f32.mrb[131].mxu0  ;;  %v4263_v8 = vld [vmem:[%s7027_s0 + $0x7f4] ss:$8 sps:$4 sm:$0xff]  }
 0x1fc   :  { %v2693_v12 = vadd.f32 %v6302_v3, %v2692_v9  ;;  %v2694_v14 = vpop.f32.mrb[131].mxu1  ;;  %4525 = vtanh.f32 %v2690_v4  ;;  %v4259_v4 = vld [vmem:[%s7027_s0 + $0x3e0] ss:$8 sps:$4 sm:$0xff]  }
 0x1fd   :  { %v4516_v15 = vpop.eup %4515  ;;  %4527 = vtanh.f32 %v2181_v11  ;;  %2392 = vmatmul.mubr.bf16.gmra.mrb[236].mxu0 %v4241_v6  ;;  %2904 = vmatmul.mubr.bf16.gmra.mrb[236].mxu1 %v4242_v7  ;;  %v4261_v7 = vld [vmem:[%s7027_s0 + $0x3f4] ss:$8 sps:$4 sm:$0xff]  }
 0x1fe   :  { %v4518_v16 = vpop.eup %4517  ;;  %3263 = vst.msk [vmem:[%s7029_s3 + $0x1f0] sm:$0xff] %vm3200_vm1, %v4516_v15  ;;  %4529 = vtanh.f32 %v2693_v12  ;;  %3787 = vmatprep.mubr.msk.bf16.mxu0 %vm1502_vm0, %v4243_v61  ;;  %3851 = vmatprep.mubr.msk.bf16.mxu1 %vm1502_vm0, %v4245_v10 }
 0x1ff   :  { %v4520_v17 = vpop.eup %4519  ;;  %3391 = vst.msk [vmem:[%s7029_s3 + $0x5f0] sm:$0xff] %vm3200_vm1, %v4518_v16 }
 0x200   :  { %v4522_v18 = vpop.eup %4521  ;;  %3264 = vst.msk [vmem:[%s7029_s3 + $0x1f8] sm:$0xff] %vm3200_vm1, %v4520_v17  ;;  %v2185_v19 = vpop.f32.mrb[132].mxu0 }
 0x201   :  { %v2697_v20 = vpop.f32.mrb[132].mxu1  ;;  %3392 = vst.msk [vmem:[%s7029_s3 + $0x5f8] sm:$0xff] %vm3200_vm1, %v4522_v18  ;;  %v2186_v21 = vadd.f32 %v6302_v3, %v2185_v19  ;;  %v2187_v23 = vpop.f32.mrb[133].mxu0 }
 0x202   :  { %v2698_v22 = vadd.f32 %v6302_v3, %v2697_v20  ;;  %v2699_v24 = vpop.f32.mrb[133].mxu1  ;;  %v2188_v27 = vpop.f32.mrb[134].mxu0  ;;  %v4266_v23 = vld [vmem:[%s7027_s0 + $0x7f0] ss:$8 sps:$4 sm:$0xff]  }
 0x203   :  { %v2700_v28 = vpop.f32.mrb[134].mxu1  ;;  %4531 = vtanh.f32 %v2186_v21  ;;  %v2189_v31 = vadd.f32 %v6302_v3, %v2188_v27  ;;  %v2190_v33 = vpop.f32.mrb[135].mxu0 }
 0x204   :  { %v2701_v32 = vadd.f32 %v6302_v3, %v2700_v28  ;;  %v2702_v34 = vpop.f32.mrb[135].mxu1  ;;  %4533 = vtanh.f32 %v2698_v22  ;;  %v4265_v22 = vld [vmem:[%s7027_s0 + $0x3f0] ss:$8 sps:$4 sm:$0xff]  }
 0x205   :  { %v4524_v35 = vpop.eup %4523  ;;  %4535 = vtanh.f32 %v2189_v31  ;;  %2400 = vmatmul.mubr.bf16.gmra.mrb[240].mxu0 %v4247_v25  ;;  %2912 = vmatmul.mubr.bf16.gmra.mrb[240].mxu1 %v4248_v26 }
 0x206   :  { %v4526_v36 = vpop.eup %4525  ;;  %3265 = vst.msk [vmem:[%s7029_s3 + $0x200] sm:$0xff] %vm3200_vm1, %v4524_v35  ;;  %4537 = vtanh.f32 %v2701_v32  ;;  %3788 = vmatprep.mubr.msk.bf16.mxu0 %vm1502_vm0, %v4249_v29  ;;  %3852 = vmatprep.mubr.msk.bf16.mxu1 %vm1502_vm0, %v4251_v30 }
 0x207   :  { %v4528_v37 = vpop.eup %4527  ;;  %3393 = vst.msk [vmem:[%s7029_s3 + $0x600] sm:$0xff] %vm3200_vm1, %v4526_v36 }
 0x208   :  { %v4530_v38 = vpop.eup %4529  ;;  %3266 = vst.msk [vmem:[%s7029_s3 + $0x208] sm:$0xff] %vm3200_vm1, %v4528_v37  ;;  %v2193_v39 = vpop.f32.mrb[136].mxu0 }
 0x209   :  { %v2705_v40 = vpop.f32.mrb[136].mxu1  ;;  %3394 = vst.msk [vmem:[%s7029_s3 + $0x608] sm:$0xff] %vm3200_vm1, %v4530_v38  ;;  %v2194_v41 = vadd.f32 %v6302_v3, %v2193_v39  ;;  %v2195_v43 = vpop.f32.mrb[137].mxu0 }
 0x20a   :  { %v2706_v42 = vadd.f32 %v6302_v3, %v2705_v40  ;;  %v2707_v44 = vpop.f32.mrb[137].mxu1  ;;  %v2196_v47 = vpop.f32.mrb[138].mxu0 }
 0x20b   :  { %v2708_v48 = vpop.f32.mrb[138].mxu1  ;;  %4539 = vtanh.f32 %v2194_v41  ;;  %v2197_v51 = vadd.f32 %v6302_v3, %v2196_v47  ;;  %v2198_v53 = vpop.f32.mrb[139].mxu0 }
 0x20c   :  { %v2709_v52 = vadd.f32 %v6302_v3, %v2708_v48  ;;  %v2710_v54 = vpop.f32.mrb[139].mxu1  ;;  %4541 = vtanh.f32 %v2706_v42 }
 0x20d   :  { %v4532_v55 = vpop.eup %4531  ;;  %4543 = vtanh.f32 %v2197_v51  ;;  %2408 = vmatmul.mubr.bf16.gmra.mrb[244].mxu0 %v4253_v45  ;;  %2920 = vmatmul.mubr.bf16.gmra.mrb[244].mxu1 %v4254_v46 }
 0x20e   :  { %v4534_v57 = vpop.eup %4533  ;;  %3267 = vst.msk [vmem:[%s7029_s3 + $0x210] sm:$0xff] %vm3200_vm1, %v4532_v55  ;;  %4545 = vtanh.f32 %v2709_v52  ;;  %3789 = vmatprep.mubr.msk.bf16.mxu0 %vm1502_vm0, %v4255_v49  ;;  %3853 = vmatprep.mubr.msk.bf16.mxu1 %vm1502_vm0, %v4257_v50 }
 0x20f   :  { %v4536_v58 = vpop.eup %4535  ;;  %3395 = vst.msk [vmem:[%s7029_s3 + $0x610] sm:$0xff] %vm3200_vm1, %v4534_v57 }
 0x210   :  { %v4538_v59 = vpop.eup %4537  ;;  %3268 = vst.msk [vmem:[%s7029_s3 + $0x218] sm:$0xff] %vm3200_vm1, %v4536_v58  ;;  %v2201_v60 = vpop.f32.mrb[140].mxu0 }
 0x211   :  { %v2713_v62 = vpop.f32.mrb[140].mxu1  ;;  %3396 = vst.msk [vmem:[%s7029_s3 + $0x618] sm:$0xff] %vm3200_vm1, %v4538_v59  ;;  %v2202_v63 = vadd.f32 %v6302_v3, %v2201_v60  ;;  %v2203_v1 = vpop.f32.mrb[141].mxu0 }
 0x212   :  { %v2714_v0 = vadd.f32 %v6302_v3, %v2713_v62  ;;  %v2715_v2 = vpop.f32.mrb[141].mxu1  ;;  %v2204_v5 = vpop.f32.mrb[142].mxu0 }
 0x213   :  { %v2716_v6 = vpop.f32.mrb[142].mxu1  ;;  %4547 = vtanh.f32 %v2202_v63  ;;  %v2205_v9 = vadd.f32 %v6302_v3, %v2204_v5  ;;  %v2206_v10 = vpop.f32.mrb[143].mxu0 }
 0x214   :  { %v2717_v61 = vadd.f32 %v6302_v3, %v2716_v6  ;;  %v2718_v11 = vpop.f32.mrb[143].mxu1  ;;  %4549 = vtanh.f32 %v2714_v0 }
 0x215   :  { %v4540_v12 = vpop.eup %4539  ;;  %4551 = vtanh.f32 %v2205_v9  ;;  %2416 = vmatmul.mubr.bf16.gmra.mrb[248].mxu0 %v4259_v4  ;;  %2928 = vmatmul.mubr.bf16.gmra.mrb[248].mxu1 %v4260_v56 }
 0x216   :  { %v4542_v13 = vpop.eup %4541  ;;  %3269 = vst.msk [vmem:[%s7029_s3 + $0x220] sm:$0xff] %vm3200_vm1, %v4540_v12  ;;  %4553 = vtanh.f32 %v2717_v61  ;;  %3790 = vmatprep.mubr.msk.bf16.mxu0 %vm1502_vm0, %v4261_v7  ;;  %3854 = vmatprep.mubr.msk.bf16.mxu1 %vm1502_vm0, %v4263_v8 }
 0x217   :  { %v4544_v14 = vpop.eup %4543  ;;  %3397 = vst.msk [vmem:[%s7029_s3 + $0x620] sm:$0xff] %vm3200_vm1, %v4542_v13 }
 0x218   :  { %v4546_v15 = vpop.eup %4545  ;;  %3270 = vst.msk [vmem:[%s7029_s3 + $0x228] sm:$0xff] %vm3200_vm1, %v4544_v14  ;;  %v2209_v16 = vpop.f32.mrb[144].mxu0 }
 0x219   :  { %v2721_v17 = vpop.f32.mrb[144].mxu1  ;;  %3398 = vst.msk [vmem:[%s7029_s3 + $0x628] sm:$0xff] %vm3200_vm1, %v4546_v15  ;;  %v2210_v18 = vadd.f32 %v6302_v3, %v2209_v16  ;;  %v2211_v20 = vpop.f32.mrb[145].mxu0 }
 0x21a   :  { %v2722_v19 = vadd.f32 %v6302_v3, %v2721_v17  ;;  %v2723_v21 = vpop.f32.mrb[145].mxu1  ;;  %v2212_v24 = vpop.f32.mrb[146].mxu0 }
 0x21b   :  { %v2724_v25 = vpop.f32.mrb[146].mxu1  ;;  %4555 = vtanh.f32 %v2210_v18  ;;  %v2213_v26 = vadd.f32 %v6302_v3, %v2212_v24  ;;  %v2214_v28 = vpop.f32.mrb[147].mxu0 }
 0x21c   :  { %v2725_v27 = vadd.f32 %v6302_v3, %v2724_v25  ;;  %v2726_v29 = vpop.f32.mrb[147].mxu1  ;;  %4557 = vtanh.f32 %v2722_v19 }
 0x21d   :  { %v4548_v30 = vpop.eup %4547  ;;  %4559 = vtanh.f32 %v2213_v26  ;;  %2424 = vmatmul.mubr.bf16.gmra.mrb[252].mxu0 %v4265_v22  ;;  %2936 = vmatmul.mubr.bf16.gmra.mrb[252].mxu1 %v4266_v23 }
 0x21e   :  { %v4550_v31 = vpop.eup %4549  ;;  %3271 = vst.msk [vmem:[%s7029_s3 + $0x230] sm:$0xff] %vm3200_vm1, %v4548_v30  ;;  %4561 = vtanh.f32 %v2725_v27 }
 0x21f   :  { %v4552_v32 = vpop.eup %4551  ;;  %3399 = vst.msk [vmem:[%s7029_s3 + $0x630] sm:$0xff] %vm3200_vm1, %v4550_v31 }
 0x220   :  { %v4554_v33 = vpop.eup %4553  ;;  %3272 = vst.msk [vmem:[%s7029_s3 + $0x238] sm:$0xff] %vm3200_vm1, %v4552_v32  ;;  %v2217_v34 = vpop.f32.mrb[148].mxu0 }
 0x221   :  { %v2729_v35 = vpop.f32.mrb[148].mxu1  ;;  %3400 = vst.msk [vmem:[%s7029_s3 + $0x638] sm:$0xff] %vm3200_vm1, %v4554_v33  ;;  %v2218_v36 = vadd.f32 %v6302_v3, %v2217_v34  ;;  %v2219_v38 = vpop.f32.mrb[149].mxu0 }
 0x222   :  { %v2730_v37 = vadd.f32 %v6302_v3, %v2729_v35  ;;  %v2731_v39 = vpop.f32.mrb[149].mxu1  ;;  %v2220_v40 = vpop.f32.mrb[150].mxu0 }
 0x223   :  { %v2732_v41 = vpop.f32.mrb[150].mxu1  ;;  %4563 = vtanh.f32 %v2218_v36  ;;  %v2221_v42 = vadd.f32 %v6302_v3, %v2220_v40  ;;  %v2222_v44 = vpop.f32.mrb[151].mxu0 }
 0x224   :  { %v2733_v43 = vadd.f32 %v6302_v3, %v2732_v41  ;;  %v2734_v45 = vpop.f32.mrb[151].mxu1  ;;  %4565 = vtanh.f32 %v2730_v37 }
 0x225   :  { %v4556_v46 = vpop.eup %4555  ;;  %4567 = vtanh.f32 %v2221_v42 }
 0x226   :  { %v4558_v47 = vpop.eup %4557  ;;  %3273 = vst.msk [vmem:[%s7029_s3 + $0x240] sm:$0xff] %vm3200_vm1, %v4556_v46  ;;  %4569 = vtanh.f32 %v2733_v43 }
 0x227   :  { %v4560_v48 = vpop.eup %4559  ;;  %3401 = vst.msk [vmem:[%s7029_s3 + $0x640] sm:$0xff] %vm3200_vm1, %v4558_v47 }
 0x228   :  { %v4562_v49 = vpop.eup %4561  ;;  %3274 = vst.msk [vmem:[%s7029_s3 + $0x248] sm:$0xff] %vm3200_vm1, %v4560_v48  ;;  %v2225_v50 = vpop.f32.mrb[152].mxu0 }
 0x229   :  { %v2737_v51 = vpop.f32.mrb[152].mxu1  ;;  %3402 = vst.msk [vmem:[%s7029_s3 + $0x648] sm:$0xff] %vm3200_vm1, %v4562_v49  ;;  %v2226_v52 = vadd.f32 %v6302_v3, %v2225_v50  ;;  %v2227_v54 = vpop.f32.mrb[153].mxu0 }
 0x22a   :  { %v2738_v53 = vadd.f32 %v6302_v3, %v2737_v51  ;;  %v2739_v55 = vpop.f32.mrb[153].mxu1  ;;  %v2228_v57 = vpop.f32.mrb[154].mxu0 }
 0x22b   :  { %v2740_v58 = vpop.f32.mrb[154].mxu1  ;;  %4571 = vtanh.f32 %v2226_v52  ;;  %v2229_v59 = vadd.f32 %v6302_v3, %v2228_v57  ;;  %v2230_v62 = vpop.f32.mrb[155].mxu0 }
 0x22c   :  { %v2741_v60 = vadd.f32 %v6302_v3, %v2740_v58  ;;  %v2742_v63 = vpop.f32.mrb[155].mxu1  ;;  %4573 = vtanh.f32 %v2738_v53 }
 0x22d   :  { %v4564_v0 = vpop.eup %4563  ;;  %4575 = vtanh.f32 %v2229_v59 }
 0x22e   :  { %v4566_v1 = vpop.eup %4565  ;;  %3275 = vst.msk [vmem:[%s7029_s3 + $0x250] sm:$0xff] %vm3200_vm1, %v4564_v0  ;;  %4577 = vtanh.f32 %v2741_v60 }
 0x22f   :  { %v4568_v2 = vpop.eup %4567  ;;  %3403 = vst.msk [vmem:[%s7029_s3 + $0x650] sm:$0xff] %vm3200_vm1, %v4566_v1 }
 0x230   :  { %v4570_v4 = vpop.eup %4569  ;;  %3276 = vst.msk [vmem:[%s7029_s3 + $0x258] sm:$0xff] %vm3200_vm1, %v4568_v2  ;;  %v2233_v56 = vpop.f32.mrb[156].mxu0 }
 0x231   :  { %v2745_v5 = vpop.f32.mrb[156].mxu1  ;;  %3404 = vst.msk [vmem:[%s7029_s3 + $0x658] sm:$0xff] %vm3200_vm1, %v4570_v4  ;;  %v2234_v6 = vadd.f32 %v6302_v3, %v2233_v56  ;;  %v2235_v8 = vpop.f32.mrb[157].mxu0 }
 0x232   :  { %v2746_v7 = vadd.f32 %v6302_v3, %v2745_v5  ;;  %v2747_v9 = vpop.f32.mrb[157].mxu1  ;;  %v2236_v61 = vpop.f32.mrb[158].mxu0 }
 0x233   :  { %v2748_v10 = vpop.f32.mrb[158].mxu1  ;;  %4579 = vtanh.f32 %v2234_v6  ;;  %v2237_v11 = vadd.f32 %v6302_v3, %v2236_v61  ;;  %v2238_v13 = vpop.f32.mrb[159].mxu0 }
 0x234   :  { %v2749_v12 = vadd.f32 %v6302_v3, %v2748_v10  ;;  %v2750_v14 = vpop.f32.mrb[159].mxu1  ;;  %4581 = vtanh.f32 %v2746_v7 }
 0x235   :  { %v4572_v15 = vpop.eup %4571  ;;  %4583 = vtanh.f32 %v2237_v11 }
 0x236   :  { %v4574_v16 = vpop.eup %4573  ;;  %3277 = vst.msk [vmem:[%s7029_s3 + $0x260] sm:$0xff] %vm3200_vm1, %v4572_v15  ;;  %4585 = vtanh.f32 %v2749_v12 }
 0x237   :  { %v4576_v17 = vpop.eup %4575  ;;  %3405 = vst.msk [vmem:[%s7029_s3 + $0x660] sm:$0xff] %vm3200_vm1, %v4574_v16 }
 0x238   :  { %v4578_v18 = vpop.eup %4577  ;;  %3278 = vst.msk [vmem:[%s7029_s3 + $0x268] sm:$0xff] %vm3200_vm1, %v4576_v17  ;;  %v2241_v19 = vpop.f32.mrb[160].mxu0 }
 0x239   :  { %v2753_v20 = vpop.f32.mrb[160].mxu1  ;;  %3406 = vst.msk [vmem:[%s7029_s3 + $0x668] sm:$0xff] %vm3200_vm1, %v4578_v18  ;;  %v2242_v21 = vadd.f32 %v6302_v3, %v2241_v19  ;;  %v2243_v23 = vpop.f32.mrb[161].mxu0 }
 0x23a   :  { %v2754_v22 = vadd.f32 %v6302_v3, %v2753_v20  ;;  %v2755_v24 = vpop.f32.mrb[161].mxu1  ;;  %v2244_v25 = vpop.f32.mrb[162].mxu0 }
 0x23b   :  { %v2756_v26 = vpop.f32.mrb[162].mxu1  ;;  %4587 = vtanh.f32 %v2242_v21  ;;  %v2245_v27 = vadd.f32 %v6302_v3, %v2244_v25  ;;  %v2246_v29 = vpop.f32.mrb[163].mxu0 }
 0x23c   :  { %v2757_v28 = vadd.f32 %v6302_v3, %v2756_v26  ;;  %v2758_v30 = vpop.f32.mrb[163].mxu1  ;;  %4589 = vtanh.f32 %v2754_v22 }
 0x23d   :  { %v4580_v31 = vpop.eup %4579  ;;  %4591 = vtanh.f32 %v2245_v27 }
 0x23e   :  { %v4582_v32 = vpop.eup %4581  ;;  %3279 = vst.msk [vmem:[%s7029_s3 + $0x270] sm:$0xff] %vm3200_vm1, %v4580_v31  ;;  %4593 = vtanh.f32 %v2757_v28 }
 0x23f   :  { %v4584_v33 = vpop.eup %4583  ;;  %3407 = vst.msk [vmem:[%s7029_s3 + $0x670] sm:$0xff] %vm3200_vm1, %v4582_v32 }
 0x240   :  { %v4586_v34 = vpop.eup %4585  ;;  %3280 = vst.msk [vmem:[%s7029_s3 + $0x278] sm:$0xff] %vm3200_vm1, %v4584_v33  ;;  %v2249_v35 = vpop.f32.mrb[164].mxu0 }
 0x241   :  { %v2761_v36 = vpop.f32.mrb[164].mxu1  ;;  %3408 = vst.msk [vmem:[%s7029_s3 + $0x678] sm:$0xff] %vm3200_vm1, %v4586_v34  ;;  %v2250_v37 = vadd.f32 %v6302_v3, %v2249_v35  ;;  %v2251_v39 = vpop.f32.mrb[165].mxu0 }
 0x242   :  { %v2762_v38 = vadd.f32 %v6302_v3, %v2761_v36  ;;  %v2763_v40 = vpop.f32.mrb[165].mxu1  ;;  %v2252_v41 = vpop.f32.mrb[166].mxu0 }
 0x243   :  { %v2764_v42 = vpop.f32.mrb[166].mxu1  ;;  %4595 = vtanh.f32 %v2250_v37  ;;  %v2253_v43 = vadd.f32 %v6302_v3, %v2252_v41  ;;  %v2254_v45 = vpop.f32.mrb[167].mxu0 }
 0x244   :  { %v2765_v44 = vadd.f32 %v6302_v3, %v2764_v42  ;;  %v2766_v46 = vpop.f32.mrb[167].mxu1  ;;  %4597 = vtanh.f32 %v2762_v38 }
 0x245   :  { %v4588_v47 = vpop.eup %4587  ;;  %4599 = vtanh.f32 %v2253_v43 }
 0x246   :  { %v4590_v48 = vpop.eup %4589  ;;  %3281 = vst.msk [vmem:[%s7029_s3 + $0x280] sm:$0xff] %vm3200_vm1, %v4588_v47  ;;  %4601 = vtanh.f32 %v2765_v44 }
 0x247   :  { %v4592_v49 = vpop.eup %4591  ;;  %3409 = vst.msk [vmem:[%s7029_s3 + $0x680] sm:$0xff] %vm3200_vm1, %v4590_v48 }
 0x248   :  { %v4594_v50 = vpop.eup %4593  ;;  %3282 = vst.msk [vmem:[%s7029_s3 + $0x288] sm:$0xff] %vm3200_vm1, %v4592_v49  ;;  %v2257_v51 = vpop.f32.mrb[168].mxu0 }
 0x249   :  { %v2769_v52 = vpop.f32.mrb[168].mxu1  ;;  %3410 = vst.msk [vmem:[%s7029_s3 + $0x688] sm:$0xff] %vm3200_vm1, %v4594_v50  ;;  %v2258_v53 = vadd.f32 %v6302_v3, %v2257_v51  ;;  %v2259_v55 = vpop.f32.mrb[169].mxu0 }
 0x24a   :  { %v2770_v54 = vadd.f32 %v6302_v3, %v2769_v52  ;;  %v2771_v57 = vpop.f32.mrb[169].mxu1  ;;  %v2260_v58 = vpop.f32.mrb[170].mxu0 }
 0x24b   :  { %v2772_v59 = vpop.f32.mrb[170].mxu1  ;;  %4603 = vtanh.f32 %v2258_v53  ;;  %v2261_v60 = vadd.f32 %v6302_v3, %v2260_v58  ;;  %v2262_v63 = vpop.f32.mrb[171].mxu0 }
 0x24c   :  { %v2773_v62 = vadd.f32 %v6302_v3, %v2772_v59  ;;  %v2774_v0 = vpop.f32.mrb[171].mxu1  ;;  %4605 = vtanh.f32 %v2770_v54 }
 0x24d   :  { %v4596_v1 = vpop.eup %4595  ;;  %4607 = vtanh.f32 %v2261_v60 }
 0x24e   :  { %v4598_v2 = vpop.eup %4597  ;;  %3283 = vst.msk [vmem:[%s7029_s3 + $0x290] sm:$0xff] %vm3200_vm1, %v4596_v1  ;;  %4609 = vtanh.f32 %v2773_v62 }
 0x24f   :  { %v4600_v4 = vpop.eup %4599  ;;  %3411 = vst.msk [vmem:[%s7029_s3 + $0x690] sm:$0xff] %vm3200_vm1, %v4598_v2 }
 0x250   :  { %v4602_v56 = vpop.eup %4601  ;;  %3284 = vst.msk [vmem:[%s7029_s3 + $0x298] sm:$0xff] %vm3200_vm1, %v4600_v4  ;;  %v2265_v5 = vpop.f32.mrb[172].mxu0 }
 0x251   :  { %v2777_v6 = vpop.f32.mrb[172].mxu1  ;;  %3412 = vst.msk [vmem:[%s7029_s3 + $0x698] sm:$0xff] %vm3200_vm1, %v4602_v56  ;;  %v2266_v7 = vadd.f32 %v6302_v3, %v2265_v5  ;;  %v2267_v9 = vpop.f32.mrb[173].mxu0 }
 0x252   :  { %v2778_v8 = vadd.f32 %v6302_v3, %v2777_v6  ;;  %v2779_v61 = vpop.f32.mrb[173].mxu1  ;;  %v2268_v10 = vpop.f32.mrb[174].mxu0 }
 0x253   :  { %v2780_v11 = vpop.f32.mrb[174].mxu1  ;;  %4611 = vtanh.f32 %v2266_v7  ;;  %v2269_v12 = vadd.f32 %v6302_v3, %v2268_v10  ;;  %v2270_v14 = vpop.f32.mrb[175].mxu0 }
 0x254   :  { %v2781_v13 = vadd.f32 %v6302_v3, %v2780_v11  ;;  %v2782_v15 = vpop.f32.mrb[175].mxu1  ;;  %4613 = vtanh.f32 %v2778_v8 }
 0x255   :  { %v4604_v16 = vpop.eup %4603  ;;  %4615 = vtanh.f32 %v2269_v12 }
 0x256   :  { %v4606_v17 = vpop.eup %4605  ;;  %3285 = vst.msk [vmem:[%s7029_s3 + $0x2a0] sm:$0xff] %vm3200_vm1, %v4604_v16  ;;  %4617 = vtanh.f32 %v2781_v13 }
 0x257   :  { %v4608_v18 = vpop.eup %4607  ;;  %3413 = vst.msk [vmem:[%s7029_s3 + $0x6a0] sm:$0xff] %vm3200_vm1, %v4606_v17 }
 0x258   :  { %v4610_v19 = vpop.eup %4609  ;;  %3286 = vst.msk [vmem:[%s7029_s3 + $0x2a8] sm:$0xff] %vm3200_vm1, %v4608_v18  ;;  %v2273_v20 = vpop.f32.mrb[176].mxu0 }
 0x259   :  { %v2785_v21 = vpop.f32.mrb[176].mxu1  ;;  %3414 = vst.msk [vmem:[%s7029_s3 + $0x6a8] sm:$0xff] %vm3200_vm1, %v4610_v19  ;;  %v2274_v22 = vadd.f32 %v6302_v3, %v2273_v20  ;;  %v2275_v24 = vpop.f32.mrb[177].mxu0 }
 0x25a   :  { %v2786_v23 = vadd.f32 %v6302_v3, %v2785_v21  ;;  %v2787_v25 = vpop.f32.mrb[177].mxu1  ;;  %v2276_v26 = vpop.f32.mrb[178].mxu0 }
 0x25b   :  { %v2788_v27 = vpop.f32.mrb[178].mxu1  ;;  %4619 = vtanh.f32 %v2274_v22  ;;  %v2277_v28 = vadd.f32 %v6302_v3, %v2276_v26  ;;  %v2278_v30 = vpop.f32.mrb[179].mxu0 }
 0x25c   :  { %v2789_v29 = vadd.f32 %v6302_v3, %v2788_v27  ;;  %v2790_v31 = vpop.f32.mrb[179].mxu1  ;;  %4621 = vtanh.f32 %v2786_v23 }
 0x25d   :  { %v4612_v32 = vpop.eup %4611  ;;  %4623 = vtanh.f32 %v2277_v28 }
 0x25e   :  { %v4614_v33 = vpop.eup %4613  ;;  %3287 = vst.msk [vmem:[%s7029_s3 + $0x2b0] sm:$0xff] %vm3200_vm1, %v4612_v32  ;;  %4625 = vtanh.f32 %v2789_v29 }
 0x25f   :  { %v4616_v34 = vpop.eup %4615  ;;  %3415 = vst.msk [vmem:[%s7029_s3 + $0x6b0] sm:$0xff] %vm3200_vm1, %v4614_v33 }
 0x260   :  { %v4618_v35 = vpop.eup %4617  ;;  %3288 = vst.msk [vmem:[%s7029_s3 + $0x2b8] sm:$0xff] %vm3200_vm1, %v4616_v34  ;;  %v2281_v36 = vpop.f32.mrb[180].mxu0 }
 0x261   :  { %v2793_v37 = vpop.f32.mrb[180].mxu1  ;;  %3416 = vst.msk [vmem:[%s7029_s3 + $0x6b8] sm:$0xff] %vm3200_vm1, %v4618_v35  ;;  %v2282_v38 = vadd.f32 %v6302_v3, %v2281_v36  ;;  %v2283_v40 = vpop.f32.mrb[181].mxu0 }
 0x262   :  { %v2794_v39 = vadd.f32 %v6302_v3, %v2793_v37  ;;  %v2795_v41 = vpop.f32.mrb[181].mxu1  ;;  %v2284_v42 = vpop.f32.mrb[182].mxu0 }
 0x263   :  { %v2796_v43 = vpop.f32.mrb[182].mxu1  ;;  %4627 = vtanh.f32 %v2282_v38  ;;  %v2285_v44 = vadd.f32 %v6302_v3, %v2284_v42  ;;  %v2286_v46 = vpop.f32.mrb[183].mxu0 }
 0x264   :  { %v2797_v45 = vadd.f32 %v6302_v3, %v2796_v43  ;;  %v2798_v47 = vpop.f32.mrb[183].mxu1  ;;  %4629 = vtanh.f32 %v2794_v39 }
 0x265   :  { %v4620_v48 = vpop.eup %4619  ;;  %4631 = vtanh.f32 %v2285_v44 }
 0x266   :  { %v4622_v49 = vpop.eup %4621  ;;  %3289 = vst.msk [vmem:[%s7029_s3 + $0x2c0] sm:$0xff] %vm3200_vm1, %v4620_v48  ;;  %4633 = vtanh.f32 %v2797_v45 }
 0x267   :  { %v4624_v50 = vpop.eup %4623  ;;  %3417 = vst.msk [vmem:[%s7029_s3 + $0x6c0] sm:$0xff] %vm3200_vm1, %v4622_v49 }
 0x268   :  { %v4626_v51 = vpop.eup %4625  ;;  %3290 = vst.msk [vmem:[%s7029_s3 + $0x2c8] sm:$0xff] %vm3200_vm1, %v4624_v50  ;;  %v2289_v52 = vpop.f32.mrb[184].mxu0 }
 0x269   :  { %v2801_v53 = vpop.f32.mrb[184].mxu1  ;;  %3418 = vst.msk [vmem:[%s7029_s3 + $0x6c8] sm:$0xff] %vm3200_vm1, %v4626_v51  ;;  %v2290_v54 = vadd.f32 %v6302_v3, %v2289_v52  ;;  %v2291_v57 = vpop.f32.mrb[185].mxu0 }
 0x26a   :  { %v2802_v55 = vadd.f32 %v6302_v3, %v2801_v53  ;;  %v2803_v58 = vpop.f32.mrb[185].mxu1  ;;  %v2292_v59 = vpop.f32.mrb[186].mxu0 }
 0x26b   :  { %v2804_v60 = vpop.f32.mrb[186].mxu1  ;;  %4635 = vtanh.f32 %v2290_v54  ;;  %v2293_v62 = vadd.f32 %v6302_v3, %v2292_v59  ;;  %v2294_v0 = vpop.f32.mrb[187].mxu0 }
 0x26c   :  { %v2805_v63 = vadd.f32 %v6302_v3, %v2804_v60  ;;  %v2806_v1 = vpop.f32.mrb[187].mxu1  ;;  %4637 = vtanh.f32 %v2802_v55 }
 0x26d   :  { %v4628_v2 = vpop.eup %4627  ;;  %4639 = vtanh.f32 %v2293_v62 }
 0x26e   :  { %v4630_v4 = vpop.eup %4629  ;;  %3291 = vst.msk [vmem:[%s7029_s3 + $0x2d0] sm:$0xff] %vm3200_vm1, %v4628_v2  ;;  %4641 = vtanh.f32 %v2805_v63 }
 0x26f   :  { %v4632_v56 = vpop.eup %4631  ;;  %3419 = vst.msk [vmem:[%s7029_s3 + $0x6d0] sm:$0xff] %vm3200_vm1, %v4630_v4 }
 0x270   :  { %v4634_v5 = vpop.eup %4633  ;;  %3292 = vst.msk [vmem:[%s7029_s3 + $0x2d8] sm:$0xff] %vm3200_vm1, %v4632_v56  ;;  %v2297_v6 = vpop.f32.mrb[188].mxu0 }
 0x271   :  { %v2809_v7 = vpop.f32.mrb[188].mxu1  ;;  %3420 = vst.msk [vmem:[%s7029_s3 + $0x6d8] sm:$0xff] %vm3200_vm1, %v4634_v5  ;;  %v2298_v8 = vadd.f32 %v6302_v3, %v2297_v6  ;;  %v2299_v61 = vpop.f32.mrb[189].mxu0 }
 0x272   :  { %v2810_v9 = vadd.f32 %v6302_v3, %v2809_v7  ;;  %v2811_v10 = vpop.f32.mrb[189].mxu1  ;;  %v2300_v11 = vpop.f32.mrb[190].mxu0 }
 0x273   :  { %v2812_v12 = vpop.f32.mrb[190].mxu1  ;;  %4643 = vtanh.f32 %v2298_v8  ;;  %v2301_v13 = vadd.f32 %v6302_v3, %v2300_v11  ;;  %v2302_v15 = vpop.f32.mrb[191].mxu0 }
 0x274   :  { %v2813_v14 = vadd.f32 %v6302_v3, %v2812_v12  ;;  %v2814_v16 = vpop.f32.mrb[191].mxu1  ;;  %4645 = vtanh.f32 %v2810_v9 }
 0x275   :  { %v4636_v17 = vpop.eup %4635  ;;  %4647 = vtanh.f32 %v2301_v13 }
 0x276   :  { %v4638_v18 = vpop.eup %4637  ;;  %3293 = vst.msk [vmem:[%s7029_s3 + $0x2e0] sm:$0xff] %vm3200_vm1, %v4636_v17  ;;  %4649 = vtanh.f32 %v2813_v14 }
 0x277   :  { %v4640_v19 = vpop.eup %4639  ;;  %3421 = vst.msk [vmem:[%s7029_s3 + $0x6e0] sm:$0xff] %vm3200_vm1, %v4638_v18 }
 0x278   :  { %v4642_v20 = vpop.eup %4641  ;;  %3294 = vst.msk [vmem:[%s7029_s3 + $0x2e8] sm:$0xff] %vm3200_vm1, %v4640_v19  ;;  %v2305_v21 = vpop.f32.mrb[192].mxu0 }
 0x279   :  { %v2817_v22 = vpop.f32.mrb[192].mxu1  ;;  %3422 = vst.msk [vmem:[%s7029_s3 + $0x6e8] sm:$0xff] %vm3200_vm1, %v4642_v20  ;;  %v2306_v23 = vadd.f32 %v6302_v3, %v2305_v21  ;;  %v2307_v25 = vpop.f32.mrb[193].mxu0 }
 0x27a   :  { %v2818_v24 = vadd.f32 %v6302_v3, %v2817_v22  ;;  %v2819_v26 = vpop.f32.mrb[193].mxu1  ;;  %v2308_v27 = vpop.f32.mrb[194].mxu0 }
 0x27b   :  { %v2820_v28 = vpop.f32.mrb[194].mxu1  ;;  %4651 = vtanh.f32 %v2306_v23  ;;  %v2309_v29 = vadd.f32 %v6302_v3, %v2308_v27  ;;  %v2310_v31 = vpop.f32.mrb[195].mxu0  ;;  %v6768_v23 = vld [vmem:[%s7028_s2] ss:$0 sm:$0xff] }
 0x27c   :  { %v2821_v30 = vadd.f32 %v6302_v3, %v2820_v28  ;;  %v2822_v32 = vpop.f32.mrb[195].mxu1  ;;  %4653 = vtanh.f32 %v2818_v24 }
 0x27d   :  { %v4644_v33 = vpop.eup %4643  ;;  %4655 = vtanh.f32 %v2309_v29 }
 0x27e   :  { %v4646_v34 = vpop.eup %4645  ;;  %3295 = vst.msk [vmem:[%s7029_s3 + $0x2f0] sm:$0xff] %vm3200_vm1, %v4644_v33  ;;  %4657 = vtanh.f32 %v2821_v30 }
 0x27f   :  { %v4648_v35 = vpop.eup %4647  ;;  %3423 = vst.msk [vmem:[%s7029_s3 + $0x6f0] sm:$0xff] %vm3200_vm1, %v4646_v34 }
 0x280   :  { %v4650_v36 = vpop.eup %4649  ;;  %3296 = vst.msk [vmem:[%s7029_s3 + $0x2f8] sm:$0xff] %vm3200_vm1, %v4648_v35  ;;  %v2313_v37 = vpop.f32.mrb[196].mxu0 }
 0x281   :  { %v2825_v38 = vpop.f32.mrb[196].mxu1  ;;  %3424 = vst.msk [vmem:[%s7029_s3 + $0x6f8] sm:$0xff] %vm3200_vm1, %v4650_v36  ;;  %v2314_v39 = vadd.f32 %v6302_v3, %v2313_v37  ;;  %v2315_v41 = vpop.f32.mrb[197].mxu0 }
 0x282   :  { %v2826_v40 = vadd.f32 %v6302_v3, %v2825_v38  ;;  %v2827_v42 = vpop.f32.mrb[197].mxu1  ;;  %v2316_v43 = vpop.f32.mrb[198].mxu0 }
 0x283   :  { %v2828_v44 = vpop.f32.mrb[198].mxu1  ;;  %4659 = vtanh.f32 %v2314_v39  ;;  %v2317_v45 = vadd.f32 %v6302_v3, %v2316_v43  ;;  %v2318_v47 = vpop.f32.mrb[199].mxu0 }
 0x284   :  { %v2829_v46 = vadd.f32 %v6302_v3, %v2828_v44  ;;  %v2830_v48 = vpop.f32.mrb[199].mxu1  ;;  %4661 = vtanh.f32 %v2826_v40 }
 0x285   :  { %v4652_v49 = vpop.eup %4651  ;;  %4663 = vtanh.f32 %v2317_v45 }
 0x286   :  { %v4654_v50 = vpop.eup %4653  ;;  %3297 = vst.msk [vmem:[%s7029_s3 + $0x300] sm:$0xff] %vm3200_vm1, %v4652_v49  ;;  %4665 = vtanh.f32 %v2829_v46 }
 0x287   :  { %v4656_v51 = vpop.eup %4655  ;;  %3425 = vst.msk [vmem:[%s7029_s3 + $0x700] sm:$0xff] %vm3200_vm1, %v4654_v50 }
 0x288   :  { %v4658_v52 = vpop.eup %4657  ;;  %3298 = vst.msk [vmem:[%s7029_s3 + $0x308] sm:$0xff] %vm3200_vm1, %v4656_v51  ;;  %v2321_v53 = vpop.f32.mrb[200].mxu0 }
 0x289   :  { %v2833_v54 = vpop.f32.mrb[200].mxu1  ;;  %3426 = vst.msk [vmem:[%s7029_s3 + $0x708] sm:$0xff] %vm3200_vm1, %v4658_v52  ;;  %v2322_v55 = vadd.f32 %v6302_v3, %v2321_v53  ;;  %v2323_v58 = vpop.f32.mrb[201].mxu0 }
 0x28a   :  { %v2834_v57 = vadd.f32 %v6302_v3, %v2833_v54  ;;  %v2835_v59 = vpop.f32.mrb[201].mxu1  ;;  %v2324_v60 = vpop.f32.mrb[202].mxu0 }
 0x28b   :  { %v2836_v62 = vpop.f32.mrb[202].mxu1  ;;  %4667 = vtanh.f32 %v2322_v55  ;;  %v2325_v63 = vadd.f32 %v6302_v3, %v2324_v60  ;;  %v2326_v1 = vpop.f32.mrb[203].mxu0 }
 0x28c   :  { %v2837_v0 = vadd.f32 %v6302_v3, %v2836_v62  ;;  %v2838_v2 = vpop.f32.mrb[203].mxu1  ;;  %4669 = vtanh.f32 %v2834_v57 }
 0x28d   :  { %v4660_v4 = vpop.eup %4659  ;;  %4671 = vtanh.f32 %v2325_v63 }
 0x28e   :  { %v4662_v56 = vpop.eup %4661  ;;  %3299 = vst.msk [vmem:[%s7029_s3 + $0x310] sm:$0xff] %vm3200_vm1, %v4660_v4  ;;  %4673 = vtanh.f32 %v2837_v0 }
 0x28f   :  { %v4664_v5 = vpop.eup %4663  ;;  %3427 = vst.msk [vmem:[%s7029_s3 + $0x710] sm:$0xff] %vm3200_vm1, %v4662_v56 }
 0x290   :  { %v4666_v6 = vpop.eup %4665  ;;  %3300 = vst.msk [vmem:[%s7029_s3 + $0x318] sm:$0xff] %vm3200_vm1, %v4664_v5  ;;  %v2329_v7 = vpop.f32.mrb[204].mxu0 }
 0x291   :  { %v2841_v8 = vpop.f32.mrb[204].mxu1  ;;  %3428 = vst.msk [vmem:[%s7029_s3 + $0x718] sm:$0xff] %vm3200_vm1, %v4666_v6  ;;  %v2330_v9 = vadd.f32 %v6302_v3, %v2329_v7  ;;  %v2331_v10 = vpop.f32.mrb[205].mxu0 }
 0x292   :  { %v2842_v61 = vadd.f32 %v6302_v3, %v2841_v8  ;;  %v2843_v11 = vpop.f32.mrb[205].mxu1  ;;  %v2332_v12 = vpop.f32.mrb[206].mxu0 }
 0x293   :  { %v2844_v13 = vpop.f32.mrb[206].mxu1  ;;  %4675 = vtanh.f32 %v2330_v9  ;;  %v2333_v14 = vadd.f32 %v6302_v3, %v2332_v12  ;;  %v2334_v16 = vpop.f32.mrb[207].mxu0 }
 0x294   :  { %v2845_v15 = vadd.f32 %v6302_v3, %v2844_v13  ;;  %v2846_v17 = vpop.f32.mrb[207].mxu1  ;;  %4677 = vtanh.f32 %v2842_v61 }
 0x295   :  { %v4668_v18 = vpop.eup %4667  ;;  %4679 = vtanh.f32 %v2333_v14 }
 0x296   :  { %v4670_v19 = vpop.eup %4669  ;;  %3301 = vst.msk [vmem:[%s7029_s3 + $0x320] sm:$0xff] %vm3200_vm1, %v4668_v18  ;;  %4681 = vtanh.f32 %v2845_v15 }
 0x297   :  { %v4672_v20 = vpop.eup %4671  ;;  %3429 = vst.msk [vmem:[%s7029_s3 + $0x720] sm:$0xff] %vm3200_vm1, %v4670_v19 }
 0x298   :  { %v4674_v21 = vpop.eup %4673  ;;  %3302 = vst.msk [vmem:[%s7029_s3 + $0x328] sm:$0xff] %vm3200_vm1, %v4672_v20  ;;  %v2337_v3 = vpop.f32.mrb[208].mxu0 }
 0x299   :  { %v2849_v22 = vpop.f32.mrb[208].mxu1  ;;  %3430 = vst.msk [vmem:[%s7029_s3 + $0x728] sm:$0xff] %vm3200_vm1, %v4674_v21  ;;  %v2338_v24 = vadd.f32 %v6768_v23, %v2337_v3  ;;  %v2339_v26 = vpop.f32.mrb[209].mxu0 }
 0x29a   :  { %v2850_v25 = vadd.f32 %v6768_v23, %v2849_v22  ;;  %v2851_v27 = vpop.f32.mrb[209].mxu1  ;;  %v2340_v28 = vpop.f32.mrb[210].mxu0 }
 0x29b   :  { %v2852_v29 = vpop.f32.mrb[210].mxu1  ;;  %4683 = vtanh.f32 %v2338_v24  ;;  %v2341_v30 = vadd.f32 %v6768_v23, %v2340_v28  ;;  %v2342_v32 = vpop.f32.mrb[211].mxu0 }
 0x29c   :  { %v2853_v31 = vadd.f32 %v6768_v23, %v2852_v29  ;;  %v2854_v33 = vpop.f32.mrb[211].mxu1  ;;  %4685 = vtanh.f32 %v2850_v25 }
 0x29d   :  { %v4676_v34 = vpop.eup %4675  ;;  %4687 = vtanh.f32 %v2341_v30 }
 0x29e   :  { %v4678_v35 = vpop.eup %4677  ;;  %3303 = vst.msk [vmem:[%s7029_s3 + $0x330] sm:$0xff] %vm3200_vm1, %v4676_v34  ;;  %4689 = vtanh.f32 %v2853_v31 }
 0x29f   :  { %v4680_v36 = vpop.eup %4679  ;;  %3431 = vst.msk [vmem:[%s7029_s3 + $0x730] sm:$0xff] %vm3200_vm1, %v4678_v35 }
 0x2a0   :  { %v4682_v37 = vpop.eup %4681  ;;  %3304 = vst.msk [vmem:[%s7029_s3 + $0x338] sm:$0xff] %vm3200_vm1, %v4680_v36  ;;  %v2345_v38 = vpop.f32.mrb[212].mxu0 }
 0x2a1   :  { %v2857_v39 = vpop.f32.mrb[212].mxu1  ;;  %3432 = vst.msk [vmem:[%s7029_s3 + $0x738] sm:$0xff] %vm3200_vm1, %v4682_v37  ;;  %v2346_v40 = vadd.f32 %v6768_v23, %v2345_v38  ;;  %v2347_v42 = vpop.f32.mrb[213].mxu0 }
 0x2a2   :  { %v2858_v41 = vadd.f32 %v6768_v23, %v2857_v39  ;;  %v2859_v43 = vpop.f32.mrb[213].mxu1  ;;  %v2348_v44 = vpop.f32.mrb[214].mxu0 }
 0x2a3   :  { %v2860_v45 = vpop.f32.mrb[214].mxu1  ;;  %4691 = vtanh.f32 %v2346_v40  ;;  %v2349_v46 = vadd.f32 %v6768_v23, %v2348_v44  ;;  %v2350_v48 = vpop.f32.mrb[215].mxu0 }
 0x2a4   :  { %v2861_v47 = vadd.f32 %v6768_v23, %v2860_v45  ;;  %v2862_v49 = vpop.f32.mrb[215].mxu1  ;;  %4693 = vtanh.f32 %v2858_v41 }
 0x2a5   :  { %v4684_v50 = vpop.eup %4683  ;;  %4695 = vtanh.f32 %v2349_v46 }
 0x2a6   :  { %v4686_v51 = vpop.eup %4685  ;;  %3305 = vst.msk [vmem:[%s7029_s3 + $0x340] sm:$0xff] %vm3200_vm1, %v4684_v50  ;;  %4697 = vtanh.f32 %v2861_v47 }
 0x2a7   :  { %v4688_v52 = vpop.eup %4687  ;;  %3433 = vst.msk [vmem:[%s7029_s3 + $0x740] sm:$0xff] %vm3200_vm1, %v4686_v51 }
 0x2a8   :  { %v4690_v53 = vpop.eup %4689  ;;  %3306 = vst.msk [vmem:[%s7029_s3 + $0x348] sm:$0xff] %vm3200_vm1, %v4688_v52  ;;  %v2353_v54 = vpop.f32.mrb[216].mxu0 }
 0x2a9   :  { %v2865_v55 = vpop.f32.mrb[216].mxu1  ;;  %3434 = vst.msk [vmem:[%s7029_s3 + $0x748] sm:$0xff] %vm3200_vm1, %v4690_v53  ;;  %v2354_v57 = vadd.f32 %v6768_v23, %v2353_v54  ;;  %v2355_v59 = vpop.f32.mrb[217].mxu0 }
 0x2aa   :  { %v2866_v58 = vadd.f32 %v6768_v23, %v2865_v55  ;;  %v2867_v60 = vpop.f32.mrb[217].mxu1  ;;  %v2356_v62 = vpop.f32.mrb[218].mxu0 }
 0x2ab   :  { %v2868_v63 = vpop.f32.mrb[218].mxu1  ;;  %4699 = vtanh.f32 %v2354_v57  ;;  %v2357_v0 = vadd.f32 %v6768_v23, %v2356_v62  ;;  %v2358_v2 = vpop.f32.mrb[219].mxu0 }
 0x2ac   :  { %v2869_v1 = vadd.f32 %v6768_v23, %v2868_v63  ;;  %v2870_v4 = vpop.f32.mrb[219].mxu1  ;;  %4701 = vtanh.f32 %v2866_v58 }
 0x2ad   :  { %v4692_v56 = vpop.eup %4691  ;;  %4703 = vtanh.f32 %v2357_v0 }
 0x2ae   :  { %v4694_v5 = vpop.eup %4693  ;;  %3307 = vst.msk [vmem:[%s7029_s3 + $0x350] sm:$0xff] %vm3200_vm1, %v4692_v56  ;;  %4705 = vtanh.f32 %v2869_v1 }
 0x2af   :  { %v4696_v6 = vpop.eup %4695  ;;  %3435 = vst.msk [vmem:[%s7029_s3 + $0x750] sm:$0xff] %vm3200_vm1, %v4694_v5 }
 0x2b0   :  { %v4698_v7 = vpop.eup %4697  ;;  %3308 = vst.msk [vmem:[%s7029_s3 + $0x358] sm:$0xff] %vm3200_vm1, %v4696_v6  ;;  %v2361_v8 = vpop.f32.mrb[220].mxu0 }
 0x2b1   :  { %v2873_v9 = vpop.f32.mrb[220].mxu1  ;;  %3436 = vst.msk [vmem:[%s7029_s3 + $0x758] sm:$0xff] %vm3200_vm1, %v4698_v7  ;;  %v2362_v61 = vadd.f32 %v6768_v23, %v2361_v8  ;;  %v2363_v11 = vpop.f32.mrb[221].mxu0 }
 0x2b2   :  { %v2874_v10 = vadd.f32 %v6768_v23, %v2873_v9  ;;  %v2875_v12 = vpop.f32.mrb[221].mxu1  ;;  %v2364_v13 = vpop.f32.mrb[222].mxu0 }
 0x2b3   :  { %v2876_v14 = vpop.f32.mrb[222].mxu1  ;;  %4707 = vtanh.f32 %v2362_v61  ;;  %v2365_v15 = vadd.f32 %v6768_v23, %v2364_v13  ;;  %v2366_v17 = vpop.f32.mrb[223].mxu0 }
 0x2b4   :  { %v2877_v16 = vadd.f32 %v6768_v23, %v2876_v14  ;;  %v2878_v18 = vpop.f32.mrb[223].mxu1  ;;  %4709 = vtanh.f32 %v2874_v10 }
 0x2b5   :  { %v4700_v19 = vpop.eup %4699  ;;  %4711 = vtanh.f32 %v2365_v15 }
 0x2b6   :  { %v4702_v20 = vpop.eup %4701  ;;  %3309 = vst.msk [vmem:[%s7029_s3 + $0x360] sm:$0xff] %vm3200_vm1, %v4700_v19  ;;  %4713 = vtanh.f32 %v2877_v16 }
 0x2b7   :  { %v4704_v21 = vpop.eup %4703  ;;  %3437 = vst.msk [vmem:[%s7029_s3 + $0x760] sm:$0xff] %vm3200_vm1, %v4702_v20 }
 0x2b8   :  { %v4706_v3 = vpop.eup %4705  ;;  %3310 = vst.msk [vmem:[%s7029_s3 + $0x368] sm:$0xff] %vm3200_vm1, %v4704_v21  ;;  %v2369_v22 = vpop.f32.mrb[224].mxu0 }
 0x2b9   :  { %v2881_v24 = vpop.f32.mrb[224].mxu1  ;;  %3438 = vst.msk [vmem:[%s7029_s3 + $0x768] sm:$0xff] %vm3200_vm1, %v4706_v3  ;;  %v2370_v25 = vadd.f32 %v6768_v23, %v2369_v22  ;;  %v2371_v27 = vpop.f32.mrb[225].mxu0 }
 0x2ba   :  { %v2882_v26 = vadd.f32 %v6768_v23, %v2881_v24  ;;  %v2883_v28 = vpop.f32.mrb[225].mxu1  ;;  %v2372_v29 = vpop.f32.mrb[226].mxu0 }
 0x2bb   :  { %v2884_v30 = vpop.f32.mrb[226].mxu1  ;;  %4715 = vtanh.f32 %v2370_v25  ;;  %v2373_v31 = vadd.f32 %v6768_v23, %v2372_v29  ;;  %v2374_v33 = vpop.f32.mrb[227].mxu0 }
 0x2bc   :  { %v2885_v32 = vadd.f32 %v6768_v23, %v2884_v30  ;;  %v2886_v34 = vpop.f32.mrb[227].mxu1  ;;  %4717 = vtanh.f32 %v2882_v26 }
 0x2bd   :  { %v4708_v35 = vpop.eup %4707  ;;  %4719 = vtanh.f32 %v2373_v31 }
 0x2be   :  { %v4710_v36 = vpop.eup %4709  ;;  %3311 = vst.msk [vmem:[%s7029_s3 + $0x370] sm:$0xff] %vm3200_vm1, %v4708_v35  ;;  %4721 = vtanh.f32 %v2885_v32 }
 0x2bf   :  { %v4712_v37 = vpop.eup %4711  ;;  %3439 = vst.msk [vmem:[%s7029_s3 + $0x770] sm:$0xff] %vm3200_vm1, %v4710_v36 }
 0x2c0   :  { %v4714_v38 = vpop.eup %4713  ;;  %3312 = vst.msk [vmem:[%s7029_s3 + $0x378] sm:$0xff] %vm3200_vm1, %v4712_v37  ;;  %v2377_v39 = vpop.f32.mrb[228].mxu0 }
 0x2c1   :  { %v2889_v40 = vpop.f32.mrb[228].mxu1  ;;  %3440 = vst.msk [vmem:[%s7029_s3 + $0x778] sm:$0xff] %vm3200_vm1, %v4714_v38  ;;  %v2378_v41 = vadd.f32 %v6768_v23, %v2377_v39  ;;  %v2379_v43 = vpop.f32.mrb[229].mxu0 }
 0x2c2   :  { %v2890_v42 = vadd.f32 %v6768_v23, %v2889_v40  ;;  %v2891_v44 = vpop.f32.mrb[229].mxu1  ;;  %v2380_v45 = vpop.f32.mrb[230].mxu0 }
 0x2c3   :  { %v2892_v46 = vpop.f32.mrb[230].mxu1  ;;  %4723 = vtanh.f32 %v2378_v41  ;;  %v2381_v47 = vadd.f32 %v6768_v23, %v2380_v45  ;;  %v2382_v49 = vpop.f32.mrb[231].mxu0 }
 0x2c4   :  { %v2893_v48 = vadd.f32 %v6768_v23, %v2892_v46  ;;  %v2894_v50 = vpop.f32.mrb[231].mxu1  ;;  %4725 = vtanh.f32 %v2890_v42 }
 0x2c5   :  { %v4716_v51 = vpop.eup %4715  ;;  %4727 = vtanh.f32 %v2381_v47 }
 0x2c6   :  { %v4718_v52 = vpop.eup %4717  ;;  %3313 = vst.msk [vmem:[%s7029_s3 + $0x380] sm:$0xff] %vm3200_vm1, %v4716_v51  ;;  %4729 = vtanh.f32 %v2893_v48 }
 0x2c7   :  { %v4720_v53 = vpop.eup %4719  ;;  %3441 = vst.msk [vmem:[%s7029_s3 + $0x780] sm:$0xff] %vm3200_vm1, %v4718_v52 }
 0x2c8   :  { %v4722_v54 = vpop.eup %4721  ;;  %3314 = vst.msk [vmem:[%s7029_s3 + $0x388] sm:$0xff] %vm3200_vm1, %v4720_v53  ;;  %v2385_v55 = vpop.f32.mrb[232].mxu0 }
 0x2c9   :  { %v2897_v57 = vpop.f32.mrb[232].mxu1  ;;  %3442 = vst.msk [vmem:[%s7029_s3 + $0x788] sm:$0xff] %vm3200_vm1, %v4722_v54  ;;  %v2386_v58 = vadd.f32 %v6768_v23, %v2385_v55  ;;  %v2387_v60 = vpop.f32.mrb[233].mxu0 }
 0x2ca   :  { %v2898_v59 = vadd.f32 %v6768_v23, %v2897_v57  ;;  %v2899_v62 = vpop.f32.mrb[233].mxu1  ;;  %v2388_v63 = vpop.f32.mrb[234].mxu0 }
 0x2cb   :  { %v2900_v0 = vpop.f32.mrb[234].mxu1  ;;  %4731 = vtanh.f32 %v2386_v58  ;;  %v2389_v1 = vadd.f32 %v6768_v23, %v2388_v63  ;;  %v2390_v4 = vpop.f32.mrb[235].mxu0 }
 0x2cc   :  { %v2901_v2 = vadd.f32 %v6768_v23, %v2900_v0  ;;  %v2902_v56 = vpop.f32.mrb[235].mxu1  ;;  %4733 = vtanh.f32 %v2898_v59 }
 0x2cd   :  { %v4724_v5 = vpop.eup %4723  ;;  %4735 = vtanh.f32 %v2389_v1 }
 0x2ce   :  { %v4726_v6 = vpop.eup %4725  ;;  %3315 = vst.msk [vmem:[%s7029_s3 + $0x390] sm:$0xff] %vm3200_vm1, %v4724_v5  ;;  %4737 = vtanh.f32 %v2901_v2 }
 0x2cf   :  { %v4728_v7 = vpop.eup %4727  ;;  %3443 = vst.msk [vmem:[%s7029_s3 + $0x790] sm:$0xff] %vm3200_vm1, %v4726_v6 }
 0x2d0   :  { %v4730_v8 = vpop.eup %4729  ;;  %3316 = vst.msk [vmem:[%s7029_s3 + $0x398] sm:$0xff] %vm3200_vm1, %v4728_v7  ;;  %v2393_v9 = vpop.f32.mrb[236].mxu0 }
 0x2d1   :  { %v2905_v61 = vpop.f32.mrb[236].mxu1  ;;  %3444 = vst.msk [vmem:[%s7029_s3 + $0x798] sm:$0xff] %vm3200_vm1, %v4730_v8  ;;  %v2394_v10 = vadd.f32 %v6768_v23, %v2393_v9  ;;  %v2395_v12 = vpop.f32.mrb[237].mxu0 }
 0x2d2   :  { %v2906_v11 = vadd.f32 %v6768_v23, %v2905_v61  ;;  %v2907_v13 = vpop.f32.mrb[237].mxu1  ;;  %v2396_v14 = vpop.f32.mrb[238].mxu0 }
 0x2d3   :  { %v2908_v15 = vpop.f32.mrb[238].mxu1  ;;  %4739 = vtanh.f32 %v2394_v10  ;;  %v2397_v16 = vadd.f32 %v6768_v23, %v2396_v14  ;;  %v2398_v18 = vpop.f32.mrb[239].mxu0 }
 0x2d4   :  { %v2909_v17 = vadd.f32 %v6768_v23, %v2908_v15  ;;  %v2910_v19 = vpop.f32.mrb[239].mxu1  ;;  %4741 = vtanh.f32 %v2906_v11 }
 0x2d5   :  { %v4732_v20 = vpop.eup %4731  ;;  %4743 = vtanh.f32 %v2397_v16 }
 0x2d6   :  { %v4734_v21 = vpop.eup %4733  ;;  %3317 = vst.msk [vmem:[%s7029_s3 + $0x3a0] sm:$0xff] %vm3200_vm1, %v4732_v20  ;;  %4745 = vtanh.f32 %v2909_v17 }
 0x2d7   :  { %v4736_v3 = vpop.eup %4735  ;;  %3445 = vst.msk [vmem:[%s7029_s3 + $0x7a0] sm:$0xff] %vm3200_vm1, %v4734_v21 }
 0x2d8   :  { %v4738_v22 = vpop.eup %4737  ;;  %3318 = vst.msk [vmem:[%s7029_s3 + $0x3a8] sm:$0xff] %vm3200_vm1, %v4736_v3  ;;  %v2401_v24 = vpop.f32.mrb[240].mxu0 }
 0x2d9   :  { %v2913_v25 = vpop.f32.mrb[240].mxu1  ;;  %3446 = vst.msk [vmem:[%s7029_s3 + $0x7a8] sm:$0xff] %vm3200_vm1, %v4738_v22  ;;  %v2402_v26 = vadd.f32 %v6768_v23, %v2401_v24  ;;  %v2403_v28 = vpop.f32.mrb[241].mxu0 }
 0x2da   :  { %v2914_v27 = vadd.f32 %v6768_v23, %v2913_v25  ;;  %v2915_v29 = vpop.f32.mrb[241].mxu1  ;;  %v2404_v30 = vpop.f32.mrb[242].mxu0 }
 0x2db   :  { %v2916_v31 = vpop.f32.mrb[242].mxu1  ;;  %4747 = vtanh.f32 %v2402_v26  ;;  %v2405_v32 = vadd.f32 %v6768_v23, %v2404_v30  ;;  %v2406_v34 = vpop.f32.mrb[243].mxu0 }
 0x2dc   :  { %v2917_v33 = vadd.f32 %v6768_v23, %v2916_v31  ;;  %v2918_v35 = vpop.f32.mrb[243].mxu1  ;;  %4749 = vtanh.f32 %v2914_v27 }
 0x2dd   :  { %v4740_v36 = vpop.eup %4739  ;;  %4751 = vtanh.f32 %v2405_v32 }
 0x2de   :  { %v4742_v37 = vpop.eup %4741  ;;  %3319 = vst.msk [vmem:[%s7029_s3 + $0x3b0] sm:$0xff] %vm3200_vm1, %v4740_v36  ;;  %4753 = vtanh.f32 %v2917_v33 }
 0x2df   :  { %v4744_v38 = vpop.eup %4743  ;;  %3447 = vst.msk [vmem:[%s7029_s3 + $0x7b0] sm:$0xff] %vm3200_vm1, %v4742_v37 }
 0x2e0   :  { %v4746_v39 = vpop.eup %4745  ;;  %3320 = vst.msk [vmem:[%s7029_s3 + $0x3b8] sm:$0xff] %vm3200_vm1, %v4744_v38  ;;  %v2409_v40 = vpop.f32.mrb[244].mxu0 }
 0x2e1   :  { %v2921_v41 = vpop.f32.mrb[244].mxu1  ;;  %3448 = vst.msk [vmem:[%s7029_s3 + $0x7b8] sm:$0xff] %vm3200_vm1, %v4746_v39  ;;  %v2410_v42 = vadd.f32 %v6768_v23, %v2409_v40  ;;  %v2411_v44 = vpop.f32.mrb[245].mxu0 }
 0x2e2   :  { %v2922_v43 = vadd.f32 %v6768_v23, %v2921_v41  ;;  %v2923_v45 = vpop.f32.mrb[245].mxu1  ;;  %v2412_v46 = vpop.f32.mrb[246].mxu0 }
 0x2e3   :  { %v2924_v47 = vpop.f32.mrb[246].mxu1  ;;  %4755 = vtanh.f32 %v2410_v42  ;;  %v2413_v48 = vadd.f32 %v6768_v23, %v2412_v46  ;;  %v2414_v50 = vpop.f32.mrb[247].mxu0 }
 0x2e4   :  { %v2925_v49 = vadd.f32 %v6768_v23, %v2924_v47  ;;  %v2926_v51 = vpop.f32.mrb[247].mxu1  ;;  %4757 = vtanh.f32 %v2922_v43 }
 0x2e5   :  { %v4748_v52 = vpop.eup %4747  ;;  %4759 = vtanh.f32 %v2413_v48 }
 0x2e6   :  { %v4750_v53 = vpop.eup %4749  ;;  %3321 = vst.msk [vmem:[%s7029_s3 + $0x3c0] sm:$0xff] %vm3200_vm1, %v4748_v52  ;;  %4761 = vtanh.f32 %v2925_v49 }
 0x2e7   :  { %v4752_v54 = vpop.eup %4751  ;;  %3449 = vst.msk [vmem:[%s7029_s3 + $0x7c0] sm:$0xff] %vm3200_vm1, %v4750_v53 }
 0x2e8   :  { %v4754_v55 = vpop.eup %4753  ;;  %3322 = vst.msk [vmem:[%s7029_s3 + $0x3c8] sm:$0xff] %vm3200_vm1, %v4752_v54  ;;  %v2417_v57 = vpop.f32.mrb[248].mxu0 }
 0x2e9   :  { %v2929_v58 = vpop.f32.mrb[248].mxu1  ;;  %3450 = vst.msk [vmem:[%s7029_s3 + $0x7c8] sm:$0xff] %vm3200_vm1, %v4754_v55  ;;  %v2418_v59 = vadd.f32 %v6768_v23, %v2417_v57  ;;  %v2419_v62 = vpop.f32.mrb[249].mxu0 }
 0x2ea   :  { %v2930_v60 = vadd.f32 %v6768_v23, %v2929_v58  ;;  %v2931_v63 = vpop.f32.mrb[249].mxu1  ;;  %v2420_v0 = vpop.f32.mrb[250].mxu0 }
 0x2eb   :  { %v2932_v1 = vpop.f32.mrb[250].mxu1  ;;  %4763 = vtanh.f32 %v2418_v59  ;;  %v2421_v2 = vadd.f32 %v6768_v23, %v2420_v0  ;;  %v2422_v56 = vpop.f32.mrb[251].mxu0 }
 0x2ec   :  { %v2933_v4 = vadd.f32 %v6768_v23, %v2932_v1  ;;  %v2934_v5 = vpop.f32.mrb[251].mxu1  ;;  %4765 = vtanh.f32 %v2930_v60 }
 0x2ed   :  { %v4756_v6 = vpop.eup %4755  ;;  %4767 = vtanh.f32 %v2421_v2 }
 0x2ee   :  { %v4758_v7 = vpop.eup %4757  ;;  %3323 = vst.msk [vmem:[%s7029_s3 + $0x3d0] sm:$0xff] %vm3200_vm1, %v4756_v6  ;;  %4769 = vtanh.f32 %v2933_v4 }
 0x2ef   :  { %v4760_v8 = vpop.eup %4759  ;;  %3451 = vst.msk [vmem:[%s7029_s3 + $0x7d0] sm:$0xff] %vm3200_vm1, %v4758_v7 }
 0x2f0   :  { %v4762_v9 = vpop.eup %4761  ;;  %3324 = vst.msk [vmem:[%s7029_s3 + $0x3d8] sm:$0xff] %vm3200_vm1, %v4760_v8  ;;  %v2425_v61 = vpop.f32.mrb[252].mxu0 }
 0x2f1   :  { %v2937_v10 = vpop.f32.mrb[252].mxu1  ;;  %3452 = vst.msk [vmem:[%s7029_s3 + $0x7d8] sm:$0xff] %vm3200_vm1, %v4762_v9  ;;  %v2426_v11 = vadd.f32 %v6768_v23, %v2425_v61  ;;  %v2427_v13 = vpop.f32.mrb[253].mxu0 }
 0x2f2   :  { %v2938_v12 = vadd.f32 %v6768_v23, %v2937_v10  ;;  %v2939_v14 = vpop.f32.mrb[253].mxu1  ;;  %v2428_v15 = vpop.f32.mrb[254].mxu0 }
 0x2f3   :  { %v2940_v16 = vpop.f32.mrb[254].mxu1  ;;  %4771 = vtanh.f32 %v2426_v11  ;;  %v2429_v17 = vadd.f32 %v6768_v23, %v2428_v15  ;;  %v2430_v19 = vpop.f32.mrb[255].mxu0 }
 0x2f4   :  { %v2941_v18 = vadd.f32 %v6768_v23, %v2940_v16  ;;  %v2942_v20 = vpop.f32.mrb[255].mxu1  ;;  %4773 = vtanh.f32 %v2938_v12 }
 0x2f5   :  { %v4764_v21 = vpop.eup %4763  ;;  %4775 = vtanh.f32 %v2429_v17 }
 0x2f6   :  { %v4766_v3 = vpop.eup %4765  ;;  %3325 = vst.msk [vmem:[%s7029_s3 + $0x3e0] sm:$0xff] %vm3200_vm1, %v4764_v21  ;;  %4777 = vtanh.f32 %v2941_v18 }
 0x2f7   :  { %v4768_v22 = vpop.eup %4767  ;;  %3453 = vst.msk [vmem:[%s7029_s3 + $0x7e0] sm:$0xff] %vm3200_vm1, %v4766_v3 }
 0x2f8   :  { %v4770_v24 = vpop.eup %4769  ;;  %3326 = vst.msk [vmem:[%s7029_s3 + $0x3e8] sm:$0xff] %vm3200_vm1, %v4768_v22 }
 0x2f9   :  { %3454 = vst.msk [vmem:[%s7029_s3 + $0x7e8] sm:$0xff] %vm3200_vm1, %v4770_v24 }
 0x2fd   :  { %v4772_v23 = vpop.eup %4771 }
 0x2fe   :  { %v4774_v25 = vpop.eup %4773  ;;  %3327 = vst.msk [vmem:[%s7029_s3 + $0x3f0] sm:$0xff] %vm3200_vm1, %v4772_v23 }
 0x2ff   :  { %v4776_v26 = vpop.eup %4775  ;;  %3455 = vst.msk [vmem:[%s7029_s3 + $0x7f0] sm:$0xff] %vm3200_vm1, %v4774_v25 }
 0x300   :  { %v4778_v27 = vpop.eup %4777  ;;  %3328 = vst.msk [vmem:[%s7029_s3 + $0x3f8] sm:$0xff] %vm3200_vm1, %v4776_v26 }
 0x301   :  { %3456 = vst.msk [vmem:[%s7029_s3 + $0x7f8] sm:$0xff] %vm3200_vm1, %v4778_v27 }

</bundles_post_ra>
